<compile_context>
chip_gen: v7x
topology: tpu7x:2x2x1
jax: 0.10.0
libtpu: 0.0.40
codegen_flags: <defaults>
</compile_context>

<pallas_src>
import jax
import jax.numpy as jnp
from jax.experimental import pallas as pl
from jax.experimental.pallas import tpu as pltpu
from math import sqrt

C = 64            # channels of the PyTorch module (conv3x3(64, 64))
KH = KW = 3       # kernel size


# --------------------------------------------------------------------------- kernel
def _resblock_kernel(x_ref, w1_ref, b1_ref, w2_ref, b2_ref, o_ref, mid_ref):
    # x_ref  : (1, TH+4, W+2, CP) f32  -- pre-padded window (2-row / 1-col zero halo)
    # w*_ref : (3, 3, CP, CP)     bf16 -- per-(kh,kw) block-diagonal weights
    # b*_ref : (1, CP)            f32
    # o_ref  : (1, TH, W, CP)     f32
    # mid_ref: (TH+2, W+2, CP)    bf16 scratch: relu(conv1) + zero SAME-padding border
    TH, W, CP = o_ref.shape[1], o_ref.shape[2], o_ref.shape[3]
    TH2 = TH + 2
    h = pl.program_id(1)
    n_h = pl.num_programs(1)

    def conv_taps(tap_fn, w_ref):
        # 9 accumulating K=CP MXU dots fed directly from ref slices (no concat buffer).
        acc = None
        for kh in range(KH):
            for kw in range(KW):
                d = jnp.dot(tap_fn(kh, kw), w_ref[kh, kw],
                            preferred_element_type=jnp.float32)
                acc = d if acc is None else acc + d
        return acc

    # ---- conv1 over TH+2 rows (1-row halo for conv2) ; bias + ReLU in the VALU op --
    def x_tap(kh, kw):
        return (x_ref[0, kh:kh + TH2, kw:kw + W, :]
                .astype(jnp.bfloat16)
                .reshape(TH2 * W, CP))

    acc1 = conv_taps(x_tap, w1_ref)                              # (TH2*W, CP) f32
    mid = jnp.maximum(acc1 + b1_ref[...], 0.0).astype(jnp.bfloat16)

    # ---- stage relu(conv1) into bf16 scratch with explicit zero SAME-padding border -
    mid_ref[:, 1:W + 1, :] = mid.reshape(TH2, W, CP)
    zcol = jnp.zeros((TH2, 1, CP), jnp.bfloat16)
    mid_ref[:, 0:1, :] = zcol                                    # left  W border
    mid_ref[:, W + 1:W + 2, :] = zcol                            # right W border
    zrow = jnp.zeros((1, W + 2, CP), jnp.bfloat16)

    @pl.when(h == 0)                                             # top image border
    def _():
        mid_ref[0:1, :, :] = zrow

    @pl.when(h == n_h - 1)                                       # bottom image border
    def _():
        mid_ref[TH + 1:TH + 2, :, :] = zrow

    # ---- conv2 over TH rows ; bias + residual + ReLU in f32 -------------------------
    def m_tap(kh, kw):
        return mid_ref[kh:kh + TH, kw:kw + W, :].reshape(TH * W, CP)

    acc2 = conv_taps(m_tap, w2_ref)                              # (TH*W, CP) f32
    residual = x_ref[0, 2:TH + 2, 1:W + 1, :]                    # re-read, not held live
    out = acc2.reshape(TH, W, CP) + b2_ref[...].reshape(1, 1, CP) + residual
    o_ref[0] = jnp.maximum(out, 0.0).astype(o_ref.dtype)


# --------------------------------------------------------------------------- wrapper
def _pick_pack(n_batch):
    """Images packed on the lane axis: 2 on v5e (128-wide MXU), 4 on v6e/v7x."""
    pref = 2
    try:
        kind = jax.devices()[0].device_kind.lower()
        if ("v6" in kind) or ("v7" in kind):
            pref = 4
    except Exception:
        pass
    cap = 2 * max(1, -(-n_batch // 2))       # never pad by more than one extra pair
    return max(2, min(pref, cap))


def _choose_tile_h(H, W, CP, budget_bytes=36 << 20):
    """Largest divisor of H whose per-step VMEM estimate fits the budget."""
    def est(th):
        xblk = (th + 4) * (W + 2) * CP * 4          # f32 input block
        oblk = th * W * CP * 4                      # f32 output block
        mids = (th + 2) * (W + 2) * CP * 2          # bf16 scratch
        wts = 2 * KH * KW * CP * CP * 2             # bf16 weights (both convs)
        tmp = (th + 2) * W * CP * (2 + 4) + th * W * CP * 4   # tap copies + f32 acc
        return 2 * (xblk + oblk + wts) + mids + 2 * tmp
    for th in sorted((d for d in range(1, H + 1) if H % d == 0), reverse=True):
        if est(th) <= budget_bytes:
            return th
    return 1


def _pack_weights(w, pack):
    # PyTorch OIHW (Cout, Cin, 3, 3) -> (kh, kw, Cin, Cout), block-diagonal over images.
    wt = jnp.transpose(w, (2, 3, 1, 0))                          # (3, 3, C, C)
    CP = pack * C
    wbd = jnp.zeros((KH, KW, CP, CP), jnp.float32)
    for p in range(pack):
        wbd = wbd.at[:, :, p * C:(p + 1) * C, p * C:(p + 1) * C].set(wt)
    return wbd.astype(jnp.bfloat16)


def conv_relu_res_relu_block(x_nchw, w1, b1, w2, b2, *, tile_h=None, images_per_pack=None):
    """x_nchw: (N, 64, H, W) f32; w*: (64, 64, 3, 3) OIHW (PyTorch); b*: (64,)."""
    N, Cc, H, W = x_nchw.shape
    assert Cc == C

    pack = images_per_pack if images_per_pack is not None else _pick_pack(N)
    CP = pack * C

    n_pad = (-N) % pack
    if n_pad:
        x_nchw = jnp.concatenate(
            [x_nchw, jnp.zeros((n_pad, C, H, W), x_nchw.dtype)], axis=0)
    NP = (N + n_pad) // pack

    # NCHW -> packed (NP, H, W, pack*C); SAME-padding halo (2 rows / 1 col of zeros)
    # is folded into the same wrapper repack so the kernel never stages x.
    x_pack = jnp.transpose(x_nchw.reshape(NP, pack, C, H, W),
                           (0, 3, 4, 1, 2)).reshape(NP, H, W, CP)
    x_padded = jnp.pad(x_pack, ((0, 0), (2, 2), (1, 1), (0, 0)))

    if tile_h is None:
        tile_h = _choose_tile_h(H, W, CP)
    assert H % tile_h == 0, "tile_h must divide H"   # TODO(synk): ragged last tile
    n_h = H // tile_h

    w1p, w2p = _pack_weights(w1, pack), _pack_weights(w2, pack)
    b1p = jnp.tile(b1, pack).reshape(1, CP).astype(jnp.float32)
    b2p = jnp.tile(b2, pack).reshape(1, CP).astype(jnp.float32)

    def build_call(th, nh):
        if nh == 1:
            # Whole-image tile: plain blocked spec (block == full padded extent).
            x_spec = pl.BlockSpec((1, th + 4, W + 2, CP), lambda n, h: (n, 0, 0, 0))
        else:
            # Overlapping (TH+4)-row windows: element offsets along H give the 2-row halo.
            x_spec = pl.BlockSpec((1, pl.Element(th + 4), W + 2, CP),
                                  lambda n, h: (n, h * th, 0, 0))
        return pl.pallas_call(
            _resblock_kernel,
            out_shape=jax.ShapeDtypeStruct((NP, H, W, CP), x_pack.dtype),
            grid_spec=pltpu.PrefetchScalarGridSpec(
                num_scalar_prefetch=0,
                grid=(NP, nh),
                in_specs=[
                    x_spec,
                    pl.BlockSpec((KH, KW, CP, CP), lambda n, h: (0, 0, 0, 0)),
                    pl.BlockSpec((1, CP), lambda n, h: (0, 0)),
                    pl.BlockSpec((KH, KW, CP, CP), lambda n, h: (0, 0, 0, 0)),
                    pl.BlockSpec((1, CP), lambda n, h: (0, 0)),
                ],
                out_specs=pl.BlockSpec((1, th, W, CP), lambda n, h: (n, h, 0, 0)),
                scratch_shapes=[pltpu.VMEM((th + 2, W + 2, CP), jnp.bfloat16)],
            ),
            compiler_params=pltpu.CompilerParams(
                dimension_semantics=("parallel", "parallel"),
                vmem_limit_bytes=48 * 1024 * 1024),
        )

    try:
        out_pack = jax.block_until_ready(
            build_call(tile_h, n_h)(x_padded, w1p, b1p, w2p, b2p))
    except Exception:
        # Safety net: whole-image tile (no Element halo indexing required).
        out_pack = jax.block_until_ready(
            build_call(H, 1)(x_padded, w1p, b1p, w2p, b2p))

    out = jnp.transpose(out_pack.reshape(NP, H, W, pack, C),
                        (0, 3, 4, 1, 2)).reshape(NP * pack, C, H, W)
    return out[:N]


# ------------------------------------------------------------------------ references
def _reference_f32(x, w1, b1, w2, b2):
    dn = ('NCHW', 'OIHW', 'NCHW')
    out = jax.lax.conv_general_dilated(x, w1, (1, 1), 'SAME', dimension_numbers=dn)
    out = jnp.maximum(out + b1[None, :, None, None], 0.0)
    out = jax.lax.conv_general_dilated(out, w2, (1, 1), 'SAME', dimension_numbers=dn)
    return jnp.maximum(out + b2[None, :, None, None] + x, 0.0)


def _reference_bf16(x, w1, b1, w2, b2):
    # Same numerics as the kernel: bf16 matmul operands, f32 accumulation,
    # f32 bias / residual / ReLU, bf16 intermediate.
    dn = ('NCHW', 'OIHW', 'NCHW')
    out = jax.lax.conv_general_dilated(
        x.astype(jnp.bfloat16), w1.astype(jnp.bfloat16), (1, 1), 'SAME',
        dimension_numbers=dn, preferred_element_type=jnp.float32)
    out = jnp.maximum(out + b1[None, :, None, None], 0.0)
    out = jax.lax.conv_general_dilated(
        out.astype(jnp.bfloat16), w2.astype(jnp.bfloat16), (1, 1), 'SAME',
        dimension_numbers=dn, preferred_element_type=jnp.float32)
    return jnp.maximum(out + b2[None, :, None, None] + x, 0.0)


if __name__ == "__main__":
    key = jax.random.PRNGKey(0)
    kx, k1, k2, k3, k4 = jax.random.split(key, 5)

    # Small shapes consistent with the module: batch=2, 64 channels, 16x16 spatial.
    N, H, W = 2, 16, 16
    x = jax.random.normal(kx, (N, C, H, W), dtype=jnp.float32)

    # PyTorch-like init: U(-1/sqrt(fan_in), 1/sqrt(fan_in)), fan_in = 64*3*3.
    bound = 1.0 / sqrt(C * KH * KW)
    w1 = jax.random.uniform(k1, (C, C, KH, KW), jnp.float32, -bound, bound)
    b1 = jax.random.uniform(k2, (C,), jnp.float32, -bound, bound)
    w2 = jax.random.uniform(k3, (C, C, KH, KW), jnp.float32, -bound, bound)
    b2 = jax.random.uniform(k4, (C,), jnp.float32, -bound, bound)

    ref_bf16 = _reference_bf16(x, w1, b1, w2, b2)
    ref_f32 = _reference_f32(x, w1, b1, w2, b2)

    # H-tiled path: 2 tiles of 8 rows, exercising the 2-row halo / border logic.
    out_tiled = jax.block_until_ready(
        conv_relu_res_relu_block(x, w1, b1, w2, b2, tile_h=8))
    assert out_tiled.shape == (N, C, H, W)
    assert jnp.allclose(out_tiled, ref_bf16, atol=5e-3, rtol=5e-3), \
        "tiled: mismatch vs bf16-matched reference"
    assert jnp.allclose(out_tiled, ref_f32, atol=5e-2, rtol=5e-2), \
        "tiled: mismatch vs f32 reference"

    # Auto-tiled path with an odd batch (exercises batch padding + per-chip packing).
    x3 = jax.random.normal(jax.random.PRNGKey(1), (3, C, H, W), dtype=jnp.float32)
    out3 = jax.block_until_ready(conv_relu_res_relu_block(x3, w1, b1, w2, b2))
    ref3 = _reference_f32(x3, w1, b1, w2, b2)
    assert out3.shape == (3, C, H, W)
    assert jnp.allclose(out3, ref3, atol=5e-2, rtol=5e-2), \
        "auto: mismatch vs f32 reference"

    print("KERNEL_OK")
</pallas_src>

<mosaic_0001>
module attributes {stable_mosaic.version = 11 : i64} {
  func.func @_resblock_kernel(%arg0: i32, %arg1: i32, %arg2: memref<1x20x18x128xf32, #tpu.memory_space<vmem>>, %arg3: memref<3x3x128x128xbf16, #tpu.memory_space<vmem>>, %arg4: memref<1x128xf32, #tpu.memory_space<vmem>>, %arg5: memref<3x3x128x128xbf16, #tpu.memory_space<vmem>>, %arg6: memref<1x128xf32, #tpu.memory_space<vmem>>, %arg7: memref<1x16x16x128xf32, #tpu.memory_space<vmem>>, %arg8: memref<18x18x128xbf16, #tpu.memory_space<vmem>>) attributes {dimension_semantics = [#tpu.dimension_semantics<parallel>, #tpu.dimension_semantics<parallel>], iteration_bounds = array<i64: 1, 1>, scalar_prefetch = 0 : i64, scratch_operands = 1 : i64, tpu.core_type = #tpu.core_type<tc>, window_params = [{transform_indices = @transform_0, window_bounds = array<i64: 1, 20, 18, 128>}, {pipeline_mode = #tpu.pipeline_mode<synchronous>, transform_indices = @transform_1, window_bounds = array<i64: 3, 3, 128, 128>}, {pipeline_mode = #tpu.pipeline_mode<synchronous>, transform_indices = @transform_2, window_bounds = array<i64: 1, 128>}, {pipeline_mode = #tpu.pipeline_mode<synchronous>, transform_indices = @transform_3, window_bounds = array<i64: 3, 3, 128, 128>}, {pipeline_mode = #tpu.pipeline_mode<synchronous>, transform_indices = @transform_4, window_bounds = array<i64: 1, 128>}, {transform_indices = @transform_5, window_bounds = array<i64: 1, 16, 16, 128>}]} {
    %c0 = arith.constant 0 : index
    %c0_0 = arith.constant 0 : index
    %c0_1 = arith.constant 0 : index
    %c0_2 = arith.constant 0 : index
    %0 = vector.load %arg2[%c0, %c0_0, %c0_1, %c0_2] : memref<1x20x18x128xf32, #tpu.memory_space<vmem>>, vector<1x18x16x128xf32>
    %1 = vector.shape_cast %0 : vector<1x18x16x128xf32> to vector<18x16x128xf32>
    %2 = arith.truncf %1 : vector<18x16x128xf32> to vector<18x16x128xbf16>
    %3 = vector.shape_cast %2 : vector<18x16x128xbf16> to vector<288x128xbf16>
    %c0_3 = arith.constant 0 : index
    %c0_4 = arith.constant 0 : index
    %c0_5 = arith.constant 0 : index
    %c0_6 = arith.constant 0 : index
    %4 = vector.load %arg3[%c0_3, %c0_4, %c0_5, %c0_6] : memref<3x3x128x128xbf16, #tpu.memory_space<vmem>>, vector<1x1x128x128xbf16>
    %5 = vector.shape_cast %4 : vector<1x1x128x128xbf16> to vector<128x128xbf16>
    %cst = arith.constant dense<0.000000e+00> : vector<288x128xf32>
    %6 = tpu.matmul %3, %5, %cst {dimension_numbers = #tpu.dot_dimension_numbers<[1], [0], [0], [1], [0, 0, 1, 1], [], []>} : vector<288x128xbf16>, vector<128x128xbf16>, vector<288x128xf32> -> vector<288x128xf32>
    %c0_7 = arith.constant 0 : index
    %c0_8 = arith.constant 0 : index
    %c1 = arith.constant 1 : index
    %c0_9 = arith.constant 0 : index
    %7 = vector.load %arg2[%c0_7, %c0_8, %c1, %c0_9] : memref<1x20x18x128xf32, #tpu.memory_space<vmem>>, vector<1x18x16x128xf32>
    %8 = vector.shape_cast %7 : vector<1x18x16x128xf32> to vector<18x16x128xf32>
    %9 = arith.truncf %8 : vector<18x16x128xf32> to vector<18x16x128xbf16>
    %10 = vector.shape_cast %9 : vector<18x16x128xbf16> to vector<288x128xbf16>
    %c0_10 = arith.constant 0 : index
    %c1_11 = arith.constant 1 : index
    %c0_12 = arith.constant 0 : index
    %c0_13 = arith.constant 0 : index
    %11 = vector.load %arg3[%c0_10, %c1_11, %c0_12, %c0_13] : memref<3x3x128x128xbf16, #tpu.memory_space<vmem>>, vector<1x1x128x128xbf16>
    %12 = vector.shape_cast %11 : vector<1x1x128x128xbf16> to vector<128x128xbf16>
    %cst_14 = arith.constant dense<0.000000e+00> : vector<288x128xf32>
    %13 = tpu.matmul %10, %12, %cst_14 {dimension_numbers = #tpu.dot_dimension_numbers<[1], [0], [0], [1], [0, 0, 1, 1], [], []>} : vector<288x128xbf16>, vector<128x128xbf16>, vector<288x128xf32> -> vector<288x128xf32>
    %14 = arith.addf %6, %13 : vector<288x128xf32>
    %c0_15 = arith.constant 0 : index
    %c0_16 = arith.constant 0 : index
    %c2 = arith.constant 2 : index
    %c0_17 = arith.constant 0 : index
    %15 = vector.load %arg2[%c0_15, %c0_16, %c2, %c0_17] : memref<1x20x18x128xf32, #tpu.memory_space<vmem>>, vector<1x18x16x128xf32>
    %16 = vector.shape_cast %15 : vector<1x18x16x128xf32> to vector<18x16x128xf32>
    %17 = arith.truncf %16 : vector<18x16x128xf32> to vector<18x16x128xbf16>
    %18 = vector.shape_cast %17 : vector<18x16x128xbf16> to vector<288x128xbf16>
    %c0_18 = arith.constant 0 : index
    %c2_19 = arith.constant 2 : index
    %c0_20 = arith.constant 0 : index
    %c0_21 = arith.constant 0 : index
    %19 = vector.load %arg3[%c0_18, %c2_19, %c0_20, %c0_21] : memref<3x3x128x128xbf16, #tpu.memory_space<vmem>>, vector<1x1x128x128xbf16>
    %20 = vector.shape_cast %19 : vector<1x1x128x128xbf16> to vector<128x128xbf16>
    %cst_22 = arith.constant dense<0.000000e+00> : vector<288x128xf32>
    %21 = tpu.matmul %18, %20, %cst_22 {dimension_numbers = #tpu.dot_dimension_numbers<[1], [0], [0], [1], [0, 0, 1, 1], [], []>} : vector<288x128xbf16>, vector<128x128xbf16>, vector<288x128xf32> -> vector<288x128xf32>
    %22 = arith.addf %14, %21 : vector<288x128xf32>
    %c0_23 = arith.constant 0 : index
    %c1_24 = arith.constant 1 : index
    %c0_25 = arith.constant 0 : index
    %c0_26 = arith.constant 0 : index
    %23 = vector.load %arg2[%c0_23, %c1_24, %c0_25, %c0_26] : memref<1x20x18x128xf32, #tpu.memory_space<vmem>>, vector<1x18x16x128xf32>
    %24 = vector.shape_cast %23 : vector<1x18x16x128xf32> to vector<18x16x128xf32>
    %25 = arith.truncf %24 : vector<18x16x128xf32> to vector<18x16x128xbf16>
    %26 = vector.shape_cast %25 : vector<18x16x128xbf16> to vector<288x128xbf16>
    %c1_27 = arith.constant 1 : index
    %c0_28 = arith.constant 0 : index
    %c0_29 = arith.constant 0 : index
    %c0_30 = arith.constant 0 : index
    %27 = vector.load %arg3[%c1_27, %c0_28, %c0_29, %c0_30] : memref<3x3x128x128xbf16, #tpu.memory_space<vmem>>, vector<1x1x128x128xbf16>
    %28 = vector.shape_cast %27 : vector<1x1x128x128xbf16> to vector<128x128xbf16>
    %cst_31 = arith.constant dense<0.000000e+00> : vector<288x128xf32>
    %29 = tpu.matmul %26, %28, %cst_31 {dimension_numbers = #tpu.dot_dimension_numbers<[1], [0], [0], [1], [0, 0, 1, 1], [], []>} : vector<288x128xbf16>, vector<128x128xbf16>, vector<288x128xf32> -> vector<288x128xf32>
    %30 = arith.addf %22, %29 : vector<288x128xf32>
    %c0_32 = arith.constant 0 : index
    %c1_33 = arith.constant 1 : index
    %c1_34 = arith.constant 1 : index
    %c0_35 = arith.constant 0 : index
    %31 = vector.load %arg2[%c0_32, %c1_33, %c1_34, %c0_35] : memref<1x20x18x128xf32, #tpu.memory_space<vmem>>, vector<1x18x16x128xf32>
    %32 = vector.shape_cast %31 : vector<1x18x16x128xf32> to vector<18x16x128xf32>
    %33 = arith.truncf %32 : vector<18x16x128xf32> to vector<18x16x128xbf16>
    %34 = vector.shape_cast %33 : vector<18x16x128xbf16> to vector<288x128xbf16>
    %c1_36 = arith.constant 1 : index
    %c1_37 = arith.constant 1 : index
    %c0_38 = arith.constant 0 : index
    %c0_39 = arith.constant 0 : index
    %35 = vector.load %arg3[%c1_36, %c1_37, %c0_38, %c0_39] : memref<3x3x128x128xbf16, #tpu.memory_space<vmem>>, vector<1x1x128x128xbf16>
    %36 = vector.shape_cast %35 : vector<1x1x128x128xbf16> to vector<128x128xbf16>
    %cst_40 = arith.constant dense<0.000000e+00> : vector<288x128xf32>
    %37 = tpu.matmul %34, %36, %cst_40 {dimension_numbers = #tpu.dot_dimension_numbers<[1], [0], [0], [1], [0, 0, 1, 1], [], []>} : vector<288x128xbf16>, vector<128x128xbf16>, vector<288x128xf32> -> vector<288x128xf32>
    %38 = arith.addf %30, %37 : vector<288x128xf32>
    %c0_41 = arith.constant 0 : index
    %c1_42 = arith.constant 1 : index
    %c2_43 = arith.constant 2 : index
    %c0_44 = arith.constant 0 : index
    %39 = vector.load %arg2[%c0_41, %c1_42, %c2_43, %c0_44] : memref<1x20x18x128xf32, #tpu.memory_space<vmem>>, vector<1x18x16x128xf32>
    %40 = vector.shape_cast %39 : vector<1x18x16x128xf32> to vector<18x16x128xf32>
    %41 = arith.truncf %40 : vector<18x16x128xf32> to vector<18x16x128xbf16>
    %42 = vector.shape_cast %41 : vector<18x16x128xbf16> to vector<288x128xbf16>
    %c1_45 = arith.constant 1 : index
    %c2_46 = arith.constant 2 : index
    %c0_47 = arith.constant 0 : index
    %c0_48 = arith.constant 0 : index
    %43 = vector.load %arg3[%c1_45, %c2_46, %c0_47, %c0_48] : memref<3x3x128x128xbf16, #tpu.memory_space<vmem>>, vector<1x1x128x128xbf16>
    %44 = vector.shape_cast %43 : vector<1x1x128x128xbf16> to vector<128x128xbf16>
    %cst_49 = arith.constant dense<0.000000e+00> : vector<288x128xf32>
    %45 = tpu.matmul %42, %44, %cst_49 {dimension_numbers = #tpu.dot_dimension_numbers<[1], [0], [0], [1], [0, 0, 1, 1], [], []>} : vector<288x128xbf16>, vector<128x128xbf16>, vector<288x128xf32> -> vector<288x128xf32>
    %46 = arith.addf %38, %45 : vector<288x128xf32>
    %c0_50 = arith.constant 0 : index
    %c2_51 = arith.constant 2 : index
    %c0_52 = arith.constant 0 : index
    %c0_53 = arith.constant 0 : index
    %47 = vector.load %arg2[%c0_50, %c2_51, %c0_52, %c0_53] : memref<1x20x18x128xf32, #tpu.memory_space<vmem>>, vector<1x18x16x128xf32>
    %48 = vector.shape_cast %47 : vector<1x18x16x128xf32> to vector<18x16x128xf32>
    %49 = arith.truncf %48 : vector<18x16x128xf32> to vector<18x16x128xbf16>
    %50 = vector.shape_cast %49 : vector<18x16x128xbf16> to vector<288x128xbf16>
    %c2_54 = arith.constant 2 : index
    %c0_55 = arith.constant 0 : index
    %c0_56 = arith.constant 0 : index
    %c0_57 = arith.constant 0 : index
    %51 = vector.load %arg3[%c2_54, %c0_55, %c0_56, %c0_57] : memref<3x3x128x128xbf16, #tpu.memory_space<vmem>>, vector<1x1x128x128xbf16>
    %52 = vector.shape_cast %51 : vector<1x1x128x128xbf16> to vector<128x128xbf16>
    %cst_58 = arith.constant dense<0.000000e+00> : vector<288x128xf32>
    %53 = tpu.matmul %50, %52, %cst_58 {dimension_numbers = #tpu.dot_dimension_numbers<[1], [0], [0], [1], [0, 0, 1, 1], [], []>} : vector<288x128xbf16>, vector<128x128xbf16>, vector<288x128xf32> -> vector<288x128xf32>
    %54 = arith.addf %46, %53 : vector<288x128xf32>
    %c0_59 = arith.constant 0 : index
    %c2_60 = arith.constant 2 : index
    %c1_61 = arith.constant 1 : index
    %c0_62 = arith.constant 0 : index
    %55 = vector.load %arg2[%c0_59, %c2_60, %c1_61, %c0_62] : memref<1x20x18x128xf32, #tpu.memory_space<vmem>>, vector<1x18x16x128xf32>
    %56 = vector.shape_cast %55 : vector<1x18x16x128xf32> to vector<18x16x128xf32>
    %57 = arith.truncf %56 : vector<18x16x128xf32> to vector<18x16x128xbf16>
    %58 = vector.shape_cast %57 : vector<18x16x128xbf16> to vector<288x128xbf16>
    %c2_63 = arith.constant 2 : index
    %c1_64 = arith.constant 1 : index
    %c0_65 = arith.constant 0 : index
    %c0_66 = arith.constant 0 : index
    %59 = vector.load %arg3[%c2_63, %c1_64, %c0_65, %c0_66] : memref<3x3x128x128xbf16, #tpu.memory_space<vmem>>, vector<1x1x128x128xbf16>
    %60 = vector.shape_cast %59 : vector<1x1x128x128xbf16> to vector<128x128xbf16>
    %cst_67 = arith.constant dense<0.000000e+00> : vector<288x128xf32>
    %61 = tpu.matmul %58, %60, %cst_67 {dimension_numbers = #tpu.dot_dimension_numbers<[1], [0], [0], [1], [0, 0, 1, 1], [], []>} : vector<288x128xbf16>, vector<128x128xbf16>, vector<288x128xf32> -> vector<288x128xf32>
    %62 = arith.addf %54, %61 : vector<288x128xf32>
    %c0_68 = arith.constant 0 : index
    %c2_69 = arith.constant 2 : index
    %c2_70 = arith.constant 2 : index
    %c0_71 = arith.constant 0 : index
    %63 = vector.load %arg2[%c0_68, %c2_69, %c2_70, %c0_71] : memref<1x20x18x128xf32, #tpu.memory_space<vmem>>, vector<1x18x16x128xf32>
    %64 = vector.shape_cast %63 : vector<1x18x16x128xf32> to vector<18x16x128xf32>
    %65 = arith.truncf %64 : vector<18x16x128xf32> to vector<18x16x128xbf16>
    %66 = vector.shape_cast %65 : vector<18x16x128xbf16> to vector<288x128xbf16>
    %c2_72 = arith.constant 2 : index
    %c2_73 = arith.constant 2 : index
    %c0_74 = arith.constant 0 : index
    %c0_75 = arith.constant 0 : index
    %67 = vector.load %arg3[%c2_72, %c2_73, %c0_74, %c0_75] : memref<3x3x128x128xbf16, #tpu.memory_space<vmem>>, vector<1x1x128x128xbf16>
    %68 = vector.shape_cast %67 : vector<1x1x128x128xbf16> to vector<128x128xbf16>
    %cst_76 = arith.constant dense<0.000000e+00> : vector<288x128xf32>
    %69 = tpu.matmul %66, %68, %cst_76 {dimension_numbers = #tpu.dot_dimension_numbers<[1], [0], [0], [1], [0, 0, 1, 1], [], []>} : vector<288x128xbf16>, vector<128x128xbf16>, vector<288x128xf32> -> vector<288x128xf32>
    %70 = arith.addf %62, %69 : vector<288x128xf32>
    %c0_77 = arith.constant 0 : index
    %c0_78 = arith.constant 0 : index
    %71 = vector.load %arg4[%c0_77, %c0_78] : memref<1x128xf32, #tpu.memory_space<vmem>>, vector<1x128xf32>
    %72 = vector.broadcast %71 : vector<1x128xf32> to vector<288x128xf32>
    %73 = arith.addf %70, %72 : vector<288x128xf32>
    %cst_79 = arith.constant 0.000000e+00 : f32
    %74 = vector.broadcast %cst_79 : f32 to vector<288x128xf32>
    %75 = arith.maximumf %73, %74 : vector<288x128xf32>
    %76 = arith.truncf %75 : vector<288x128xf32> to vector<288x128xbf16>
    %77 = vector.shape_cast %76 : vector<288x128xbf16> to vector<18x16x128xbf16>
    %c0_80 = arith.constant 0 : index
    %c1_81 = arith.constant 1 : index
    %c0_82 = arith.constant 0 : index
    %78 = vector.load %arg8[%c0_80, %c1_81, %c0_82] : memref<18x18x128xbf16, #tpu.memory_space<vmem>>, vector<18x16x128xbf16>
    tpu.vector_store %arg8[%c0_80, %c1_81, %c0_82], %77 {strides = array<i32>} : memref<18x18x128xbf16, #tpu.memory_space<vmem>>, vector<18x16x128xbf16>,
    %cst_83 = arith.constant 0.000000e+00 : bf16
    %79 = vector.broadcast %cst_83 : bf16 to vector<18x1x128xbf16>
    %c0_84 = arith.constant 0 : index
    %c0_85 = arith.constant 0 : index
    %c0_86 = arith.constant 0 : index
    %80 = vector.load %arg8[%c0_84, %c0_85, %c0_86] : memref<18x18x128xbf16, #tpu.memory_space<vmem>>, vector<18x1x128xbf16>
    tpu.vector_store %arg8[%c0_84, %c0_85, %c0_86], %79 {strides = array<i32>} : memref<18x18x128xbf16, #tpu.memory_space<vmem>>, vector<18x1x128xbf16>,
    %c0_87 = arith.constant 0 : index
    %c17 = arith.constant 17 : index
    %c0_88 = arith.constant 0 : index
    %81 = vector.load %arg8[%c0_87, %c17, %c0_88] : memref<18x18x128xbf16, #tpu.memory_space<vmem>>, vector<18x1x128xbf16>
    tpu.vector_store %arg8[%c0_87, %c17, %c0_88], %79 {strides = array<i32>} : memref<18x18x128xbf16, #tpu.memory_space<vmem>>, vector<18x1x128xbf16>,
    %cst_89 = arith.constant 0.000000e+00 : bf16
    %82 = vector.broadcast %cst_89 : bf16 to vector<1x18x128xbf16>
    %c0_i32 = arith.constant 0 : i32
    %83 = arith.cmpi eq, %arg1, %c0_i32 : i32
    %84 = arith.extui %83 : i1 to i32
    %c0_i32_90 = arith.constant 0 : i32
    %85 = arith.cmpi ne, %84, %c0_i32_90 : i32
    scf.if %85 {
      %c0_176 = arith.constant 0 : index
      %c0_177 = arith.constant 0 : index
      %c0_178 = arith.constant 0 : index
      %155 = vector.load %arg8[%c0_176, %c0_177, %c0_178] : memref<18x18x128xbf16, #tpu.memory_space<vmem>>, vector<1x18x128xbf16>
      tpu.vector_store %arg8[%c0_176, %c0_177, %c0_178], %82 {strides = array<i32>} : memref<18x18x128xbf16, #tpu.memory_space<vmem>>, vector<1x18x128xbf16>,
    } else {
    }
    %c0_i32_91 = arith.constant 0 : i32
    %86 = arith.cmpi eq, %arg1, %c0_i32_91 : i32
    %87 = arith.extui %86 : i1 to i32
    %c0_i32_92 = arith.constant 0 : i32
    %88 = arith.cmpi ne, %87, %c0_i32_92 : i32
    scf.if %88 {
      %c17_176 = arith.constant 17 : index
      %c0_177 = arith.constant 0 : index
      %c0_178 = arith.constant 0 : index
      %155 = vector.load %arg8[%c17_176, %c0_177, %c0_178] : memref<18x18x128xbf16, #tpu.memory_space<vmem>>, vector<1x18x128xbf16>
      tpu.vector_store %arg8[%c17_176, %c0_177, %c0_178], %82 {strides = array<i32>} : memref<18x18x128xbf16, #tpu.memory_space<vmem>>, vector<1x18x128xbf16>,
    } else {
    }
    %c0_93 = arith.constant 0 : index
    %c0_94 = arith.constant 0 : index
    %c0_95 = arith.constant 0 : index
    %89 = vector.load %arg8[%c0_93, %c0_94, %c0_95] : memref<18x18x128xbf16, #tpu.memory_space<vmem>>, vector<16x16x128xbf16>
    %90 = vector.shape_cast %89 : vector<16x16x128xbf16> to vector<256x128xbf16>
    %c0_96 = arith.constant 0 : index
    %c0_97 = arith.constant 0 : index
    %c0_98 = arith.constant 0 : index
    %c0_99 = arith.constant 0 : index
    %91 = vector.load %arg5[%c0_96, %c0_97, %c0_98, %c0_99] : memref<3x3x128x128xbf16, #tpu.memory_space<vmem>>, vector<1x1x128x128xbf16>
    %92 = vector.shape_cast %91 : vector<1x1x128x128xbf16> to vector<128x128xbf16>
    %cst_100 = arith.constant dense<0.000000e+00> : vector<256x128xf32>
    %93 = tpu.matmul %90, %92, %cst_100 {dimension_numbers = #tpu.dot_dimension_numbers<[1], [0], [0], [1], [0, 0, 1, 1], [], []>} : vector<256x128xbf16>, vector<128x128xbf16>, vector<256x128xf32> -> vector<256x128xf32>
    %c0_101 = arith.constant 0 : index
    %c1_102 = arith.constant 1 : index
    %c0_103 = arith.constant 0 : index
    %94 = vector.load %arg8[%c0_101, %c1_102, %c0_103] : memref<18x18x128xbf16, #tpu.memory_space<vmem>>, vector<16x16x128xbf16>
    %95 = vector.shape_cast %94 : vector<16x16x128xbf16> to vector<256x128xbf16>
    %c0_104 = arith.constant 0 : index
    %c1_105 = arith.constant 1 : index
    %c0_106 = arith.constant 0 : index
    %c0_107 = arith.constant 0 : index
    %96 = vector.load %arg5[%c0_104, %c1_105, %c0_106, %c0_107] : memref<3x3x128x128xbf16, #tpu.memory_space<vmem>>, vector<1x1x128x128xbf16>
    %97 = vector.shape_cast %96 : vector<1x1x128x128xbf16> to vector<128x128xbf16>
    %cst_108 = arith.constant dense<0.000000e+00> : vector<256x128xf32>
    %98 = tpu.matmul %95, %97, %cst_108 {dimension_numbers = #tpu.dot_dimension_numbers<[1], [0], [0], [1], [0, 0, 1, 1], [], []>} : vector<256x128xbf16>, vector<128x128xbf16>, vector<256x128xf32> -> vector<256x128xf32>
    %99 = arith.addf %93, %98 : vector<256x128xf32>
    %c0_109 = arith.constant 0 : index
    %c2_110 = arith.constant 2 : index
    %c0_111 = arith.constant 0 : index
    %100 = vector.load %arg8[%c0_109, %c2_110, %c0_111] : memref<18x18x128xbf16, #tpu.memory_space<vmem>>, vector<16x16x128xbf16>
    %101 = vector.shape_cast %100 : vector<16x16x128xbf16> to vector<256x128xbf16>
    %c0_112 = arith.constant 0 : index
    %c2_113 = arith.constant 2 : index
    %c0_114 = arith.constant 0 : index
    %c0_115 = arith.constant 0 : index
    %102 = vector.load %arg5[%c0_112, %c2_113, %c0_114, %c0_115] : memref<3x3x128x128xbf16, #tpu.memory_space<vmem>>, vector<1x1x128x128xbf16>
    %103 = vector.shape_cast %102 : vector<1x1x128x128xbf16> to vector<128x128xbf16>
    %cst_116 = arith.constant dense<0.000000e+00> : vector<256x128xf32>
    %104 = tpu.matmul %101, %103, %cst_116 {dimension_numbers = #tpu.dot_dimension_numbers<[1], [0], [0], [1], [0, 0, 1, 1], [], []>} : vector<256x128xbf16>, vector<128x128xbf16>, vector<256x128xf32> -> vector<256x128xf32>
    %105 = arith.addf %99, %104 : vector<256x128xf32>
    %c1_117 = arith.constant 1 : index
    %c0_118 = arith.constant 0 : index
    %c0_119 = arith.constant 0 : index
    %106 = vector.load %arg8[%c1_117, %c0_118, %c0_119] : memref<18x18x128xbf16, #tpu.memory_space<vmem>>, vector<16x16x128xbf16>
    %107 = vector.shape_cast %106 : vector<16x16x128xbf16> to vector<256x128xbf16>
    %c1_120 = arith.constant 1 : index
    %c0_121 = arith.constant 0 : index
    %c0_122 = arith.constant 0 : index
    %c0_123 = arith.constant 0 : index
    %108 = vector.load %arg5[%c1_120, %c0_121, %c0_122, %c0_123] : memref<3x3x128x128xbf16, #tpu.memory_space<vmem>>, vector<1x1x128x128xbf16>
    %109 = vector.shape_cast %108 : vector<1x1x128x128xbf16> to vector<128x128xbf16>
    %cst_124 = arith.constant dense<0.000000e+00> : vector<256x128xf32>
    %110 = tpu.matmul %107, %109, %cst_124 {dimension_numbers = #tpu.dot_dimension_numbers<[1], [0], [0], [1], [0, 0, 1, 1], [], []>} : vector<256x128xbf16>, vector<128x128xbf16>, vector<256x128xf32> -> vector<256x128xf32>
    %111 = arith.addf %105, %110 : vector<256x128xf32>
    %c1_125 = arith.constant 1 : index
    %c1_126 = arith.constant 1 : index
    %c0_127 = arith.constant 0 : index
    %112 = vector.load %arg8[%c1_125, %c1_126, %c0_127] : memref<18x18x128xbf16, #tpu.memory_space<vmem>>, vector<16x16x128xbf16>
    %113 = vector.shape_cast %112 : vector<16x16x128xbf16> to vector<256x128xbf16>
    %c1_128 = arith.constant 1 : index
    %c1_129 = arith.constant 1 : index
    %c0_130 = arith.constant 0 : index
    %c0_131 = arith.constant 0 : index
    %114 = vector.load %arg5[%c1_128, %c1_129, %c0_130, %c0_131] : memref<3x3x128x128xbf16, #tpu.memory_space<vmem>>, vector<1x1x128x128xbf16>
    %115 = vector.shape_cast %114 : vector<1x1x128x128xbf16> to vector<128x128xbf16>
    %cst_132 = arith.constant dense<0.000000e+00> : vector<256x128xf32>
    %116 = tpu.matmul %113, %115, %cst_132 {dimension_numbers = #tpu.dot_dimension_numbers<[1], [0], [0], [1], [0, 0, 1, 1], [], []>} : vector<256x128xbf16>, vector<128x128xbf16>, vector<256x128xf32> -> vector<256x128xf32>
    %117 = arith.addf %111, %116 : vector<256x128xf32>
    %c1_133 = arith.constant 1 : index
    %c2_134 = arith.constant 2 : index
    %c0_135 = arith.constant 0 : index
    %118 = vector.load %arg8[%c1_133, %c2_134, %c0_135] : memref<18x18x128xbf16, #tpu.memory_space<vmem>>, vector<16x16x128xbf16>
    %119 = vector.shape_cast %118 : vector<16x16x128xbf16> to vector<256x128xbf16>
    %c1_136 = arith.constant 1 : index
    %c2_137 = arith.constant 2 : index
    %c0_138 = arith.constant 0 : index
    %c0_139 = arith.constant 0 : index
    %120 = vector.load %arg5[%c1_136, %c2_137, %c0_138, %c0_139] : memref<3x3x128x128xbf16, #tpu.memory_space<vmem>>, vector<1x1x128x128xbf16>
    %121 = vector.shape_cast %120 : vector<1x1x128x128xbf16> to vector<128x128xbf16>
    %cst_140 = arith.constant dense<0.000000e+00> : vector<256x128xf32>
    %122 = tpu.matmul %119, %121, %cst_140 {dimension_numbers = #tpu.dot_dimension_numbers<[1], [0], [0], [1], [0, 0, 1, 1], [], []>} : vector<256x128xbf16>, vector<128x128xbf16>, vector<256x128xf32> -> vector<256x128xf32>
    %123 = arith.addf %117, %122 : vector<256x128xf32>
    %c2_141 = arith.constant 2 : index
    %c0_142 = arith.constant 0 : index
    %c0_143 = arith.constant 0 : index
    %124 = vector.load %arg8[%c2_141, %c0_142, %c0_143] : memref<18x18x128xbf16, #tpu.memory_space<vmem>>, vector<16x16x128xbf16>
    %125 = vector.shape_cast %124 : vector<16x16x128xbf16> to vector<256x128xbf16>
    %c2_144 = arith.constant 2 : index
    %c0_145 = arith.constant 0 : index
    %c0_146 = arith.constant 0 : index
    %c0_147 = arith.constant 0 : index
    %126 = vector.load %arg5[%c2_144, %c0_145, %c0_146, %c0_147] : memref<3x3x128x128xbf16, #tpu.memory_space<vmem>>, vector<1x1x128x128xbf16>
    %127 = vector.shape_cast %126 : vector<1x1x128x128xbf16> to vector<128x128xbf16>
    %cst_148 = arith.constant dense<0.000000e+00> : vector<256x128xf32>
    %128 = tpu.matmul %125, %127, %cst_148 {dimension_numbers = #tpu.dot_dimension_numbers<[1], [0], [0], [1], [0, 0, 1, 1], [], []>} : vector<256x128xbf16>, vector<128x128xbf16>, vector<256x128xf32> -> vector<256x128xf32>
    %129 = arith.addf %123, %128 : vector<256x128xf32>
    %c2_149 = arith.constant 2 : index
    %c1_150 = arith.constant 1 : index
    %c0_151 = arith.constant 0 : index
    %130 = vector.load %arg8[%c2_149, %c1_150, %c0_151] : memref<18x18x128xbf16, #tpu.memory_space<vmem>>, vector<16x16x128xbf16>
    %131 = vector.shape_cast %130 : vector<16x16x128xbf16> to vector<256x128xbf16>
    %c2_152 = arith.constant 2 : index
    %c1_153 = arith.constant 1 : index
    %c0_154 = arith.constant 0 : index
    %c0_155 = arith.constant 0 : index
    %132 = vector.load %arg5[%c2_152, %c1_153, %c0_154, %c0_155] : memref<3x3x128x128xbf16, #tpu.memory_space<vmem>>, vector<1x1x128x128xbf16>
    %133 = vector.shape_cast %132 : vector<1x1x128x128xbf16> to vector<128x128xbf16>
    %cst_156 = arith.constant dense<0.000000e+00> : vector<256x128xf32>
    %134 = tpu.matmul %131, %133, %cst_156 {dimension_numbers = #tpu.dot_dimension_numbers<[1], [0], [0], [1], [0, 0, 1, 1], [], []>} : vector<256x128xbf16>, vector<128x128xbf16>, vector<256x128xf32> -> vector<256x128xf32>
    %135 = arith.addf %129, %134 : vector<256x128xf32>
    %c2_157 = arith.constant 2 : index
    %c2_158 = arith.constant 2 : index
    %c0_159 = arith.constant 0 : index
    %136 = vector.load %arg8[%c2_157, %c2_158, %c0_159] : memref<18x18x128xbf16, #tpu.memory_space<vmem>>, vector<16x16x128xbf16>
    %137 = vector.shape_cast %136 : vector<16x16x128xbf16> to vector<256x128xbf16>
    %c2_160 = arith.constant 2 : index
    %c2_161 = arith.constant 2 : index
    %c0_162 = arith.constant 0 : index
    %c0_163 = arith.constant 0 : index
    %138 = vector.load %arg5[%c2_160, %c2_161, %c0_162, %c0_163] : memref<3x3x128x128xbf16, #tpu.memory_space<vmem>>, vector<1x1x128x128xbf16>
    %139 = vector.shape_cast %138 : vector<1x1x128x128xbf16> to vector<128x128xbf16>
    %cst_164 = arith.constant dense<0.000000e+00> : vector<256x128xf32>
    %140 = tpu.matmul %137, %139, %cst_164 {dimension_numbers = #tpu.dot_dimension_numbers<[1], [0], [0], [1], [0, 0, 1, 1], [], []>} : vector<256x128xbf16>, vector<128x128xbf16>, vector<256x128xf32> -> vector<256x128xf32>
    %141 = arith.addf %135, %140 : vector<256x128xf32>
    %c0_165 = arith.constant 0 : index
    %c2_166 = arith.constant 2 : index
    %c1_167 = arith.constant 1 : index
    %c0_168 = arith.constant 0 : index
    %142 = vector.load %arg2[%c0_165, %c2_166, %c1_167, %c0_168] : memref<1x20x18x128xf32, #tpu.memory_space<vmem>>, vector<1x16x16x128xf32>
    %143 = vector.shape_cast %142 : vector<1x16x16x128xf32> to vector<16x16x128xf32>
    %144 = vector.shape_cast %141 : vector<256x128xf32> to vector<16x16x128xf32>
    %c0_169 = arith.constant 0 : index
    %c0_170 = arith.constant 0 : index
    %145 = vector.load %arg6[%c0_169, %c0_170] : memref<1x128xf32, #tpu.memory_space<vmem>>, vector<1x128xf32>
    %146 = vector.shape_cast %145 : vector<1x128xf32> to vector<1x1x128xf32>
    %147 = vector.broadcast %146 : vector<1x1x128xf32> to vector<16x16x128xf32>
    %148 = arith.addf %144, %147 : vector<16x16x128xf32>
    %149 = arith.addf %148, %143 : vector<16x16x128xf32>
    %cst_171 = arith.constant 0.000000e+00 : f32
    %150 = vector.broadcast %cst_171 : f32 to vector<16x16x128xf32>
    %151 = arith.maximumf %149, %150 : vector<16x16x128xf32>
    %c0_172 = arith.constant 0 : index
    %c0_173 = arith.constant 0 : index
    %c0_174 = arith.constant 0 : index
    %c0_175 = arith.constant 0 : index
    %152 = vector.load %arg7[%c0_172, %c0_173, %c0_174, %c0_175] : memref<1x16x16x128xf32, #tpu.memory_space<vmem>>, vector<1x16x16x128xf32>
    %153 = vector.shape_cast %152 : vector<1x16x16x128xf32> to vector<16x16x128xf32>
    %154 = vector.shape_cast %151 : vector<16x16x128xf32> to vector<1x16x16x128xf32>
    tpu.vector_store %arg7[%c0_172, %c0_173, %c0_174, %c0_175], %154 {strides = array<i32>} : memref<1x16x16x128xf32, #tpu.memory_space<vmem>>, vector<1x16x16x128xf32>,
    return
  }
  func.func @transform_0(%arg0: i32, %arg1: i32) -> (i32, i32, i32, i32) {
    %c0_i32 = arith.constant 0 : i32
    %c0_i32_0 = arith.constant 0 : i32
    %c0_i32_1 = arith.constant 0 : i32
    %c0_i32_2 = arith.constant 0 : i32
    return %arg0, %c0_i32, %c0_i32_0, %c0_i32_1 : i32, i32, i32, i32
  }
  func.func @transform_1(%arg0: i32, %arg1: i32) -> (i32, i32, i32, i32) {
    %c0_i32 = arith.constant 0 : i32
    %c0_i32_0 = arith.constant 0 : i32
    %c0_i32_1 = arith.constant 0 : i32
    %c0_i32_2 = arith.constant 0 : i32
    %c0_i32_3 = arith.constant 0 : i32
    return %c0_i32, %c0_i32_0, %c0_i32_1, %c0_i32_2 : i32, i32, i32, i32
  }
  func.func @transform_2(%arg0: i32, %arg1: i32) -> (i32, i32) {
    %c0_i32 = arith.constant 0 : i32
    %c0_i32_0 = arith.constant 0 : i32
    %c0_i32_1 = arith.constant 0 : i32
    return %c0_i32, %c0_i32_0 : i32, i32
  }
  func.func @transform_3(%arg0: i32, %arg1: i32) -> (i32, i32, i32, i32) {
    %c0_i32 = arith.constant 0 : i32
    %c0_i32_0 = arith.constant 0 : i32
    %c0_i32_1 = arith.constant 0 : i32
    %c0_i32_2 = arith.constant 0 : i32
    %c0_i32_3 = arith.constant 0 : i32
    return %c0_i32, %c0_i32_0, %c0_i32_1, %c0_i32_2 : i32, i32, i32, i32
  }
  func.func @transform_4(%arg0: i32, %arg1: i32) -> (i32, i32) {
    %c0_i32 = arith.constant 0 : i32
    %c0_i32_0 = arith.constant 0 : i32
    %c0_i32_1 = arith.constant 0 : i32
    return %c0_i32, %c0_i32_0 : i32, i32
  }
  func.func @transform_5(%arg0: i32, %arg1: i32) -> (i32, i32, i32, i32) {
    %c0_i32 = arith.constant 0 : i32
    %c0_i32_0 = arith.constant 0 : i32
    %c0_i32_1 = arith.constant 0 : i32
    return %arg0, %arg1, %c0_i32, %c0_i32_0 : i32, i32, i32, i32
  }
}

</mosaic_0001>

<bundles_post_ra>
// kernel: tpu_custom_call.1
= control target key start
LH: loop header
LB: loop body
LE: loop exit
PB: predicated region body
PF: predicated region fallthrough
CT: control target
= control target key end

     0   :  { %10 = vsyncpa [#allocation4], 0  ;;  %s14687_s0 = inlined_call_operand.vmem [shape: f32[1,20,18,128], index: 0, kind: input, shape index: {}]   ;;  %s14688_s1 = inlined_call_operand.vmem [shape: bf16[3,3,128,128], index: 1, kind: input, shape index: {}]   ;;  %s14689_s2 = inlined_call_operand.vmem [shape: f32[1,128], index: 2, kind: input, shape index: {}]   ;;  %s14690_s3 = inlined_call_operand.hbm [shape: bf16[3,3,128,128], index: 3, kind: input, shape index: {}]   ;;  %s14691_s4 = inlined_call_operand.vmem [shape: f32[1,128], index: 4, kind: input, shape index: {}]   ;;  %s14692_s5 = inlined_call_operand.hbm [shape: f32[1,16,16,128], index: 5, kind: output, shape index: {}]  }
   0x1   :  { %11 = vsyncpa [#allocation5], 0  ;;  %s11737_s18 = smov [#allocation3]   ;;  %s11689_s22 = scalar_lea.hbm %s14690_s3, 9216 }
   0x2   :  { %s23_s19 = sshll.u32 %s11737_s18, 4  ;;  %p11690_p0 = scmp.ne.s32.totalorder %s14690_s3, %s11689_s22  ;;  %s24_s19 = int_to_ptr.vmem [resolvable:$true] %s23_s19 }
   0x3   :  { %p11693_p1 = scmp.lt.u32.totalorder %s11689_s22, %s14690_s3 }
   0x5   :  { %p11695_p2 = pnand %p11693_p1, %p11690_p0 }
   0x7   :  { %11698 = shalt.err (!%p11695_p2)
}
   0x8   :  { %s11699_s27 = scalar_lea.vmem %s24_s19, 9216  ;;  %p11704_p4 = scmp.lt.s32.totalorder %s24_s19, %s24_s19 }
   0x9   :  { %p11700_p3 = scmp.ne.s32.totalorder %s24_s19, %s11699_s27  ;;  %p11705_p5 = scmp.lt.s32.totalorder %s11699_s27, %s11699_s27 }
   0xb   :  { %p11706_p6 = por %p11705_p5, %p11704_p4 }
   0xd   :  { %p11707_p7 = pnand %p11706_p6, %p11700_p3 }
   0xf   :  { %11710 = shalt.err (!%p11707_p7)
}
  0x10   :  { %s11738_s28 = smov 64   ;;  %s11739_s29 = smov 4  }
  0x11   :  { %29 = dma.hbm_to_vmem [thread:$0]  %s14690_s3, 9216, %s24_s19, [#allocation4], %s11738_s28, %s11738_s28, %s11739_s29  }
  0x12   :  { %11733 = dma.done.wait [#allocation4], 9216  }
  0x13   :  { %11734 = vsyncadd [#allocation4], 4294958080  ;;  %v11450_v0 = vld [vmem:[%s14688_s1 + $0x40] sm:$0xff]   ;;  %v11451_v1 = vld [vmem:[%s14688_s1 + $0x48] sm:$0xff]   ;;  %vm3140_vm0 = vsmask.f32 256 }
  0x14   :  { %9983 = vmatprep.subr.bf16.mxu0 %v11450_v0  ;;  %10883 = vmatprep.subr.bf16.mxu1 %v11450_v0  ;;  %v11452_v2 = vld [vmem:[%s14688_s1 + $0x50] sm:$0xff]   ;;  %v11453_v3 = vld [vmem:[%s14688_s1 + $0x58] sm:$0xff]   ;;  %v106_v4 = vld [vmem:[%s14687_s0 + $0x1] sm:$0xff]  ;;  %vm3503_vm1 = vcmask 1043456   ;;  %vm3504_vm2 = vsmask.f32 7938 }
  0x15   :  { %9984 = vmatpush3.bf16.msra.mxu0 %v11450_v0  ;;  %10891 = vmatpush3.bf16.msra.mxu1 %v11450_v0  ;;  %v107_v5 = vld [vmem:[%s14687_s0 + $0x9] sm:$0xff]  ;;  %v11454_v7 = vld [vmem:[%s14688_s1 + $0x60] sm:$0xff]   ;;  %v11457_v10 = vld [vmem:[%s14688_s1 + $0x78] sm:$0xff]   ;;  %vm3510_vm3 = vcmask 1040384   ;;  %vm3141_vm4 = vsmask.f32 4368 }
  0x16   :  { %9985 = vmatprep.subr.bf16.mxu0 %v11451_v1  ;;  %10884 = vmatprep.subr.bf16.mxu1 %v11451_v1  ;;  %v142_v6 = vpack.c.bf16 %v107_v5, %v106_v4  ;;  %v11455_v8 = vld [vmem:[%s14688_s1 + $0x68] sm:$0xff]   ;;  %v11456_v9 = vld [vmem:[%s14688_s1 + $0x70] sm:$0xff]   ;;  %v108_v11 = vld [vmem:[%s14687_s0 + $0x19] sm:$0xff]  ;;  %vm3818_vm9 = vsmask.f32 3328  ;;  %vm4848_vm12 = vcmask 1042432  }
  0x17   :  { %v109_v12 = vld [vmem:[%s14687_s0 + $0x21] sm:$0xff]  ;;  %v110_v14 = vld [vmem:[%s14687_s0 + $0x31] sm:$0xff]  ;;  %v111_v15 = vld [vmem:[%s14687_s0 + $0x39] sm:$0xff]  ;;  %vm3819_vm10 = vsmask.f32 7440  ;;  %vm4849_vm13 = vcmask 1046532  }
  0x18   :  { %9999 = vmatprep.mubr.bf16.mxu0 %v142_v6  ;;  %v11458_v13 = vld [vmem:[%s14688_s1] sm:$0xff]   ;;  %v11831_v16 = vpack.c.bf16 %v109_v12, %v108_v11  ;;  %v11833_v17 = vpack.c.bf16 %v111_v15, %v110_v14  ;;  %v11459_v18 = vld [vmem:[%s14688_s1 + $0x8] sm:$0xff]   ;;  %v113_v20 = vld [vmem:[%s14687_s0 + $0x51] sm:$0xff] }
  0x19   :  { %9986 = vmatpush3.bf16.msra.mxu0 %v11451_v1  ;;  %10892 = vmatpush3.bf16.msra.mxu1 %v11451_v1  ;;  %v112_v19 = vld [vmem:[%s14687_s0 + $0x49] sm:$0xff]  ;;  %v114_v22 = vld [vmem:[%s14687_s0 + $0x61] sm:$0xff]  ;;  %v11461_v26 = vld [vmem:[%s14688_s1 + $0x18] sm:$0xff]  }
  0x1a   :  { %9987 = vmatprep.subr.bf16.mxu0 %v11452_v2  ;;  %10885 = vmatprep.subr.bf16.mxu1 %v11452_v2  ;;  %v11460_v21 = vld [vmem:[%s14688_s1 + $0x10] sm:$0xff]   ;;  %v11855_v24 = vpack.c.bf16 %v113_v20, %v112_v19  ;;  %v116_v27 = vld [vmem:[%s14687_s0 + $0x79] sm:$0xff]  ;;  %v117_v28 = vld [vmem:[%s14687_s0 + $0x81] sm:$0xff] }
  0x1b   :  { %v115_v23 = vld [vmem:[%s14687_s0 + $0x69] sm:$0xff]  ;;  %v11462_v29 = vld [vmem:[%s14688_s1 + $0x20] sm:$0xff]   ;;  %v118_v30 = vld [vmem:[%s14687_s0 + $0x91] sm:$0xff]  ;;  %v11879_v32 = vpack.c.bf16 %v117_v28, %v116_v27 }
  0x1c   :  { %v11857_v25 = vpack.c.bf16 %v115_v23, %v114_v22  ;;  %v119_v31 = vld [vmem:[%s14687_s0 + $0x99] sm:$0xff]  ;;  %v11463_v34 = vld [vmem:[%s14688_s1 + $0x28] sm:$0xff]   ;;  %v121_v36 = vld [vmem:[%s14687_s0 + $0xb1] sm:$0xff] }
  0x1d   :  { %9988 = vmatpush3.bf16.msra.mxu0 %v11452_v2  ;;  %10893 = vmatpush3.bf16.msra.mxu1 %v11452_v2  ;;  %v11881_v33 = vpack.c.bf16 %v119_v31, %v118_v30  ;;  %v120_v35 = vld [vmem:[%s14687_s0 + $0xa9] sm:$0xff]  ;;  %v36_v38 = vld [vmem:[%s14687_s0] sm:$0xff]  ;;  %v11465_v42 = vld [vmem:[%s14688_s1 + $0x38] sm:$0xff]  }
  0x1e   :  { %9989 = vmatprep.subr.bf16.mxu0 %v11453_v3  ;;  %10886 = vmatprep.subr.bf16.mxu1 %v11453_v3  ;;  %v11464_v37 = vld [vmem:[%s14688_s1 + $0x30] sm:$0xff]   ;;  %v37_v39 = vld [vmem:[%s14687_s0 + $0x8] sm:$0xff]  ;;  %v11903_v40 = vpack.c.bf16 %v121_v36, %v120_v35  ;;  %v38_v43 = vld [vmem:[%s14687_s0 + $0x18] sm:$0xff] }
  0x1f   :  { %v72_v41 = vpack.c.bf16 %v37_v39, %v36_v38  ;;  %v39_v44 = vld [vmem:[%s14687_s0 + $0x20] sm:$0xff]  ;;  %v40_v46 = vld [vmem:[%s14687_s0 + $0x30] sm:$0xff]  ;;  %v41_v47 = vld [vmem:[%s14687_s0 + $0x38] sm:$0xff] }
  0x20   :  { %v11466_v45 = vld [vmem:[%s14688_s1 + $0x80] sm:$0xff]   ;;  %v11924_v48 = vpack.c.bf16 %v39_v44, %v38_v43  ;;  %v11467_v49 = vld [vmem:[%s14688_s1 + $0x88] sm:$0xff]   ;;  %v11929_v50 = vpack.c.bf16 %v41_v47, %v40_v46  ;;  %v43_v52 = vld [vmem:[%s14687_s0 + $0x50] sm:$0xff] }
  0x21   :  { %9990 = vmatpush3.bf16.msra.mxu0 %v11453_v3  ;;  %10894 = vmatpush3.bf16.msra.mxu1 %v11453_v3  ;;  %v42_v51 = vld [vmem:[%s14687_s0 + $0x48] sm:$0xff]  ;;  %v44_v53 = vld [vmem:[%s14687_s0 + $0x60] sm:$0xff]  ;;  %v11468_v55 = vld [vmem:[%s14688_s1 + $0x90] sm:$0xff]  }
  0x22   :  { %9991 = vmatprep.subr.bf16.mxu0 %v11454_v7  ;;  %10887 = vmatprep.subr.bf16.mxu1 %v11454_v7  ;;  %v45_v54 = vld [vmem:[%s14687_s0 + $0x68] sm:$0xff]  ;;  %v11948_v56 = vpack.c.bf16 %v43_v52, %v42_v51  ;;  %v11469_v57 = vld [vmem:[%s14688_s1 + $0x98] sm:$0xff]   ;;  %v47_v60 = vld [vmem:[%s14687_s0 + $0x80] sm:$0xff] }
  0x23   :  { %v11953_v58 = vpack.c.bf16 %v45_v54, %v44_v53  ;;  %v46_v59 = vld [vmem:[%s14687_s0 + $0x78] sm:$0xff]  ;;  %v48_v61 = vld [vmem:[%s14687_s0 + $0x90] sm:$0xff]  ;;  %v11470_v63 = vld [vmem:[%s14688_s1 + $0xa0] sm:$0xff]  }
  0x24   :  { %v49_v62 = vld [vmem:[%s14687_s0 + $0x98] sm:$0xff]  ;;  %v11972_v0 = vpack.c.bf16 %v47_v60, %v46_v59  ;;  %v11471_v1 = vld [vmem:[%s14688_s1 + $0xa8] sm:$0xff]   ;;  %v51_v4 = vld [vmem:[%s14687_s0 + $0xb0] sm:$0xff] }
  0x25   :  { %9992 = vmatpush3.bf16.msra.mxu0 %v11454_v7  ;;  %10895 = vmatpush3.bf16.msra.mxu1 %v11454_v7  ;;  %v11977_v2 = vpack.c.bf16 %v49_v62, %v48_v61  ;;  %v50_v3 = vld [vmem:[%s14687_s0 + $0xa8] sm:$0xff]  ;;  %v52_v5 = vld [vmem:[%s14687_s0 + $0xc0] sm:$0xff]  ;;  %v11472_v7 = vld [vmem:[%s14688_s1 + $0xb0] sm:$0xff]  }
  0x26   :  { %9993 = vmatprep.subr.bf16.mxu0 %v11455_v8  ;;  %10888 = vmatprep.subr.bf16.mxu1 %v11455_v8  ;;  %v53_v6 = vld [vmem:[%s14687_s0 + $0xc8] sm:$0xff]  ;;  %v54_v11 = vld [vmem:[%s14687_s0 + $0xd8] sm:$0xff]  ;;  %v55_v12 = vld [vmem:[%s14687_s0 + $0xe0] sm:$0xff] }
  0x27   :  { %v57_v14 = vld [vmem:[%s14687_s0 + $0xf8] sm:$0xff]  ;;  %v11474_v15 = vld [vmem:[%s14688_s1 + $0xc0] sm:$0xff]   ;;  %v58_v20 = vld [vmem:[%s14687_s0 + $0x108] sm:$0xff] }
  0x28   :  { %v60_v22 = vld [vmem:[%s14687_s0 + $0x120] sm:$0xff]  ;;  %v61_v23 = vld [vmem:[%s14687_s0 + $0x128] sm:$0xff]  ;;  %v62_v28 = vld [vmem:[%s14687_s0 + $0x138] sm:$0xff] }
  0x29   :  { %9994 = vmatpush3.bf16.msra.mxu0 %v11455_v8  ;;  %10896 = vmatpush3.bf16.msra.mxu1 %v11455_v8  ;;  %v11996_v8 = vpack.c.bf16 %v51_v4, %v50_v3  ;;  %v12040_v27 = vpack.c.bf16 %v61_v23, %v60_v22  ;;  %v64_v30 = vld [vmem:[%s14687_s0 + $0x150] sm:$0xff]  ;;  %v65_v31 = vld [vmem:[%s14687_s0 + $0x158] sm:$0xff]  ;;  %v66_v36 = vld [vmem:[%s14687_s0 + $0x168] sm:$0xff] }
  0x2a   :  { %9995 = vmatprep.subr.bf16.mxu0 %v11456_v9  ;;  %10889 = vmatprep.subr.bf16.mxu1 %v11456_v9  ;;  %v12058_v35 = vpack.c.bf16 %v65_v31, %v64_v30  ;;  %v68_v38 = vld [vmem:[%s14687_s0 + $0x180] sm:$0xff]  ;;  %v69_v39 = vld [vmem:[%s14687_s0 + $0x188] sm:$0xff]  ;;  %v70_v43 = vld [vmem:[%s14687_s0 + $0x198] sm:$0xff] }
  0x2b   :  { %v71_v44 = vld [vmem:[%s14687_s0 + $0x1a0] sm:$0xff]  ;;  %v628_v46 = vld [vmem:[%s14687_s0 + $0xa] sm:$0xff]  ;;  %v631_v53 = vld [vmem:[%s14687_s0 + $0x32] sm:$0xff] }
  0x2c   :  { %v12092_v47 = vpack.c.bf16 %v71_v44, %v70_v43  ;;  %v629_v51 = vld [vmem:[%s14687_s0 + $0x1a] sm:$0xff]  ;;  %v630_v52 = vld [vmem:[%s14687_s0 + $0x22] sm:$0xff]  ;;  %v633_v60 = vld [vmem:[%s14687_s0 + $0x4a] sm:$0xff] }
  0x2d   :  { %9996 = vmatpush3.bf16.msra.mxu0 %v11456_v9  ;;  %10897 = vmatpush3.bf16.msra.mxu1 %v11456_v9  ;;  %v11473_v9 = vld [vmem:[%s14688_s1 + $0xb8] sm:$0xff]   ;;  %v635_v62 = vld [vmem:[%s14687_s0 + $0x62] sm:$0xff]  ;;  %v644_v23 = vld [vmem:[%s14687_s0 + $0xca] sm:$0xff] }
  0x2e   :  { %9997 = vmatprep.subr.bf16.mxu0 %v11457_v10  ;;  %10890 = vmatprep.subr.bf16.mxu1 %v11457_v10  ;;  %v632_v54 = vld [vmem:[%s14687_s0 + $0x3a] sm:$0xff]  ;;  %v634_v61 = vld [vmem:[%s14687_s0 + $0x52] sm:$0xff]  ;;  %v643_v22 = vld [vmem:[%s14687_s0 + $0xc2] sm:$0xff] }
  0x2f   :  { %v12112_v59 = vpack.c.bf16 %v632_v54, %v631_v53  ;;  %v12131_v3 = vpack.c.bf16 %v634_v61, %v633_v60  ;;  %v12181_v30 = vpack.c.bf16 %v644_v23, %v643_v22  ;;  %v11481_v31 = vld [vmem:[%s14688_s1 + $0xf8] sm:$0xff]   ;;  %v12203_v43 = vld [vmem:[%s14688_s1 + $0x100] sm:$0xff]   ;;  %v652_v54 = vld [vmem:[%s14687_s0 + $0x12a] sm:$0xff] }
  0x30   :  { %v651_v53 = vld [vmem:[%s14687_s0 + $0x122] sm:$0xff]  ;;  %v657_v22 = vld [vmem:[%s14687_s0 + $0x16a] sm:$0xff]  ;;  %vm12866_vm5 = vmand %vm3503_vm1, %vm3504_vm2 }
  0x31   :  { %9998 = vmatpush3.bf16.msra.mxu0 %v11457_v10  ;;  %10898 = vmatpush3.bf16.msra.mxu1 %v11457_v10  ;;  %v12001_v10 = vpack.c.bf16 %v53_v6, %v52_v5  ;;  %v11477_v5 = vld [vmem:[%s14688_s1 + $0xd8] sm:$0xff]   ;;  %v12235_v61 = vpack.c.bf16 %v652_v54, %v651_v53  ;;  %v8883_v23 = vld [vmem:[%s14687_s0 + $0x109] sm:$0xff]  ;;  %vm12875_vm6 = vmand %vm3510_vm3, %vm3140_vm0 }
  0x32   :  { %10035 = vmatprep.subr.bf16.mxu0 %v11458_v13  ;;  %v637_v6 = vld [vmem:[%s14687_s0 + $0x7a] sm:$0xff]  ;;  %vm12881_vm7 = vmor %vm3140_vm0, %vm3141_vm4 }
  0x33   :  { %v661_v53 = vld [vmem:[%s14687_s0 + $0x19a] sm:$0xff]  ;;  %vm12916_vm8 = vmand %vm3510_vm3, %vm3504_vm2 }
  0x34   :  { %10000 = vmatmul.mubr.bf16.vlgmr.msra.gmra.mrb[0].mxu0 %v11831_v16  ;;  %v8887_v54 = vld [vmem:[%s14687_s0 + $0x139] sm:$0xff]  ;;  %vm13103_vm11 = vmor %vm3818_vm9, %vm3819_vm10 }
  0x35   :  { %10036 = vmatpush3.bf16.msra.mxu0 %v11458_v13  ;;  %10003 = vmatprep.mubr.bf16.mxu0 %v11833_v17  ;;  %v56_v13 = vld [vmem:[%s14687_s0 + $0xf0] sm:$0xff]  ;;  %vm13470_vm14 = vmor %vm4848_vm12, %vm4849_vm13 }
  0x36   :  { %10037 = vmatprep.subr.bf16.mxu0 %v11459_v18  ;;  %v12022_v19 = vpack.c.bf16 %v57_v14, %v56_v13 }
  0x39   :  { %10038 = vmatpush3.bf16.msra.mxu0 %v11459_v18  ;;  %v12020_v18 = vpack.c.bf16 %v55_v12, %v54_v11  ;;  %v640_v11 = vld [vmem:[%s14687_s0 + $0x9a] sm:$0xff] }
  0x3a   :  { %10039 = vmatprep.subr.bf16.mxu0 %v11460_v21  ;;  %v11478_v12 = vld [vmem:[%s14688_s1 + $0xe0] sm:$0xff]  }
  0x3c   :  { %10004 = vmatmul.mubr.bf16.gmra.mrb[4].mxu0 %v11855_v24 }
  0x3d   :  { %10040 = vmatpush3.bf16.msra.mxu0 %v11460_v21  ;;  %10007 = vmatprep.mubr.bf16.mxu0 %v11857_v25  ;;  %v59_v21 = vld [vmem:[%s14687_s0 + $0x110] sm:$0xff] }
  0x3e   :  { %10041 = vmatprep.subr.bf16.mxu0 %v11461_v26 }
  0x41   :  { %10042 = vmatpush3.bf16.msra.mxu0 %v11461_v26  ;;  %v12038_v26 = vpack.c.bf16 %v59_v21, %v58_v20  ;;  %v641_v20 = vld [vmem:[%s14687_s0 + $0xaa] sm:$0xff]  ;;  %v642_v21 = vld [vmem:[%s14687_s0 + $0xb2] sm:$0xff] }
  0x42   :  { %10043 = vmatprep.subr.bf16.mxu0 %v11462_v29 }
  0x44   :  { %10008 = vmatmul.mubr.bf16.gmra.mrb[8].mxu0 %v11879_v32 }
  0x45   :  { %10044 = vmatpush3.bf16.msra.mxu0 %v11462_v29  ;;  %10011 = vmatprep.mubr.bf16.mxu0 %v11881_v33  ;;  %v63_v29 = vld [vmem:[%s14687_s0 + $0x140] sm:$0xff] }
  0x46   :  { %10045 = vmatprep.subr.bf16.mxu0 %v11463_v34 }
  0x49   :  { %10046 = vmatpush3.bf16.msra.mxu0 %v11463_v34  ;;  %v12056_v34 = vpack.c.bf16 %v63_v29, %v62_v28  ;;  %v11480_v28 = vld [vmem:[%s14688_s1 + $0xf0] sm:$0xff]   ;;  %v12179_v29 = vpack.c.bf16 %v642_v21, %v641_v20 }
  0x4a   :  { %10047 = vmatprep.subr.bf16.mxu0 %v11464_v37 }
  0x4c   :  { %10012 = vmatmul.mubr.bf16.gmra.mrb[12].mxu0 %v11903_v40 }
  0x4d   :  { %10048 = vmatpush3.bf16.msra.mxu0 %v11464_v37  ;;  %10051 = vmatprep.mubr.bf16.mxu0 %v72_v41  ;;  %v67_v37 = vld [vmem:[%s14687_s0 + $0x170] sm:$0xff] }
  0x4e   :  { %10049 = vmatprep.subr.bf16.mxu0 %v11465_v42  ;;  %v12074_v41 = vpack.c.bf16 %v67_v37, %v66_v36  ;;  %v645_v36 = vld [vmem:[%s14687_s0 + $0xda] sm:$0xff]  ;;  %v646_v37 = vld [vmem:[%s14687_s0 + $0xe2] sm:$0xff] }
  0x4f   :  { %v12205_v44 = vpack.c.bf16 %v646_v37, %v645_v36  ;;  %v8885_v37 = vld [vmem:[%s14687_s0 + $0x121] sm:$0xff] }
  0x51   :  { %10050 = vmatpush3.bf16.msra.mxu0 %v11465_v42  ;;  %v12076_v42 = vpack.c.bf16 %v69_v39, %v68_v38  ;;  %v647_v38 = vld [vmem:[%s14687_s0 + $0xf2] sm:$0xff]  ;;  %v648_v39 = vld [vmem:[%s14687_s0 + $0xfa] sm:$0xff] }
  0x52   :  { %10087 = vmatprep.subr.bf16.mxu0 %v11466_v45 }
  0x54   :  { %10052 = vmatmul.mubr.bf16.vlgmr.msra.gmra.mrb[0].mxu0 %v11924_v48 }
  0x55   :  { %10088 = vmatpush3.bf16.msra.mxu0 %v11466_v45  ;;  %10055 = vmatprep.mubr.bf16.mxu0 %v11929_v50  ;;  %v627_v45 = vld [vmem:[%s14687_s0 + $0x2] sm:$0xff] }
  0x56   :  { %10089 = vmatprep.subr.bf16.mxu0 %v11467_v49 }
  0x59   :  { %10090 = vmatpush3.bf16.msra.mxu0 %v11467_v49  ;;  %v663_v49 = vpack.c.bf16 %v628_v46, %v627_v45  ;;  %v12207_v45 = vpack.c.bf16 %v648_v39, %v647_v38  ;;  %v649_v46 = vld [vmem:[%s14687_s0 + $0x10a] sm:$0xff]  ;;  %v659_v39 = vld [vmem:[%s14687_s0 + $0x182] sm:$0xff] }
  0x5a   :  { %10091 = vmatprep.subr.bf16.mxu0 %v11468_v55  ;;  %v8886_v38 = vld [vmem:[%s14687_s0 + $0x129] sm:$0xff] }
  0x5c   :  { %10056 = vmatmul.mubr.bf16.gmra.mrb[4].mxu0 %v11948_v56 }
  0x5d   :  { %10059 = vmatprep.mubr.bf16.mxu0 %v11953_v58  ;;  %10092 = vmatpush3.bf16.msra.mxu0 %v11468_v55  ;;  %v12107_v55 = vpack.c.bf16 %v630_v52, %v629_v51  ;;  %v8877_v51 = vld [vmem:[%s14687_s0 + $0xc1] sm:$0xff]  ;;  %v8878_v52 = vld [vmem:[%s14687_s0 + $0xc9] sm:$0xff] }
  0x5e   :  { %10093 = vmatprep.subr.bf16.mxu0 %v11469_v57 }
  0x61   :  { %10094 = vmatpush3.bf16.msra.mxu0 %v11469_v57  ;;  %v11475_v57 = vld [vmem:[%s14688_s1 + $0xc8] sm:$0xff]  }
  0x62   :  { %10095 = vmatprep.subr.bf16.mxu0 %v11470_v63 }
  0x64   :  { %10060 = vmatmul.mubr.bf16.gmra.mrb[8].mxu0 %v11972_v0 }
  0x65   :  { %10063 = vmatprep.mubr.bf16.mxu0 %v11977_v2  ;;  %10096 = vmatpush3.bf16.msra.mxu0 %v11470_v63  ;;  %v636_v63 = vld [vmem:[%s14687_s0 + $0x6a] sm:$0xff] }
  0x66   :  { %10097 = vmatprep.subr.bf16.mxu0 %v11471_v1  ;;  %v12133_v4 = vpack.c.bf16 %v636_v63, %v635_v62  ;;  %v653_v62 = vld [vmem:[%s14687_s0 + $0x13a] sm:$0xff] }
  0x67   :  { %v8879_v63 = vld [vmem:[%s14687_s0 + $0xd9] sm:$0xff] }
  0x69   :  { %10098 = vmatpush3.bf16.msra.mxu0 %v11471_v1  ;;  %v11476_v1 = vld [vmem:[%s14688_s1 + $0xd0] sm:$0xff]  }
  0x6a   :  { %10099 = vmatprep.subr.bf16.mxu0 %v11472_v7 }
  0x6c   :  { %10064 = vmatmul.mubr.bf16.gmra.mrb[12].mxu0 %v11996_v8 }
  0x6d   :  { %10067 = vmatprep.mubr.bf16.mxu0 %v12001_v10  ;;  %10100 = vmatpush3.bf16.msra.mxu0 %v11472_v7  ;;  %v638_v7 = vld [vmem:[%s14687_s0 + $0x82] sm:$0xff] }
  0x6e   :  { %10101 = vmatprep.subr.bf16.mxu0 %v11473_v9  ;;  %v12155_v13 = vpack.c.bf16 %v638_v7, %v637_v6  ;;  %v8881_v7 = vld [vmem:[%s14687_s0 + $0xf1] sm:$0xff] }
  0x71   :  { %10102 = vmatpush3.bf16.msra.mxu0 %v11473_v9  ;;  %v639_v9 = vld [vmem:[%s14687_s0 + $0x92] sm:$0xff] }
  0x72   :  { %10139 = vmatprep.subr.bf16.mxu0 %v11474_v15  ;;  %v12157_v14 = vpack.c.bf16 %v640_v11, %v639_v9  ;;  %v8882_v9 = vld [vmem:[%s14687_s0 + $0xf9] sm:$0xff] }
  0x73   :  { %v655_v11 = vld [vmem:[%s14687_s0 + $0x152] sm:$0xff] }
  0x74   :  { %10068 = vmatmul.mubr.bf16.gmra.mrb[16].mxu0 %v12020_v18 }
  0x75   :  { %10071 = vmatprep.mubr.bf16.mxu0 %v12022_v19 }
  0x7c   :  { %10072 = vmatmul.mubr.bf16.gmra.mrb[20].mxu0 %v12038_v26 }
  0x7d   :  { %10075 = vmatprep.mubr.bf16.mxu0 %v12040_v27 }
  0x84   :  { %10076 = vmatmul.mubr.bf16.gmra.mrb[24].mxu0 %v12056_v34 }
  0x85   :  { %10079 = vmatprep.mubr.bf16.mxu0 %v12058_v35 }
  0x8c   :  { %10080 = vmatmul.mubr.bf16.gmra.mrb[28].mxu0 %v12074_v41 }
  0x8d   :  { %10083 = vmatprep.mubr.bf16.mxu0 %v12076_v42 }
  0x94   :  { %10084 = vmatmul.mubr.bf16.gmra.mrb[32].mxu0 %v12092_v47 }
  0x95   :  { %10103 = vmatprep.mubr.bf16.mxu0 %v663_v49  ;;  %v650_v49 = vld [vmem:[%s14687_s0 + $0x112] sm:$0xff] }
  0x96   :  { %v12232_v60 = vpack.c.bf16 %v650_v49, %v649_v46  ;;  %v660_v46 = vld [vmem:[%s14687_s0 + $0x18a] sm:$0xff]  ;;  %v12301_v49 = vpack.c.bf16 %v8886_v38, %v8885_v37  ;;  %v8895_v38 = vld [vmem:[%s14687_s0 + $0x199] sm:$0xff] }
  0x9c   :  { %10104 = vmatmul.mubr.bf16.vlgmr.msra.gmra.mrb[0].mxu0 %v12107_v55 }
  0x9d   :  { %10140 = vmatpush3.bf16.msra.mxu0 %v11474_v15  ;;  %10107 = vmatprep.mubr.bf16.mxu0 %v12112_v59  ;;  %v11479_v15 = vld [vmem:[%s14688_s1 + $0xe8] sm:$0xff]  }
  0x9e   :  { %10141 = vmatprep.subr.bf16.mxu0 %v11475_v57 }
  0xa1   :  { %10142 = vmatpush3.bf16.msra.mxu0 %v11475_v57  ;;  %v12230_v57 = vpack.c.bf16 %v8878_v52, %v8877_v51  ;;  %v12307_v52 = vpack.c.bf16 %v660_v46, %v659_v39  ;;  %v8896_v39 = vld [vmem:[%s14687_s0 + $0x1a1] sm:$0xff] }
  0xa2   :  { %10143 = vmatprep.subr.bf16.mxu0 %v11476_v1  ;;  %v12369_v46 = vpack.c.bf16 %v8896_v39, %v8895_v38  ;;  %v8995_v38 = vld [vmem:[%s14687_s0 + $0xc0] sm:$0xff]  ;;  %v8996_v39 = vld [vmem:[%s14687_s0 + $0xc8] sm:$0xff] }
  0xa3   :  { %10015 = vmatprep.mubr.bf16.mxu1 %v12230_v57 }
  0xa4   :  { %10108 = vmatmul.mubr.bf16.gmra.mrb[4].mxu0 %v12131_v3 }
  0xa5   :  { %10111 = vmatprep.mubr.bf16.mxu0 %v12133_v4  ;;  %10144 = vmatpush3.bf16.msra.mxu0 %v11476_v1  ;;  %v8880_v1 = vld [vmem:[%s14687_s0 + $0xe1] sm:$0xff] }
  0xa6   :  { %10145 = vmatprep.subr.bf16.mxu0 %v11477_v5  ;;  %v12251_v6 = vpack.c.bf16 %v8880_v1, %v8879_v63  ;;  %v662_v63 = vld [vmem:[%s14687_s0 + $0x1a2] sm:$0xff] }
  0xa8   :  { %10016 = vmatmul.mubr.bf16.vlgmr.msra.gmra.mrb[0].mxu1 %v12251_v6 }
  0xa9   :  { %10146 = vmatpush3.bf16.msra.mxu0 %v11477_v5  ;;  %v654_v5 = vld [vmem:[%s14687_s0 + $0x142] sm:$0xff] }
  0xaa   :  { %10147 = vmatprep.subr.bf16.mxu0 %v11478_v12  ;;  %v12268_v20 = vpack.c.bf16 %v654_v5, %v653_v62  ;;  %v8888_v62 = vld [vmem:[%s14687_s0 + $0x141] sm:$0xff]  ;;  %v8889_v5 = vld [vmem:[%s14687_s0 + $0x151] sm:$0xff] }
  0xab   :  { %v12323_v1 = vpack.c.bf16 %v8888_v62, %v8887_v54  ;;  %v11507_v54 = vld [vmem:[%s14688_s1 + $0x1c8] sm:$0xff]   ;;  %v8989_v62 = vld [vmem:[%s14687_s0 + $0x78] sm:$0xff] }
  0xac   :  { %10112 = vmatmul.mubr.bf16.gmra.mrb[8].mxu0 %v12155_v13 }
  0xad   :  { %10115 = vmatprep.mubr.bf16.mxu0 %v12157_v14  ;;  %10148 = vmatpush3.bf16.msra.mxu0 %v11478_v12  ;;  %v656_v12 = vld [vmem:[%s14687_s0 + $0x15a] sm:$0xff] }
  0xae   :  { %10149 = vmatprep.subr.bf16.mxu0 %v11479_v15  ;;  %v12271_v21 = vpack.c.bf16 %v656_v12, %v655_v11  ;;  %v12334_v11 = vpack.c.bf16 %v662_v63, %v661_v53  ;;  %v8891_v12 = vld [vmem:[%s14687_s0 + $0x169] sm:$0xff]  ;;  %v8990_v63 = vld [vmem:[%s14687_s0 + $0x80] sm:$0xff] }
  0xaf   :  { %v11484_v53 = vld [vmem:[%s14688_s1 + $0x110] sm:$0xff]  }
  0xb1   :  { %10150 = vmatpush3.bf16.msra.mxu0 %v11479_v15  ;;  %v12265_v15 = vpack.c.bf16 %v8882_v9, %v8881_v7  ;;  %v8890_v7 = vld [vmem:[%s14687_s0 + $0x159] sm:$0xff] }
  0xb2   :  { %10151 = vmatprep.subr.bf16.mxu0 %v11480_v28  ;;  %v12331_v9 = vpack.c.bf16 %v8890_v7, %v8889_v5  ;;  %v8991_v5 = vld [vmem:[%s14687_s0 + $0x90] sm:$0xff]  ;;  %v8992_v7 = vld [vmem:[%s14687_s0 + $0x98] sm:$0xff] }
  0xb3   :  { %10019 = vmatprep.mubr.bf16.mxu1 %v12265_v15 }
  0xb4   :  { %10116 = vmatmul.mubr.bf16.gmra.mrb[12].mxu0 %v12179_v29 }
  0xb5   :  { %10119 = vmatprep.mubr.bf16.mxu0 %v12181_v30  ;;  %10152 = vmatpush3.bf16.msra.mxu0 %v11480_v28  ;;  %v8884_v28 = vld [vmem:[%s14687_s0 + $0x111] sm:$0xff] }
  0xb6   :  { %10153 = vmatprep.subr.bf16.mxu0 %v11481_v31  ;;  %v12287_v36 = vpack.c.bf16 %v8884_v28, %v8883_v23  ;;  %v8893_v28 = vld [vmem:[%s14687_s0 + $0x181] sm:$0xff] }
  0xb8   :  { %10020 = vmatmul.mubr.bf16.gmra.mrb[4].mxu1 %v12287_v36 }
  0xb9   :  { %10154 = vmatpush3.bf16.msra.mxu0 %v11481_v31  ;;  %v658_v31 = vld [vmem:[%s14687_s0 + $0x172] sm:$0xff]  ;;  %10023 = vmatprep.mubr.bf16.mxu1 %v12301_v49 }
  0xba   :  { %10191 = vmatprep.subr.bf16.mxu0 %v12203_v43  ;;  %v12304_v51 = vpack.c.bf16 %v658_v31, %v657_v22  ;;  %v8892_v22 = vld [vmem:[%s14687_s0 + $0x171] sm:$0xff]  ;;  %v8894_v31 = vld [vmem:[%s14687_s0 + $0x189] sm:$0xff] }
  0xbb   :  { %v12345_v23 = vpack.c.bf16 %v8892_v22, %v8891_v12  ;;  %v12353_v37 = vpack.c.bf16 %v8894_v31, %v8893_v28  ;;  %v1996_v12 = vpack.c.bf16 %v8990_v63, %v8989_v62  ;;  %v1997_v22 = vpack.c.bf16 %v8992_v7, %v8991_v5  ;;  %v11509_v28 = vld [vmem:[%s14688_s1 + $0x1d8] sm:$0xff]   ;;  %v8993_v31 = vld [vmem:[%s14687_s0 + $0xa8] sm:$0xff] }
  0xbc   :  { %10120 = vmatmul.mubr.bf16.gmra.mrb[16].mxu0 %v12205_v44  ;;  %v9046_v63 = vld [vmem:[%s14687_s0 + $0x51] sm:$0xff]  ;;  %v9047_v5 = vld [vmem:[%s14687_s0 + $0x61] sm:$0xff]  ;;  %v9048_v7 = vld [vmem:[%s14687_s0 + $0x69] sm:$0xff] }
  0xbd   :  { %10123 = vmatprep.mubr.bf16.mxu0 %v12207_v45 }
  0xc0   :  { %10024 = vmatmul.mubr.bf16.gmra.mrb[8].mxu1 %v12323_v1 }
  0xc1   :  { %10027 = vmatprep.mubr.bf16.mxu1 %v12331_v9 }
  0xc4   :  { %10124 = vmatmul.mubr.bf16.gmra.mrb[20].mxu0 %v12232_v60 }
  0xc5   :  { %10127 = vmatprep.mubr.bf16.mxu0 %v12235_v61 }
  0xc8   :  { %10028 = vmatmul.mubr.bf16.gmra.mrb[12].mxu1 %v12345_v23 }
  0xc9   :  { %10031 = vmatprep.mubr.bf16.mxu1 %v12353_v37 }
  0xcc   :  { %10128 = vmatmul.mubr.bf16.gmra.mrb[24].mxu0 %v12268_v20 }
  0xcd   :  { %10131 = vmatprep.mubr.bf16.mxu0 %v12271_v21 }
  0xd0   :  { %10032 = vmatmul.mubr.bf16.gmra.mrb[16].mxu1 %v12369_v46 }
  0xd4   :  { %10132 = vmatmul.mubr.bf16.gmra.mrb[28].mxu0 %v12304_v51 }
  0xd5   :  { %10135 = vmatprep.mubr.bf16.mxu0 %v12307_v52 }
  0xdc   :  { %10136 = vmatmul.mubr.bf16.gmra.mrb[32].mxu0 %v12334_v11 }
  0xdd   :  { %10155 = vmatprep.mubr.bf16.mxu0 %v11924_v48  ;;  %v11483_v48 = vld [vmem:[%s14688_s1 + $0x108] sm:$0xff]  }
  0xe4   :  { %10156 = vmatmul.mubr.bf16.vlgmr.msra.gmra.mrb[0].mxu0 %v11929_v50  ;;  %v11485_v50 = vld [vmem:[%s14688_s1 + $0x118] sm:$0xff]  }
  0xe5   :  { %10192 = vmatpush3.bf16.msra.mxu0 %v12203_v43  ;;  %10159 = vmatprep.mubr.bf16.mxu0 %v11948_v56  ;;  %v11486_v56 = vld [vmem:[%s14688_s1 + $0x120] sm:$0xff]   ;;  %v11487_v43 = vld [vmem:[%s14688_s1 + $0x128] sm:$0xff]  }
  0xe6   :  { %10193 = vmatprep.subr.bf16.mxu0 %v11483_v48 }
  0xe9   :  { %10194 = vmatpush3.bf16.msra.mxu0 %v11483_v48  ;;  %v8994_v48 = vld [vmem:[%s14687_s0 + $0xb0] sm:$0xff] }
  0xea   :  { %10195 = vmatprep.subr.bf16.mxu0 %v11484_v53 }
  0xec   :  { %10160 = vmatmul.mubr.bf16.gmra.mrb[4].mxu0 %v11953_v58  ;;  %v11488_v58 = vld [vmem:[%s14688_s1 + $0x130] sm:$0xff]  }
  0xed   :  { %10163 = vmatprep.mubr.bf16.mxu0 %v11972_v0  ;;  %10196 = vmatpush3.bf16.msra.mxu0 %v11484_v53  ;;  %v11489_v0 = vld [vmem:[%s14688_s1 + $0x138] sm:$0xff]   ;;  %v11510_v53 = vld [vmem:[%s14688_s1 + $0x1e0] sm:$0xff]  }
  0xee   :  { %10197 = vmatprep.subr.bf16.mxu0 %v11485_v50 }
  0xf1   :  { %10198 = vmatpush3.bf16.msra.mxu0 %v11485_v50  ;;  %v1998_v50 = vpack.c.bf16 %v8994_v48, %v8993_v31  ;;  %v9050_v31 = vld [vmem:[%s14687_s0 + $0x81] sm:$0xff]  ;;  %v9051_v48 = vld [vmem:[%s14687_s0 + $0x91] sm:$0xff] }
  0xf2   :  { %10199 = vmatprep.subr.bf16.mxu0 %v11486_v56 }
  0xf4   :  { %10164 = vmatmul.mubr.bf16.gmra.mrb[8].mxu0 %v11977_v2  ;;  %v11490_v2 = vld [vmem:[%s14688_s1 + $0x140] sm:$0xff]  }
  0xf5   :  { %10167 = vmatprep.mubr.bf16.mxu0 %v11996_v8  ;;  %10200 = vmatpush3.bf16.msra.mxu0 %v11486_v56  ;;  %v8837_v8 = vld [vmem:[%s14687_s0 + $0x1b0] sm:$0xff]  ;;  %v1999_v56 = vpack.c.bf16 %v8996_v39, %v8995_v38  ;;  %v9052_v38 = vld [vmem:[%s14687_s0 + $0x99] sm:$0xff] }
  0xf6   :  { %10201 = vmatprep.subr.bf16.mxu0 %v11487_v43  ;;  %v11516_v39 = vld [vmem:[%s14688_s1 + $0x210] sm:$0xff]  }
  0xf9   :  { %10202 = vmatpush3.bf16.msra.mxu0 %v11487_v43  ;;  %v11511_v43 = vld [vmem:[%s14688_s1 + $0x1e8] sm:$0xff]  }
  0xfa   :  { %10203 = vmatprep.subr.bf16.mxu0 %v11488_v58 }
  0xfc   :  { %10168 = vmatmul.mubr.bf16.gmra.mrb[12].mxu0 %v12001_v10  ;;  %v8838_v10 = vld [vmem:[%s14687_s0 + $0x1b8] sm:$0xff] }
  0xfd   :  { %10171 = vmatprep.mubr.bf16.mxu0 %v12020_v18  ;;  %10204 = vmatpush3.bf16.msra.mxu0 %v11488_v58  ;;  %v12413_v18 = vpack.c.bf16 %v8838_v10, %v8837_v8  ;;  %v8997_v58 = vld [vmem:[%s14687_s0 + $0xd8] sm:$0xff]  ;;  %v11512_v10 = vld [vmem:[%s14688_s1 + $0x1f0] sm:$0xff]  }
  0xfe   :  { %10205 = vmatprep.subr.bf16.mxu0 %v11489_v0  ;;  %v9000_v8 = vld [vmem:[%s14687_s0 + $0xf8] sm:$0xff] }
 0x101   :  { %10206 = vmatpush3.bf16.msra.mxu0 %v11489_v0  ;;  %v8998_v0 = vld [vmem:[%s14687_s0 + $0xe0] sm:$0xff] }
 0x102   :  { %10243 = vmatprep.subr.bf16.mxu0 %v11490_v2 }
 0x104   :  { %10172 = vmatmul.mubr.bf16.gmra.mrb[16].mxu0 %v12022_v19  ;;  %v11491_v19 = vld [vmem:[%s14688_s1 + $0x148] sm:$0xff]  }
 0x105   :  { %10175 = vmatprep.mubr.bf16.mxu0 %v12038_v26  ;;  %v11492_v26 = vld [vmem:[%s14688_s1 + $0x150] sm:$0xff]  }
 0x10c   :  { %10176 = vmatmul.mubr.bf16.gmra.mrb[20].mxu0 %v12040_v27  ;;  %v8898_v27 = vld [vmem:[%s14687_s0 + $0x1b9] sm:$0xff] }
 0x10d   :  { %10179 = vmatprep.mubr.bf16.mxu0 %v12056_v34 }
 0x114   :  { %10180 = vmatmul.mubr.bf16.gmra.mrb[24].mxu0 %v12058_v35  ;;  %v11499_v35 = vld [vmem:[%s14688_s1 + $0x188] sm:$0xff]  }
 0x115   :  { %10183 = vmatprep.mubr.bf16.mxu0 %v12074_v41  ;;  %v11500_v41 = vld [vmem:[%s14688_s1 + $0x190] sm:$0xff]  }
 0x11c   :  { %10184 = vmatmul.mubr.bf16.gmra.mrb[28].mxu0 %v12076_v42  ;;  %v11501_v42 = vld [vmem:[%s14688_s1 + $0x198] sm:$0xff]  }
 0x11d   :  { %10187 = vmatprep.mubr.bf16.mxu0 %v12092_v47  ;;  %v11502_v47 = vld [vmem:[%s14688_s1 + $0x1a0] sm:$0xff]  }
 0x124   :  { %10188 = vmatmul.mubr.bf16.gmra.mrb[32].mxu0 %v12413_v18 }
 0x125   :  { %10207 = vmatprep.mubr.bf16.mxu0 %v11831_v16  ;;  %v11493_v16 = vld [vmem:[%s14688_s1 + $0x158] sm:$0xff]  }
 0x12c   :  { %10208 = vmatmul.mubr.bf16.vlgmr.msra.gmra.mrb[0].mxu0 %v11833_v17  ;;  %v11494_v17 = vld [vmem:[%s14688_s1 + $0x160] sm:$0xff]  }
 0x12d   :  { %10244 = vmatpush3.bf16.msra.mxu0 %v11490_v2  ;;  %10211 = vmatprep.mubr.bf16.mxu0 %v11855_v24  ;;  %v11495_v24 = vld [vmem:[%s14688_s1 + $0x168] sm:$0xff]   ;;  %v8999_v2 = vld [vmem:[%s14687_s0 + $0xf0] sm:$0xff] }
 0x12e   :  { %10245 = vmatprep.subr.bf16.mxu0 %v11491_v19 }
 0x131   :  { %10246 = vmatpush3.bf16.msra.mxu0 %v11491_v19  ;;  %v2000_v19 = vpack.c.bf16 %v8998_v0, %v8997_v58  ;;  %v9054_v58 = vld [vmem:[%s14687_s0 + $0xb1] sm:$0xff]  ;;  %v11518_v0 = vld [vmem:[%s14688_s1 + $0x220] sm:$0xff]  }
 0x132   :  { %10247 = vmatprep.subr.bf16.mxu0 %v11492_v26 }
 0x134   :  { %10212 = vmatmul.mubr.bf16.gmra.mrb[4].mxu0 %v11857_v25  ;;  %v11496_v25 = vld [vmem:[%s14688_s1 + $0x170] sm:$0xff]  }
 0x135   :  { %10215 = vmatprep.mubr.bf16.mxu0 %v11879_v32  ;;  %10248 = vmatpush3.bf16.msra.mxu0 %v11492_v26  ;;  %v11497_v32 = vld [vmem:[%s14688_s1 + $0x178] sm:$0xff]   ;;  %v2001_v26 = vpack.c.bf16 %v9000_v8, %v8999_v2  ;;  %v11519_v8 = vld [vmem:[%s14688_s1 + $0x228] sm:$0xff]  }
 0x136   :  { %10249 = vmatprep.subr.bf16.mxu0 %v11493_v16 }
 0x139   :  { %10250 = vmatpush3.bf16.msra.mxu0 %v11493_v16  ;;  %v11513_v16 = vld [vmem:[%s14688_s1 + $0x1f8] sm:$0xff]  }
 0x13a   :  { %10251 = vmatprep.subr.bf16.mxu0 %v11494_v17 }
 0x13c   :  { %10216 = vmatmul.mubr.bf16.gmra.mrb[8].mxu0 %v11881_v33  ;;  %v11498_v33 = vld [vmem:[%s14688_s1 + $0x180] sm:$0xff]  }
 0x13d   :  { %10219 = vmatprep.mubr.bf16.mxu0 %v11903_v40  ;;  %10252 = vmatpush3.bf16.msra.mxu0 %v11494_v17  ;;  %v8897_v40 = vld [vmem:[%s14687_s0 + $0x1b1] sm:$0xff]  ;;  %v9001_v17 = vld [vmem:[%s14687_s0 + $0x108] sm:$0xff] }
 0x13e   :  { %10253 = vmatprep.subr.bf16.mxu0 %v11495_v24  ;;  %v12463_v34 = vpack.c.bf16 %v8898_v27, %v8897_v40 }
 0x141   :  { %10254 = vmatpush3.bf16.msra.mxu0 %v11495_v24  ;;  %v9002_v24 = vld [vmem:[%s14687_s0 + $0x110] sm:$0xff] }
 0x142   :  { %10255 = vmatprep.subr.bf16.mxu0 %v11496_v25  ;;  %v2002_v40 = vpack.c.bf16 %v9002_v24, %v9001_v17  ;;  %v9110_v17 = vld [vmem:[%s14687_s0 + $0x82] sm:$0xff]  ;;  %v9111_v24 = vld [vmem:[%s14687_s0 + $0x92] sm:$0xff] }
 0x144   :  { %10220 = vmatmul.mubr.bf16.gmra.mrb[12].mxu0 %v12230_v57 }
 0x145   :  { %10223 = vmatprep.mubr.bf16.mxu0 %v12251_v6  ;;  %10256 = vmatpush3.bf16.msra.mxu0 %v11496_v25  ;;  %v9003_v25 = vld [vmem:[%s14687_s0 + $0x120] sm:$0xff] }
 0x146   :  { %10257 = vmatprep.subr.bf16.mxu0 %v11497_v32 }
 0x149   :  { %10258 = vmatpush3.bf16.msra.mxu0 %v11497_v32  ;;  %v9004_v32 = vld [vmem:[%s14687_s0 + $0x128] sm:$0xff] }
 0x14a   :  { %10295 = vmatprep.subr.bf16.mxu0 %v11498_v33  ;;  %v2003_v27 = vpack.c.bf16 %v9004_v32, %v9003_v25  ;;  %v9112_v25 = vld [vmem:[%s14687_s0 + $0x9a] sm:$0xff] }
 0x14c   :  { %10224 = vmatmul.mubr.bf16.gmra.mrb[16].mxu0 %v12265_v15 }
 0x14d   :  { %10227 = vmatprep.mubr.bf16.mxu0 %v12287_v36 }
 0x154   :  { %10228 = vmatmul.mubr.bf16.gmra.mrb[20].mxu0 %v12301_v49 }
 0x155   :  { %10231 = vmatprep.mubr.bf16.mxu0 %v12323_v1 }
 0x15c   :  { %10232 = vmatmul.mubr.bf16.gmra.mrb[24].mxu0 %v12331_v9 }
 0x15d   :  { %10235 = vmatprep.mubr.bf16.mxu0 %v12345_v23 }
 0x164   :  { %10236 = vmatmul.mubr.bf16.gmra.mrb[28].mxu0 %v12353_v37 }
 0x165   :  { %10239 = vmatprep.mubr.bf16.mxu0 %v12369_v46 }
 0x16c   :  { %10240 = vmatmul.mubr.bf16.gmra.mrb[32].mxu0 %v12463_v34 }
 0x16d   :  { %10259 = vmatprep.mubr.bf16.mxu0 %v12107_v55  ;;  %v11503_v55 = vld [vmem:[%s14688_s1 + $0x1a8] sm:$0xff]  }
 0x174   :  { %10260 = vmatmul.mubr.bf16.vlgmr.msra.gmra.mrb[0].mxu0 %v12112_v59  ;;  %v11504_v59 = vld [vmem:[%s14688_s1 + $0x1b0] sm:$0xff]  }
 0x175   :  { %10296 = vmatpush3.bf16.msra.mxu0 %v11498_v33  ;;  %10263 = vmatprep.mubr.bf16.mxu0 %v12131_v3  ;;  %v11505_v3 = vld [vmem:[%s14688_s1 + $0x1b8] sm:$0xff]   ;;  %v11514_v33 = vld [vmem:[%s14688_s1 + $0x200] sm:$0xff]  }
 0x176   :  { %10297 = vmatprep.subr.bf16.mxu0 %v11499_v35 }
 0x179   :  { %10298 = vmatpush3.bf16.msra.mxu0 %v11499_v35  ;;  %v9005_v35 = vld [vmem:[%s14687_s0 + $0x138] sm:$0xff] }
 0x17a   :  { %10299 = vmatprep.subr.bf16.mxu0 %v11500_v41 }
 0x17c   :  { %10264 = vmatmul.mubr.bf16.gmra.mrb[4].mxu0 %v12133_v4  ;;  %v11506_v4 = vld [vmem:[%s14688_s1 + $0x1c0] sm:$0xff]  }
 0x17d   :  { %10267 = vmatprep.mubr.bf16.mxu0 %v12155_v13  ;;  %10300 = vmatpush3.bf16.msra.mxu0 %v11500_v41  ;;  %v8957_v13 = vld [vmem:[%s14687_s0 + $0x1b2] sm:$0xff]  ;;  %v9006_v41 = vld [vmem:[%s14687_s0 + $0x140] sm:$0xff] }
 0x17e   :  { %10301 = vmatprep.subr.bf16.mxu0 %v11501_v42 }
 0x181   :  { %10302 = vmatpush3.bf16.msra.mxu0 %v11501_v42  ;;  %v9007_v42 = vld [vmem:[%s14687_s0 + $0x150] sm:$0xff] }
 0x182   :  { %10303 = vmatprep.subr.bf16.mxu0 %v11502_v47 }
 0x184   :  { %10268 = vmatmul.mubr.bf16.gmra.mrb[8].mxu0 %v12157_v14  ;;  %v8958_v14 = vld [vmem:[%s14687_s0 + $0x1ba] sm:$0xff] }
 0x185   :  { %10271 = vmatprep.mubr.bf16.mxu0 %v12179_v29  ;;  %10304 = vmatpush3.bf16.msra.mxu0 %v11502_v47  ;;  %v8983_v29 = vld [vmem:[%s14687_s0 + $0x30] sm:$0xff]  ;;  %v9008_v47 = vld [vmem:[%s14687_s0 + $0x158] sm:$0xff] }
 0x186   :  { %10305 = vmatprep.subr.bf16.mxu0 %v11503_v55 }
 0x189   :  { %10306 = vmatpush3.bf16.msra.mxu0 %v11503_v55  ;;  %v2004_v55 = vpack.c.bf16 %v9006_v41, %v9005_v35  ;;  %v9115_v35 = vld [vmem:[%s14687_s0 + $0xc2] sm:$0xff]  ;;  %v9116_v41 = vld [vmem:[%s14687_s0 + $0xca] sm:$0xff] }
 0x18a   :  { %10307 = vmatprep.subr.bf16.mxu0 %v11504_v59 }
 0x18c   :  { %10272 = vmatmul.mubr.bf16.gmra.mrb[12].mxu0 %v12181_v30  ;;  %v8984_v30 = vld [vmem:[%s14687_s0 + $0x38] sm:$0xff] }
 0x18d   :  { %10275 = vmatprep.mubr.bf16.mxu0 %v12205_v44  ;;  %10308 = vmatpush3.bf16.msra.mxu0 %v11504_v59  ;;  %v12519_v44 = vpack.c.bf16 %v8958_v14, %v8957_v13  ;;  %v2005_v59 = vpack.c.bf16 %v9008_v47, %v9007_v42  ;;  %v9011_v13 = vld [vmem:[%s14687_s0 + $0x180] sm:$0xff]  ;;  %v9012_v14 = vld [vmem:[%s14687_s0 + $0x188] sm:$0xff]  ;;  %v2663_v47 = vpack.c.bf16 %v9116_v41, %v9115_v35 }
 0x18e   :  { %10309 = vmatprep.subr.bf16.mxu0 %v11505_v3 }
 0x191   :  { %10310 = vmatpush3.bf16.msra.mxu0 %v11505_v3  ;;  %v9009_v3 = vld [vmem:[%s14687_s0 + $0x168] sm:$0xff] }
 0x192   :  { %10347 = vmatprep.subr.bf16.mxu0 %v11506_v4 }
 0x194   :  { %10276 = vmatmul.mubr.bf16.gmra.mrb[16].mxu0 %v12207_v45  ;;  %v1993_v45 = vpack.c.bf16 %v8984_v30, %v8983_v29  ;;  %v2007_v30 = vpack.c.bf16 %v9012_v14, %v9011_v13 }
 0x195   :  { %10279 = vmatprep.mubr.bf16.mxu0 %v12232_v60  ;;  %v8985_v60 = vld [vmem:[%s14687_s0 + $0x48] sm:$0xff] }
 0x19c   :  { %10280 = vmatmul.mubr.bf16.gmra.mrb[20].mxu0 %v12235_v61  ;;  %v8986_v61 = vld [vmem:[%s14687_s0 + $0x50] sm:$0xff] }
 0x19d   :  { %10283 = vmatprep.mubr.bf16.mxu0 %v12268_v20  ;;  %v8987_v20 = vld [vmem:[%s14687_s0 + $0x60] sm:$0xff] }
 0x1a4   :  { %10284 = vmatmul.mubr.bf16.gmra.mrb[24].mxu0 %v12271_v21  ;;  %v8988_v21 = vld [vmem:[%s14687_s0 + $0x68] sm:$0xff] }
 0x1a5   :  { %10287 = vmatprep.mubr.bf16.mxu0 %v12304_v51  ;;  %v1994_v51 = vpack.c.bf16 %v8986_v61, %v8985_v60  ;;  %v9014_v60 = vld [vmem:[%s14687_s0 + $0x1a0] sm:$0xff] }
 0x1ac   :  { %10288 = vmatmul.mubr.bf16.gmra.mrb[28].mxu0 %v12307_v52  ;;  %v1995_v52 = vpack.c.bf16 %v8988_v21, %v8987_v20  ;;  %v9017_v20 = vld [vmem:[%s14687_s0 + $0x1c8] sm:$0xff]  ;;  %v9018_v21 = vld [vmem:[%s14687_s0 + $0x1d0] sm:$0xff] }
 0x1ad   :  { %10291 = vmatprep.mubr.bf16.mxu0 %v12334_v11  ;;  %v11508_v11 = vld [vmem:[%s14688_s1 + $0x1d0] sm:$0xff]  }
 0x1b4   :  { %10292 = vmatmul.mubr.bf16.gmra.mrb[32].mxu0 %v12519_v44 }
 0x1b5   :  { %10311 = vmatprep.mubr.bf16.mxu0 %v1993_v45  ;;  %v9013_v45 = vld [vmem:[%s14687_s0 + $0x198] sm:$0xff] }
 0x1b6   :  { %v2008_v61 = vpack.c.bf16 %v9014_v60, %v9013_v45  ;;  %v9123_v45 = vld [vmem:[%s14687_s0 + $0x122] sm:$0xff]  ;;  %v9124_v60 = vld [vmem:[%s14687_s0 + $0x12a] sm:$0xff] }
 0x1bc   :  { %10312 = vmatmul.mubr.bf16.vlgmr.msra.gmra.mrb[0].mxu0 %v1994_v51  ;;  %v9043_v51 = vld [vmem:[%s14687_s0 + $0x31] sm:$0xff] }
 0x1bd   :  { %10348 = vmatpush3.bf16.msra.mxu0 %v11506_v4  ;;  %10315 = vmatprep.mubr.bf16.mxu0 %v1995_v52  ;;  %v9010_v4 = vld [vmem:[%s14687_s0 + $0x170] sm:$0xff]  ;;  %v9044_v52 = vld [vmem:[%s14687_s0 + $0x39] sm:$0xff] }
 0x1be   :  { %10349 = vmatprep.subr.bf16.mxu0 %v11507_v54  ;;  %v2006_v29 = vpack.c.bf16 %v9010_v4, %v9009_v3  ;;  %v2325_v62 = vpack.c.bf16 %v9044_v52, %v9043_v51  ;;  %v9119_v3 = vld [vmem:[%s14687_s0 + $0xf2] sm:$0xff]  ;;  %v9120_v4 = vld [vmem:[%s14687_s0 + $0xfa] sm:$0xff]  ;;  %v9126_v51 = vld [vmem:[%s14687_s0 + $0x142] sm:$0xff] }
 0x1bf   :  { %v2665_v14 = vpack.c.bf16 %v9120_v4, %v9119_v3  ;;  %v9127_v52 = vld [vmem:[%s14687_s0 + $0x152] sm:$0xff] }
 0x1c1   :  { %10350 = vmatpush3.bf16.msra.mxu0 %v11507_v54  ;;  %v2010_v54 = vpack.c.bf16 %v9018_v21, %v9017_v20  ;;  %v2667_v20 = vpack.c.bf16 %v9124_v60, %v9123_v45  ;;  %v9125_v21 = vld [vmem:[%s14687_s0 + $0x13a] sm:$0xff] }
 0x1c2   :  { %10351 = vmatprep.subr.bf16.mxu0 %v11508_v11 }
 0x1c4   :  { %10316 = vmatmul.mubr.bf16.gmra.mrb[4].mxu0 %v1996_v12  ;;  %v2327_v12 = vpack.c.bf16 %v9048_v7, %v9047_v5  ;;  %v9130_v5 = vld [vmem:[%s14687_s0 + $0x172] sm:$0xff]  ;;  %v9131_v7 = vld [vmem:[%s14687_s0 + $0x182] sm:$0xff] }
 0x1c5   :  { %10319 = vmatprep.mubr.bf16.mxu0 %v1997_v22  ;;  %10352 = vmatpush3.bf16.msra.mxu0 %v11508_v11  ;;  %v11515_v22 = vld [vmem:[%s14688_s1 + $0x208] sm:$0xff]  }
 0x1c6   :  { %10353 = vmatprep.subr.bf16.mxu0 %v11509_v28 }
 0x1c9   :  { %10354 = vmatpush3.bf16.msra.mxu0 %v11509_v28  ;;  %v9049_v28 = vld [vmem:[%s14687_s0 + $0x79] sm:$0xff] }
 0x1ca   :  { %10355 = vmatprep.subr.bf16.mxu0 %v11510_v53 }
 0x1cc   :  { %10320 = vmatmul.mubr.bf16.gmra.mrb[8].mxu0 %v1998_v50  ;;  %v2329_v50 = vpack.c.bf16 %v9052_v38, %v9051_v48  ;;  %v9137_v38 = vld [vmem:[%s14687_s0 + $0x1ca] sm:$0xff] }
 0x1cd   :  { %10323 = vmatprep.mubr.bf16.mxu0 %v1999_v56  ;;  %10356 = vmatpush3.bf16.msra.mxu0 %v11510_v53  ;;  %v2328_v53 = vpack.c.bf16 %v9050_v31, %v9049_v28  ;;  %v11517_v56 = vld [vmem:[%s14688_s1 + $0x218] sm:$0xff]   ;;  %v9134_v31 = vld [vmem:[%s14687_s0 + $0x1a2] sm:$0xff] }
 0x1ce   :  { %10357 = vmatprep.subr.bf16.mxu0 %v11511_v43  ;;  %v9133_v28 = vld [vmem:[%s14687_s0 + $0x19a] sm:$0xff] }
 0x1cf   :  { %v2672_v48 = vpack.c.bf16 %v9134_v31, %v9133_v28 }
 0x1d1   :  { %10358 = vmatpush3.bf16.msra.mxu0 %v11511_v43  ;;  %v9053_v43 = vld [vmem:[%s14687_s0 + $0xa9] sm:$0xff] }
 0x1d2   :  { %10359 = vmatprep.subr.bf16.mxu0 %v11512_v10  ;;  %v2330_v2 = vpack.c.bf16 %v9054_v58, %v9053_v43  ;;  %v11524_v43 = vld [vmem:[#allocation3 + $0x50] sm:$0xff]   ;;  %v11526_v58 = vld [vmem:[#allocation3 + $0x60] sm:$0xff]  }
 0x1d4   :  { %10324 = vmatmul.mubr.bf16.gmra.mrb[12].mxu0 %v2000_v19  ;;  %v11521_v19 = vld [vmem:[%s14688_s1 + $0x238] sm:$0xff]  }
 0x1d5   :  { %10327 = vmatprep.mubr.bf16.mxu0 %v2001_v26  ;;  %10360 = vmatpush3.bf16.msra.mxu0 %v11512_v10  ;;  %v11520_v10 = vld [vmem:[%s14688_s1 + $0x230] sm:$0xff]  }
 0x1d6   :  { %10361 = vmatprep.subr.bf16.mxu0 %v11513_v16 }
 0x1d9   :  { %10362 = vmatpush3.bf16.msra.mxu0 %v11513_v16  ;;  %v9109_v16 = vld [vmem:[%s14687_s0 + $0x7a] sm:$0xff] }
 0x1da   :  { %10399 = vmatprep.subr.bf16.mxu0 %v11514_v33  ;;  %v2660_v32 = vpack.c.bf16 %v9110_v17, %v9109_v16 }
 0x1dc   :  { %10328 = vmatmul.mubr.bf16.gmra.mrb[16].mxu0 %v2002_v40  ;;  %v9113_v40 = vld [vmem:[%s14687_s0 + $0xaa] sm:$0xff] }
 0x1dd   :  { %10331 = vmatprep.mubr.bf16.mxu0 %v2003_v27  ;;  %v9114_v27 = vld [vmem:[%s14687_s0 + $0xb2] sm:$0xff] }
 0x1de   :  { %v2662_v42 = vpack.c.bf16 %v9114_v27, %v9113_v40 }
 0x1e4   :  { %10332 = vmatmul.mubr.bf16.gmra.mrb[20].mxu0 %v2004_v55  ;;  %v9117_v55 = vld [vmem:[%s14687_s0 + $0xda] sm:$0xff] }
 0x1e5   :  { %10335 = vmatprep.mubr.bf16.mxu0 %v2005_v59  ;;  %v9118_v59 = vld [vmem:[%s14687_s0 + $0xe2] sm:$0xff] }
 0x1e6   :  { %v2664_v13 = vpack.c.bf16 %v9118_v59, %v9117_v55 }
 0x1ec   :  { %10336 = vmatmul.mubr.bf16.gmra.mrb[24].mxu0 %v2006_v29  ;;  %v9121_v29 = vld [vmem:[%s14687_s0 + $0x10a] sm:$0xff] }
 0x1ed   :  { %10339 = vmatprep.mubr.bf16.mxu0 %v2007_v30  ;;  %v9122_v30 = vld [vmem:[%s14687_s0 + $0x112] sm:$0xff] }
 0x1f4   :  { %10340 = vmatmul.mubr.bf16.gmra.mrb[28].mxu0 %v2008_v61  ;;  %v2666_v61 = vpack.c.bf16 %v9122_v30, %v9121_v29 }
 0x1f5   :  { %10343 = vmatprep.mubr.bf16.mxu0 %v12413_v18  ;;  %v9045_v18 = vld [vmem:[%s14687_s0 + $0x49] sm:$0xff] }
 0x1f6   :  { %v2326_v11 = vpack.c.bf16 %v9046_v63, %v9045_v18  ;;  %v9129_v63 = vld [vmem:[%s14687_s0 + $0x16a] sm:$0xff] }
 0x1fc   :  { %10344 = vmatmul.mubr.bf16.gmra.mrb[32].mxu0 %v2010_v54  ;;  %v9128_v54 = vld [vmem:[%s14687_s0 + $0x15a] sm:$0xff] }
 0x1fd   :  { %10363 = vmatprep.mubr.bf16.mxu0 %v2325_v62  ;;  %v2668_v62 = vpack.c.bf16 %v9126_v51, %v9125_v21  ;;  %v2669_v18 = vpack.c.bf16 %v9128_v54, %v9127_v52  ;;  %v3515_v54 = vld [vmem:[#allocation2 + $0xc] sm:$0xf] }
 0x204   :  { %10364 = vmatmul.mubr.bf16.vlgmr.msra.gmra.mrb[0].mxu0 %v2326_v11  ;;  %v9132_v11 = vld [vmem:[%s14687_s0 + $0x18a] sm:$0xff] }
 0x205   :  { %10400 = vmatpush3.bf16.msra.mxu0 %v11514_v33  ;;  %10367 = vmatprep.mubr.bf16.mxu0 %v2327_v12  ;;  %v2661_v33 = vpack.c.bf16 %v9112_v25, %v9111_v24  ;;  %v2670_v12 = vpack.c.bf16 %v9130_v5, %v9129_v63  ;;  %v12855_v25 = vld [vmem:[%s14689_s2] ss:$0 sm:$0xff] }
 0x206   :  { %10401 = vmatprep.subr.bf16.mxu0 %v11515_v22 }
 0x209   :  { %10402 = vmatpush3.bf16.msra.mxu0 %v11515_v22  ;;  %v2671_v22 = vpack.c.bf16 %v9132_v11, %v9131_v7 }
 0x20a   :  { %10403 = vmatprep.subr.bf16.mxu0 %v11516_v39 }
 0x20c   :  { %10368 = vmatmul.mubr.bf16.gmra.mrb[4].mxu0 %v2328_v53 }
 0x20d   :  { %10371 = vmatprep.mubr.bf16.mxu0 %v2329_v50  ;;  %10404 = vmatpush3.bf16.msra.mxu0 %v11516_v39  ;;  %v9138_v39 = vld [vmem:[%s14687_s0 + $0x1d2] sm:$0xff] }
 0x20e   :  { %10405 = vmatprep.subr.bf16.mxu0 %v11517_v56  ;;  %v2674_v53 = vpack.c.bf16 %v9138_v39, %v9137_v38  ;;  %v11522_v50 = vld [vmem:[#allocation3 + $0x40] sm:$0xff]  }
 0x20f   :  { %10451 = vmatprep.subr.bf16.mxu1 %v11522_v50 }
 0x210   :  { %10452 = vmatpush3.bf16.msra.mxu1 %v11522_v50  ;;  %v3506_v50 = vld [vmem:[#allocation2] sm:$0xf] }
 0x211   :  { %10406 = vmatpush3.bf16.msra.mxu0 %v11517_v56  ;;  %v11523_v56 = vld [vmem:[#allocation3 + $0x48] sm:$0xff]  }
 0x212   :  { %10407 = vmatprep.subr.bf16.mxu0 %v11518_v0  ;;  %10453 = vmatprep.subr.bf16.mxu1 %v11523_v56 }
 0x214   :  { %10372 = vmatmul.mubr.bf16.gmra.mrb[8].mxu0 %v2330_v2  ;;  %10454 = vmatpush3.bf16.msra.mxu1 %v11523_v56 }
 0x215   :  { %10375 = vmatprep.mubr.bf16.mxu0 %v12230_v57  ;;  %10408 = vmatpush3.bf16.msra.mxu0 %v11518_v0  ;;  %v9077_v57 = vld [vmem:[%s14687_s0 + $0x1c9] sm:$0xff]  ;;  %v12820_v0 = vpop.f32.mrb[0].mxu1 }
 0x216   :  { %10409 = vmatprep.subr.bf16.mxu0 %v11519_v8  ;;  %10455 = vmatprep.subr.bf16.mxu1 %v11524_v43  ;;  %v12822_v2 = vpop.f32.mrb[1].mxu1 }
 0x218   :  { %10456 = vmatpush3.bf16.msra.mxu1 %v11524_v43 }
 0x219   :  { %10410 = vmatpush3.bf16.msra.mxu0 %v11519_v8  ;;  %v11527_v8 = vld [vmem:[#allocation3 + $0x68] sm:$0xff]  }
 0x21a   :  { %10411 = vmatprep.subr.bf16.mxu0 %v11520_v10 }
 0x21c   :  { %10376 = vmatmul.mubr.bf16.gmra.mrb[12].mxu0 %v12251_v6  ;;  %v9078_v6 = vld [vmem:[%s14687_s0 + $0x1d1] sm:$0xff] }
 0x21d   :  { %10379 = vmatprep.mubr.bf16.mxu0 %v12265_v15  ;;  %10412 = vmatpush3.bf16.msra.mxu0 %v11520_v10  ;;  %v9103_v15 = vld [vmem:[%s14687_s0 + $0x32] sm:$0xff]  ;;  %v12824_v10 = vpop.f32.mrb[2].mxu1 }
 0x21e   :  { %10413 = vmatprep.subr.bf16.mxu0 %v11521_v19 }
 0x221   :  { %10414 = vmatpush3.bf16.msra.mxu0 %v11521_v19  ;;  %v12826_v19 = vpop.f32.mrb[3].mxu1 }
 0x224   :  { %10380 = vmatmul.mubr.bf16.gmra.mrb[16].mxu0 %v12287_v36  ;;  %v9104_v36 = vld [vmem:[%s14687_s0 + $0x3a] sm:$0xff] }
 0x225   :  { %10383 = vmatprep.mubr.bf16.mxu0 %v12301_v49  ;;  %v2342_v49 = vpack.c.bf16 %v9078_v6, %v9077_v57  ;;  %v11528_v57 = vld [vmem:[#allocation3 + $0x70] sm:$0xff]   ;;  %v12828_v6 = vpop.f32.mrb[4].mxu1 }
 0x22c   :  { %10384 = vmatmul.mubr.bf16.gmra.mrb[20].mxu0 %v12323_v1  ;;  %v2657_v1 = vpack.c.bf16 %v9104_v36, %v9103_v15  ;;  %v12830_v15 = vpop.f32.mrb[5].mxu1 }
 0x22d   :  { %10387 = vmatprep.mubr.bf16.mxu0 %v12331_v9  ;;  %v9105_v9 = vld [vmem:[%s14687_s0 + $0x4a] sm:$0xff]  ;;  %v12832_v36 = vpop.f32.mrb[6].mxu1 }
 0x234   :  { %10388 = vmatmul.mubr.bf16.gmra.mrb[24].mxu0 %v12345_v23  ;;  %v9106_v23 = vld [vmem:[%s14687_s0 + $0x52] sm:$0xff] }
 0x235   :  { %10391 = vmatprep.mubr.bf16.mxu0 %v12353_v37  ;;  %v9107_v37 = vld [vmem:[%s14687_s0 + $0x62] sm:$0xff] }
 0x23c   :  { %10392 = vmatmul.mubr.bf16.gmra.mrb[28].mxu0 %v12369_v46  ;;  %v9108_v46 = vld [vmem:[%s14687_s0 + $0x6a] sm:$0xff] }
 0x23d   :  { %10395 = vmatprep.mubr.bf16.mxu0 %v12463_v34  ;;  %v2658_v34 = vpack.c.bf16 %v9106_v23, %v9105_v9  ;;  %v2659_v26 = vpack.c.bf16 %v9108_v46, %v9107_v37  ;;  %v11530_v23 = vld [vmem:[#allocation3] sm:$0xff]  }
 0x244   :  { %10396 = vmatmul.mubr.bf16.gmra.mrb[32].mxu0 %v2342_v49  ;;  %v11529_v49 = vld [vmem:[#allocation3 + $0x78] sm:$0xff]  }
 0x245   :  { %10415 = vmatprep.mubr.bf16.mxu0 %v2657_v1  ;;  %v12834_v1 = vpop.f32.mrb[7].mxu1 }
 0x246   :  { %v12836_v9 = vpop.f32.mrb[8].mxu1 }
 0x247   :  { %v12838_v37 = vpop.f32.mrb[9].mxu1 }
 0x248   :  { %v12840_v46 = vpop.f32.mrb[10].mxu1 }
 0x24c   :  { %10416 = vmatmul.mubr.bf16.vlgmr.msra.gmra.mrb[0].mxu0 %v2658_v34  ;;  %v12842_v34 = vpop.f32.mrb[11].mxu1 }
 0x24d   :  { %10419 = vmatprep.mubr.bf16.mxu0 %v2659_v26  ;;  %v12844_v26 = vpop.f32.mrb[12].mxu1 }
 0x24e   :  { %v12846_v16 = vpop.f32.mrb[13].mxu1 }
 0x24f   :  { %v12848_v17 = vpop.f32.mrb[14].mxu1 }
 0x250   :  { %v12850_v24 = vpop.f32.mrb[15].mxu1 }
 0x254   :  { %10420 = vmatmul.mubr.bf16.gmra.mrb[4].mxu0 %v2660_v32  ;;  %v12857_v32 = vpop.f32.mrb[16].mxu1 }
 0x255   :  { %10423 = vmatprep.mubr.bf16.mxu0 %v2661_v33 }
 0x25c   :  { %10424 = vmatmul.mubr.bf16.gmra.mrb[8].mxu0 %v2662_v42 }
 0x25d   :  { %10427 = vmatprep.mubr.bf16.mxu0 %v2663_v47 }
 0x264   :  { %10428 = vmatmul.mubr.bf16.gmra.mrb[12].mxu0 %v2664_v13 }
 0x265   :  { %10431 = vmatprep.mubr.bf16.mxu0 %v2665_v14 }
 0x26c   :  { %10432 = vmatmul.mubr.bf16.gmra.mrb[16].mxu0 %v2666_v61 }
 0x26d   :  { %10435 = vmatprep.mubr.bf16.mxu0 %v2667_v20 }
 0x274   :  { %10436 = vmatmul.mubr.bf16.gmra.mrb[20].mxu0 %v2668_v62 }
 0x275   :  { %10439 = vmatprep.mubr.bf16.mxu0 %v2669_v18 }
 0x27c   :  { %10440 = vmatmul.mubr.bf16.gmra.mrb[24].mxu0 %v2670_v12 }
 0x27d   :  { %10443 = vmatprep.mubr.bf16.mxu0 %v2671_v22 }
 0x284   :  { %10444 = vmatmul.mubr.bf16.gmra.mrb[28].mxu0 %v2672_v48  ;;  %v12871_v48 = vpop.f32.mrb[17].mxu1 }
 0x285   :  { %10447 = vmatprep.mubr.bf16.mxu0 %v12519_v44  ;;  %v11525_v44 = vld [vmem:[#allocation3 + $0x58] sm:$0xff]  }
 0x286   :  { %10457 = vmatprep.subr.bf16.mxu1 %v11525_v44 }
 0x287   :  { %10458 = vmatpush3.bf16.msra.mxu1 %v11525_v44 }
 0x288   :  { %10459 = vmatprep.subr.bf16.mxu1 %v11526_v58 }
 0x28b   :  { %10460 = vmatpush3.bf16.msra.mxu1 %v11526_v58 }
 0x28c   :  { %10448 = vmatmul.mubr.bf16.gmra.mrb[32].mxu0 %v2674_v53  ;;  %10461 = vmatprep.subr.bf16.mxu1 %v11527_v8 }
 0x28f   :  { %10462 = vmatpush3.bf16.msra.mxu1 %v11527_v8 }
 0x290   :  { %10463 = vmatprep.subr.bf16.mxu1 %v11528_v57 }
 0x293   :  { %10464 = vmatpush3.bf16.msra.mxu1 %v11528_v57 }
 0x294   :  { %10465 = vmatprep.subr.bf16.mxu1 %v11529_v49 }
 0x297   :  { %10466 = vmatpush3.bf16.msra.mxu1 %v11529_v49  ;;  %v3519_v49 = vld [vmem:[#allocation2 + $0x14] sm:$0x1] }
 0x298   :  { %10499 = vmatprep.subr.bf16.mxu1 %v11530_v23 }
 0x31f   :  { %v10417_v33 = vpop.f32.mrb[0].mxu0 }
 0x320   :  { %v2962_v40 = vadd.f32 %v10417_v33, %v12855_v25  ;;  %v2774_v27 = vpop.f32.mrb[1].mxu0 }
 0x321   :  { %v2960_v35 = vadd.f32 %v12855_v25, %v2774_v27  ;;  %v10418_v41 = vpop.f32.mrb[2].mxu0 }
 0x322   :  { %v2998_v42 = vmax.f32 %v2962_v40, 0.0  ;;  %v2963_v47 = vadd.f32 %v10418_v41, %v12855_v25  ;;  %v2777_v55 = vpop.f32.mrb[3].mxu0  ;;  %v12885_v40 = vpop.f32.mrb[18].mxu1 }
 0x323   :  { %v2996_v59 = vmax.f32 %v2960_v35, 0.0  ;;  %v2961_v3 = vadd.f32 %v12855_v25, %v2777_v55  ;;  %v12889_v55 = vpop.f32.mrb[19].mxu1 }
 0x324   :  { %v9499_v4 = vpack.c.bf16 %v2998_v42, %v2998_v42  ;;  %v2999_v13 = vmax.f32 %v2963_v47, 0.0  ;;  %v3512_v42 = vld [vmem:[#allocation2 + $0x8] sm:$0x1] }
 0x325   :  { %v9497_v14 = vpack.c.bf16 %v2996_v59, %v2996_v59  ;;  %v2997_v29 = vmax.f32 %v2961_v3, 0.0 }
 0x326   :  { %v3161_v30 = vshrl.u32 %v9499_v4, 16  ;;  %v9500_v45 = vpack.c.bf16 %v2999_v13, %v2999_v13  ;;  %v3164_v60 = vshll.u32 %v9499_v4, 16 }
 0x327   :  { %v3144_v61 = vshrl.u32 %v9497_v14, 16  ;;  %v3147_v20 = vshll.u32 %v9497_v14, 16  ;;  %v9498_v21 = vpack.c.bf16 %v2997_v29, %v2997_v29  ;;  %v10421_v51 = vpop.f32.mrb[4].mxu0 }
 0x328   :  { %v3163_v52 = vrot.slane %v3161_v30, 7  ;;  %v3169_v62 = vshrl.u32 %v9500_v45, 16  ;;  %v3172_v18 = vshll.u32 %v9500_v45, 16  ;;  %v2966_v63 = vadd.f32 %v10421_v51, %v12855_v25  ;;  %v2790_v5 = vpop.f32.mrb[5].mxu0 }
 0x329   :  { %v3146_v11 = vrot.slane %v3144_v61, 7  ;;  %v3152_v12 = vshrl.u32 %v9498_v21, 16  ;;  %v3155_v22 = vshll.u32 %v9498_v21, 16  ;;  %v2964_v28 = vadd.f32 %v12855_v25, %v2790_v5  ;;  %v10422_v31 = vpop.f32.mrb[6].mxu0  ;;  %v3529_v5 = vld [vmem:[#allocation2 + $0x24] sm:$0xf] }
 0x32a   :  { %v3166_v38 = vor.u32 %v3164_v60, %v3163_v52  ;;  %v3167_v39 = vrot.slane %v3163_v52, 4  ;;  %v3171_v56 = vrot.slane %v3169_v62, 7  ;;  %v3002_v43 = vmax.f32 %v2966_v63, 0.0  ;;  %v2793_v44 = vpop.f32.mrb[7].mxu0 }
 0x32b   :  { %v3149_v58 = vor.u32 %v3147_v20, %v3146_v11  ;;  %v3150_v8 = vrot.slane %v3146_v11, 4  ;;  %v3154_v23 = vrot.slane %v3152_v12, 7  ;;  %v3000_v33 = vmax.f32 %v2964_v28, 0.0 }
 0x32c   :  { %v3516_v27 = vsel %vm12866_vm5, %v3166_v38, %v3515_v54  ;;  %v3174_v35 = vor.u32 %v3172_v18, %v3171_v56  ;;  %v3176_v41 = vrot.slane %v3171_v56, 4  ;;  %v9503_v47 = vpack.c.bf16 %v3002_v43, %v3002_v43 }
 0x32d   :  { %3517 = vst [vmem:[#allocation2 + $0xc] sm:$0xf] %v3516_v27  ;;  %v3507_v59 = vsel %vm12866_vm5, %v3149_v58, %v3506_v50  ;;  %v3157_v3 = vor.u32 %v3155_v22, %v3154_v23  ;;  %v3159_v4 = vrot.slane %v3154_v23, 4  ;;  %v9501_v13 = vpack.c.bf16 %v3000_v33, %v3000_v33 }
 0x32e   :  { %3508 = vst [vmem:[#allocation2] sm:$0xf] %v3507_v59  ;;  %v3175_v14 = vsel %vm12881_vm7, %v3167_v39, %v3174_v35  ;;  %v3520_v29 = vsel %vm12875_vm6, %v3176_v41, %v3519_v49  ;;  %v3195_v30 = vshrl.u32 %v9503_v47, 16  ;;  %v3198_v61 = vshll.u32 %v9503_v47, 16 }
 0x32f   :  { %3518 = vst [vmem:[#allocation2 + $0x10] sm:$0xf] %v3175_v14  ;;  %3521 = vst [vmem:[#allocation2 + $0x14] sm:$0x1] %v3520_v29  ;;  %v3158_v45 = vsel %vm12881_vm7, %v3150_v8, %v3157_v3  ;;  %v3513_v60 = vsel %vm12875_vm6, %v3159_v4, %v3512_v42  ;;  %v3178_v20 = vshrl.u32 %v9501_v13, 16  ;;  %v10425_v21 = vpop.f32.mrb[8].mxu0  ;;  %v2967_v52 = vadd.f32 %v10422_v31, %v12855_v25 }
 0x330   :  { %3509 = vst [vmem:[#allocation2 + $0x4] sm:$0xf] %v3158_v45  ;;  %3514 = vst [vmem:[#allocation2 + $0x8] sm:$0x1] %v3513_v60  ;;  %v12901_v51 = vrot.slane %v3195_v30, 7  ;;  %v2965_v54 = vadd.f32 %v12855_v25, %v2793_v44  ;;  %v2970_v62 = vadd.f32 %v10425_v21, %v12855_v25  ;;  %v2806_v18 = vpop.f32.mrb[9].mxu0 }
 0x331   :  { %v11740_v63 = vmov 0   ;;  %v12907_v11 = vrot.slane %v3178_v20, 7  ;;  %v3181_v12 = vshll.u32 %v9501_v13, 16  ;;  %v2968_v22 = vadd.f32 %v12855_v25, %v2806_v18  ;;  %v10426_v28 = vpop.f32.mrb[10].mxu0  ;;  %v3522_v31 = vld [vmem:[#allocation2 + $0x18] sm:$0xf] }
 0x332   :  { %3748 = vst [vmem:[#allocation2 + $0x4] sm:$0xf] %v11740_v63  ;;  %v3200_v38 = vor.u32 %v3198_v61, %v12901_v51  ;;  %v3201_v39 = vrot.slane %v12901_v51, 4  ;;  %v3003_v50 = vmax.f32 %v2967_v52, 0.0  ;;  %v3001_v56 = vmax.f32 %v2965_v54, 0.0  ;;  %v2809_v43 = vpop.f32.mrb[11].mxu0 }
 0x333   :  { %v3183_v44 = vor.u32 %v3181_v12, %v12907_v11  ;;  %v3184_v58 = vrot.slane %v12907_v11, 4  ;;  %v3006_v8 = vmax.f32 %v2970_v62, 0.0  ;;  %v3004_v49 = vmax.f32 %v2968_v22, 0.0  ;;  %v3533_v21 = vld [vmem:[#allocation2 + $0x2c] sm:$0x1] }
 0x334   :  { %v3637_v23 = vld [vmem:[#allocation2 + $0xc] sm:$0x1]  ;;  %v3530_v27 = vsel %vm12866_vm5, %v3200_v38, %v3529_v5  ;;  %v9504_v35 = vpack.c.bf16 %v3003_v50, %v3003_v50  ;;  %v9502_v41 = vpack.c.bf16 %v3001_v56, %v3001_v56  ;;  %v2971_v42 = vadd.f32 %v10426_v28, %v12855_v25  ;;  %v3526_v28 = vld [vmem:[#allocation2 + $0x20] sm:$0x1] }
 0x335   :  { %v3638_v47 = vsel %vm12875_vm6, 0, %v3637_v23  ;;  %v3634_v59 = vld [vmem:[#allocation2] sm:$0x1]  ;;  %3531 = vst [vmem:[#allocation2 + $0x24] sm:$0xf] %v3530_v27  ;;  %v3523_v3 = vsel %vm12866_vm5, %v3183_v44, %v3522_v31  ;;  %v9507_v4 = vpack.c.bf16 %v3006_v8, %v3006_v8  ;;  %v9505_v13 = vpack.c.bf16 %v3004_v49, %v3004_v49 }
 0x336   :  { %3639 = vst [vmem:[#allocation2 + $0xc] sm:$0x1] %v3638_v47  ;;  %v3635_v14 = vsel %vm12875_vm6, 0, %v3634_v59  ;;  %v3692_v29 = vld [vmem:[#allocation2 + $0x14] sm:$0x1]  ;;  %v3203_v30 = vshrl.u32 %v9504_v35, 16  ;;  %v2969_v56 = vadd.f32 %v12855_v25, %v2809_v43 }
 0x337   :  { %3524 = vst [vmem:[#allocation2 + $0x18] sm:$0xf] %v3523_v3  ;;  %v3206_v45 = vshll.u32 %v9504_v35, 16  ;;  %v3186_v60 = vshrl.u32 %v9502_v41, 16  ;;  %3636 = vst [vmem:[#allocation2] sm:$0x1] %v3635_v14 }
 0x338   :  { %v3693_v61 = vsel %vm12916_vm8, 0, %v3692_v29  ;;  %v3689_v20 = vld [vmem:[#allocation2 + $0x8] sm:$0x1]  ;;  %v3189_v52 = vshll.u32 %v9502_v41, 16  ;;  %v3229_v54 = vshrl.u32 %v9507_v4, 16  ;;  %v3232_v62 = vshll.u32 %v9507_v4, 16 }
 0x339   :  { %3747 = vst [vmem:[#allocation2] sm:$0xf] %v11740_v63  ;;  %3694 = vst [vmem:[#allocation2 + $0x14] sm:$0x1] %v3693_v61  ;;  %v3690_v18 = vsel %vm12916_vm8, 0, %v3689_v20  ;;  %v3205_v5 = vrot.slane %v3203_v30, 7 }
 0x33a   :  { %v3188_v11 = vrot.slane %v3186_v60, 7  ;;  %v3212_v12 = vshrl.u32 %v9505_v13, 16  ;;  %v10429_v22 = vpop.f32.mrb[12].mxu0  ;;  %3691 = vst [vmem:[#allocation2 + $0x8] sm:$0x1] %v3690_v18  ;;  %v12934_v38 = vrot.slane %v3229_v54, 7 }
 0x33b   :  { %v3215_v31 = vshll.u32 %v9505_v13, 16  ;;  %v3007_v50 = vmax.f32 %v2971_v42, 0.0  ;;  %v2822_v44 = vpop.f32.mrb[13].mxu0  ;;  %3749 = vst [vmem:[#allocation2 + $0x8] sm:$0x1] %v11740_v63  ;;  %v3208_v8 = vor.u32 %v3206_v45, %v3205_v5  ;;  %v3210_v49 = vrot.slane %v3205_v5, 4 }
 0x33c   :  { %v3191_v23 = vor.u32 %v3189_v52, %v3188_v11  ;;  %v3193_v27 = vrot.slane %v3188_v11, 4  ;;  %v3543_v35 = vld [vmem:[#allocation2 + $0x3c] sm:$0xf]  ;;  %v10430_v41 = vpop.f32.mrb[14].mxu0  ;;  %v3234_v47 = vor.u32 %v3232_v62, %v12934_v38  ;;  %v3235_v59 = vrot.slane %v12934_v38, 4 }
 0x33d   :  { %v12940_v3 = vrot.slane %v3212_v12, 7  ;;  %v9508_v4 = vpack.c.bf16 %v3007_v50, %v3007_v50  ;;  %v2825_v13 = vpop.f32.mrb[15].mxu0  ;;  %v3643_v42 = vld [vmem:[#allocation2 + $0x24] sm:$0x1]  ;;  %v3209_v43 = vsel %vm12881_vm7, %v3201_v39, %v3208_v8  ;;  %v3534_v14 = vsel %vm12875_vm6, %v3210_v49, %v3533_v21  ;;  %v3536_v45 = vld [vmem:[#allocation2 + $0x30] sm:$0xf] }
 0x33e   :  { %v3192_v29 = vsel %vm12881_vm7, %v3184_v58, %v3191_v23  ;;  %v3527_v30 = vsel %vm12875_vm6, %v3193_v27, %v3526_v28  ;;  %v3644_v60 = vsel %vm12875_vm6, 0, %v3643_v42  ;;  %v3640_v61 = vld [vmem:[#allocation2 + $0x18] sm:$0x1]  ;;  %3532 = vst [vmem:[#allocation2 + $0x28] sm:$0xf] %v3209_v43  ;;  %v3544_v51 = vsel %vm12866_vm5, %v3234_v47, %v3543_v35 }
 0x33f   :  { %3535 = vst [vmem:[#allocation2 + $0x2c] sm:$0x1] %v3534_v14  ;;  %3525 = vst [vmem:[#allocation2 + $0x1c] sm:$0xf] %v3192_v29  ;;  %v3217_v39 = vor.u32 %v3215_v31, %v12940_v3  ;;  %v3218_v20 = vrot.slane %v12940_v3, 4  ;;  %v3641_v58 = vsel %vm12875_vm6, 0, %v3640_v61  ;;  %v2974_v18 = vadd.f32 %v10429_v22, %v12855_v25 }
 0x340   :  { %3528 = vst [vmem:[#allocation2 + $0x20] sm:$0x1] %v3527_v30  ;;  %3645 = vst [vmem:[#allocation2 + $0x24] sm:$0x1] %v3644_v60  ;;  %v3237_v21 = vshrl.u32 %v9508_v4, 16  ;;  %v3240_v52 = vshll.u32 %v9508_v4, 16  ;;  %v2972_v5 = vadd.f32 %v12855_v25, %v2822_v44  ;;  %v2975_v11 = vadd.f32 %v10430_v41, %v12855_v25 }
 0x341   :  { %3545 = vst [vmem:[#allocation2 + $0x3c] sm:$0xf] %v3544_v51  ;;  %v3005_v54 = vmax.f32 %v2969_v56, 0.0  ;;  %3642 = vst [vmem:[#allocation2 + $0x18] sm:$0x1] %v3641_v58  ;;  %v3537_v62 = vsel %vm12866_vm5, %v3217_v39, %v3536_v45  ;;  %v10433_v12 = vpop.f32.mrb[16].mxu0  ;;  %v2973_v31 = vadd.f32 %v12855_v25, %v2825_v13 }
 0x342   :  { %3538 = vst [vmem:[#allocation2 + $0x30] sm:$0xf] %v3537_v62  ;;  %v3239_v28 = vrot.slane %v3237_v21, 7  ;;  %v10899_v50 = vadd.f32 %v10433_v12, %v12820_v0  ;;  %v2838_v8 = vpop.f32.mrb[17].mxu0  ;;  %v3547_v56 = vld [vmem:[#allocation2 + $0x44] sm:$0x1] }
 0x343   :  { %v9506_v38 = vpack.c.bf16 %v3005_v54, %v3005_v54  ;;  %v3010_v49 = vmax.f32 %v2974_v18, 0.0  ;;  %v3008_v23 = vmax.f32 %v2972_v5, 0.0  ;;  %v3011_v27 = vmax.f32 %v2975_v11, 0.0  ;;  %v12968_v22 = vpop.f32.mrb[18].mxu0  ;;  %v3540_v42 = vld [vmem:[#allocation2 + $0x38] sm:$0x1] }
 0x344   :  { %v10900_v35 = vadd.f32 %v2838_v8, %v12822_v2  ;;  %v3242_v44 = vor.u32 %v3240_v52, %v3239_v28  ;;  %v3244_v47 = vrot.slane %v3239_v28, 4  ;;  %v12970_v4 = vpop.f32.mrb[19].mxu0  ;;  %v3009_v0 = vmax.f32 %v2973_v31, 0.0 }
 0x345   :  { %v3220_v41 = vshrl.u32 %v9506_v38, 16  ;;  %v3223_v3 = vshll.u32 %v9506_v38, 16  ;;  %v9511_v43 = vpack.c.bf16 %v3010_v49, %v3010_v49  ;;  %v9509_v13 = vpack.c.bf16 %v3008_v23, %v3008_v23 }
 0x346   :  { %v9512_v14 = vpack.c.bf16 %v3011_v27, %v3011_v27  ;;  %v3698_v29 = vld [vmem:[#allocation2 + $0x2c] sm:$0x1]  ;;  %v3243_v45 = vsel %vm12881_vm7, %v3235_v59, %v3242_v44  ;;  %v3548_v2 = vsel %vm12875_vm6, %v3244_v47, %v3547_v56  ;;  %v2978_v61 = vadd.f32 %v10899_v50, %v12855_v25  ;;  %v3557_v56 = vld [vmem:[#allocation2 + $0x54] sm:$0xf]  ;;  %v3550_v47 = vld [vmem:[#allocation2 + $0x48] sm:$0xf] }
 0x347   :  { %v3695_v30 = vld [vmem:[#allocation2 + $0x20] sm:$0x1]  ;;  %v3222_v60 = vrot.slane %v3220_v41, 7  ;;  %v3699_v51 = vsel %vm12916_vm8, 0, %v3698_v29  ;;  %3546 = vst [vmem:[#allocation2 + $0x40] sm:$0xf] %v3243_v45 }
 0x348   :  { %v3696_v39 = vsel %vm12916_vm8, 0, %v3695_v30  ;;  %v3649_v58 = vld [vmem:[#allocation2 + $0x3c] sm:$0x1]  ;;  %3549 = vst [vmem:[#allocation2 + $0x44] sm:$0x1] %v3548_v2  ;;  %v3263_v21 = vshrl.u32 %v9511_v43, 16 }
 0x349   :  { %v3266_v52 = vshll.u32 %v9511_v43, 16  ;;  %3700 = vst [vmem:[#allocation2 + $0x2c] sm:$0x1] %v3699_v51  ;;  %3697 = vst [vmem:[#allocation2 + $0x20] sm:$0x1] %v3696_v39  ;;  %v3650_v59 = vsel %vm12875_vm6, 0, %v3649_v58  ;;  %v3225_v54 = vor.u32 %v3223_v3, %v3222_v60  ;;  %v9510_v3 = vpack.c.bf16 %v3009_v0, %v3009_v0 }
 0x34a   :  { %v3227_v62 = vrot.slane %v3222_v60, 4  ;;  %v3246_v18 = vshrl.u32 %v9509_v13, 16  ;;  %3651 = vst [vmem:[#allocation2 + $0x3c] sm:$0x1] %v3650_v59  ;;  %v3646_v5 = vld [vmem:[#allocation2 + $0x30] sm:$0x1] }
 0x34b   :  { %v3265_v11 = vrot.slane %v3263_v21, 7  ;;  %v3249_v12 = vshll.u32 %v9509_v13, 16  ;;  %v3271_v28 = vshrl.u32 %v9512_v14, 16  ;;  %v3274_v38 = vshll.u32 %v9512_v14, 16  ;;  %v10437_v23 = vpop.f32.mrb[20].mxu0 }
 0x34c   :  { %v3647_v31 = vsel %vm12875_vm6, 0, %v3646_v5  ;;  %v3226_v50 = vsel %vm12881_vm7, %v3218_v20, %v3225_v54  ;;  %v3541_v8 = vsel %vm12875_vm6, %v3227_v62, %v3540_v42  ;;  %v3248_v49 = vrot.slane %v3246_v18, 7  ;;  %v2854_v43 = vpop.f32.mrb[21].mxu0  ;;  %v3561_v29 = vld [vmem:[#allocation2 + $0x5c] sm:$0x1] }
 0x34d   :  { %3648 = vst [vmem:[#allocation2 + $0x30] sm:$0x1] %v3647_v31  ;;  %3539 = vst [vmem:[#allocation2 + $0x34] sm:$0xf] %v3226_v50  ;;  %v3268_v27 = vor.u32 %v3266_v52, %v3265_v11  ;;  %v3269_v44 = vrot.slane %v3265_v11, 4  ;;  %v3273_v41 = vrot.slane %v3271_v28, 7  ;;  %v2976_v20 = vadd.f32 %v10900_v35, %v12855_v25 }
 0x34e   :  { %3542 = vst [vmem:[#allocation2 + $0x38] sm:$0x1] %v3541_v8  ;;  %v3251_v13 = vor.u32 %v3249_v12, %v3248_v49  ;;  %v3252_v14 = vrot.slane %v3248_v49, 4  ;;  %v3014_v30 = vmax.f32 %v2978_v61, 0.0  ;;  %v10438_v45 = vpop.f32.mrb[22].mxu0  ;;  %v3254_v51 = vshrl.u32 %v9510_v3, 16 }
 0x34f   :  { %v3558_v42 = vsel %vm12866_vm5, %v3268_v27, %v3557_v56  ;;  %v3276_v2 = vor.u32 %v3274_v38, %v3273_v41  ;;  %v3278_v60 = vrot.slane %v3273_v41, 4  ;;  %v12992_v39 = vpop.f32.mrb[23].mxu0  ;;  %v3704_v58 = vld [vmem:[#allocation2 + $0x44] sm:$0x1]  ;;  %v3257_v21 = vshll.u32 %v9510_v3, 16 }
 0x350   :  { %3559 = vst [vmem:[#allocation2 + $0x54] sm:$0xf] %v3558_v42  ;;  %v3551_v0 = vsel %vm12866_vm5, %v3251_v13, %v3550_v47  ;;  %v9515_v52 = vpack.c.bf16 %v3014_v30, %v3014_v30  ;;  %v3012_v59 = vmax.f32 %v2976_v20, 0.0  ;;  %v3705_v35 = vsel %vm12916_vm8, 0, %v3704_v58  ;;  %v3554_v18 = vld [vmem:[#allocation2 + $0x50] sm:$0x1] }
 0x351   :  { %3552 = vst [vmem:[#allocation2 + $0x48] sm:$0xf] %v3551_v0  ;;  %v3277_v61 = vsel %vm12881_vm7, %v3269_v44, %v3276_v2  ;;  %v3562_v54 = vsel %vm12875_vm6, %v3278_v60, %v3561_v29  ;;  %v3256_v62 = vrot.slane %v3254_v51, 7  ;;  %3706 = vst [vmem:[#allocation2 + $0x44] sm:$0x1] %v3705_v35  ;;  %v10901_v28 = vadd.f32 %v12968_v22, %v12824_v10  ;;  %v13007_v56 = vpop.f32.mrb[24].mxu0 }
 0x352   :  { %3560 = vst [vmem:[#allocation2 + $0x58] sm:$0xf] %v3277_v61  ;;  %3563 = vst [vmem:[#allocation2 + $0x5c] sm:$0x1] %v3562_v54  ;;  %v3297_v5 = vshrl.u32 %v9515_v52, 16  ;;  %v3300_v11 = vshll.u32 %v9515_v52, 16  ;;  %v9513_v12 = vpack.c.bf16 %v3012_v59, %v3012_v59  ;;  %v10902_v50 = vadd.f32 %v12970_v4, %v12826_v19 }
 0x353   :  { %v3259_v38 = vor.u32 %v3257_v21, %v3256_v62  ;;  %v3261_v31 = vrot.slane %v3256_v62, 4  ;;  %v10903_v8 = vadd.f32 %v10437_v23, %v12828_v6  ;;  %v2979_v41 = vadd.f32 %v10901_v28, %v12855_v25  ;;  %v13012_v3 = vpop.f32.mrb[25].mxu0  ;;  %v3571_v6 = vld [vmem:[#allocation2 + $0x6c] sm:$0xf]  ;;  %v3564_v4 = vld [vmem:[#allocation2 + $0x60] sm:$0xf] }
 0x354   :  { %v13009_v27 = vrot.slane %v3297_v5, 7  ;;  %v3280_v44 = vshrl.u32 %v9513_v12, 16  ;;  %v3283_v47 = vshll.u32 %v9513_v12, 16  ;;  %v2977_v23 = vadd.f32 %v10902_v50, %v12855_v25  ;;  %v13021_v13 = vpop.f32.mrb[26].mxu0  ;;  %v13046_v12 = vld [vmem:[#allocation2] sm:$0xf] }
 0x355   :  { %v3701_v49 = vld [vmem:[#allocation2 + $0x38] sm:$0x1]  ;;  %v3260_v22 = vsel %vm12881_vm7, %v3252_v14, %v3259_v38  ;;  %v3555_v19 = vsel %vm12875_vm6, %v3261_v31, %v3554_v18  ;;  %v3015_v42 = vmax.f32 %v2979_v41, 0.0  ;;  %v13027_v14 = vpop.f32.mrb[27].mxu0  ;;  %v2982_v51 = vadd.f32 %v10903_v8, %v12855_v25 }
 0x356   :  { %v3702_v10 = vsel %vm12916_vm8, 0, %v3701_v49  ;;  %3553 = vst [vmem:[#allocation2 + $0x4c] sm:$0xf] %v3260_v22  ;;  %3556 = vst [vmem:[#allocation2 + $0x50] sm:$0x1] %v3555_v19  ;;  %v3302_v29 = vor.u32 %v3300_v11, %v13009_v27  ;;  %v3303_v30 = vrot.slane %v13009_v27, 4  ;;  %v10904_v58 = vadd.f32 %v2854_v43, %v12830_v15 }
 0x357   :  { %3703 = vst [vmem:[#allocation2 + $0x38] sm:$0x1] %v3702_v10  ;;  %v13025_v20 = vrot.slane %v3280_v44, 7  ;;  %v3655_v2 = vld [vmem:[#allocation2 + $0x54] sm:$0x1]  ;;  %v3013_v60 = vmax.f32 %v2977_v23, 0.0  ;;  %v10905_v0 = vadd.f32 %v10438_v45, %v12832_v36  ;;  %v9516_v15 = vpack.c.bf16 %v3015_v42, %v3015_v42 }
 0x358   :  { %v3656_v21 = vsel %vm12875_vm6, 0, %v3655_v2  ;;  %v3652_v52 = vld [vmem:[#allocation2 + $0x48] sm:$0x1]  ;;  %v3572_v59 = vsel %vm12866_vm5, %v3302_v29, %v3571_v6  ;;  %v3018_v36 = vmax.f32 %v2982_v51, 0.0  ;;  %v2980_v5 = vadd.f32 %v10904_v58, %v12855_v25  ;;  %v13048_v8 = vpop.f32.mrb[28].mxu0 }
 0x359   :  { %v3285_v35 = vor.u32 %v3283_v47, %v13025_v20  ;;  %v3286_v61 = vrot.slane %v13025_v20, 4  ;;  %3657 = vst [vmem:[#allocation2 + $0x54] sm:$0x1] %v3656_v21  ;;  %v3653_v54 = vsel %vm12875_vm6, 0, %v3652_v52  ;;  %v3710_v62 = vld [vmem:[#allocation2 + $0x5c] sm:$0x1]  ;;  %v9514_v43 = vpack.c.bf16 %v3013_v60, %v3013_v60 }
 0x35a   :  { %3573 = vst [vmem:[#allocation2 + $0x6c] sm:$0xf] %v3572_v59  ;;  %3654 = vst [vmem:[#allocation2 + $0x48] sm:$0x1] %v3653_v54  ;;  %v3711_v45 = vsel %vm12916_vm8, 0, %v3710_v62  ;;  %v2983_v11 = vadd.f32 %v10905_v0, %v12855_v25  ;;  %v3305_v28 = vshrl.u32 %v9516_v15, 16  ;;  %v9519_v44 = vpack.c.bf16 %v3018_v36, %v3018_v36 }
 0x35b   :  { %v3565_v18 = vsel %vm12866_vm5, %v3285_v35, %v3564_v4  ;;  %3712 = vst [vmem:[#allocation2 + $0x5c] sm:$0x1] %v3711_v45  ;;  %v3308_v38 = vshll.u32 %v9516_v15, 16  ;;  %v3288_v31 = vshrl.u32 %v9514_v43, 16  ;;  %v3291_v50 = vshll.u32 %v9514_v43, 16  ;;  %v13052_v22 = vpop.f32.mrb[29].mxu0 }
 0x35c   :  { %3566 = vst [vmem:[#allocation2 + $0x60] sm:$0xf] %v3565_v18  ;;  %v3575_v49 = vld [vmem:[#allocation2 + $0x74] sm:$0x1]  ;;  %v3016_v47 = vmax.f32 %v2980_v5, 0.0  ;;  %v3019_v41 = vmax.f32 %v2983_v11, 0.0  ;;  %v10906_v10 = vadd.f32 %v12992_v39, %v12834_v1 }
 0x35d   :  { %v3707_v19 = vld [vmem:[#allocation2 + $0x50] sm:$0x1]  ;;  %v3307_v6 = vrot.slane %v3305_v28, 7  ;;  %v3290_v4 = vrot.slane %v3288_v31, 7  ;;  %v3822_v23 = vshrl.u32 %v13046_v12, 16  ;;  %v3825_v29 = vshll.u32 %v13046_v12, 16 }
 0x35e   :  { %v3708_v20 = vsel %vm12916_vm8, 0, %v3707_v19  ;;  %v3568_v42 = vld [vmem:[#allocation2 + $0x68] sm:$0x1]  ;;  %v3331_v2 = vshrl.u32 %v9519_v44, 16  ;;  %v3334_v60 = vshll.u32 %v9519_v44, 16  ;;  %v9517_v51 = vpack.c.bf16 %v3016_v47, %v3016_v47  ;;  %v13058_v58 = vpop.f32.mrb[30].mxu0 }
 0x35f   :  { %3709 = vst [vmem:[#allocation2 + $0x50] sm:$0x1] %v3708_v20  ;;  %v3310_v1 = vor.u32 %v3308_v38, %v3307_v6  ;;  %v3312_v39 = vrot.slane %v3307_v6, 4  ;;  %v3293_v0 = vor.u32 %v3291_v50, %v3290_v4  ;;  %v3295_v21 = vrot.slane %v3290_v4, 4  ;;  %v3585_v52 = vld [vmem:[#allocation2 + $0x84] sm:$0xf] }
 0x360   :  { %v13060_v59 = vpop.f32.mrb[31].mxu0  ;;  %v3333_v54 = vrot.slane %v3331_v2, 7  ;;  %v3314_v62 = vshrl.u32 %v9517_v51, 16  ;;  %v3317_v15 = vshll.u32 %v9517_v51, 16  ;;  %v9520_v43 = vpack.c.bf16 %v3019_v41, %v3019_v41  ;;  %v3578_v11 = vld [vmem:[#allocation2 + $0x78] sm:$0xf] }
 0x361   :  { %v3661_v35 = vld [vmem:[#allocation2 + $0x6c] sm:$0x1]  ;;  %v3311_v45 = vsel %vm12881_vm7, %v3303_v30, %v3310_v1  ;;  %v3576_v18 = vsel %vm12875_vm6, %v3312_v39, %v3575_v49  ;;  %v3294_v5 = vsel %vm12881_vm7, %v3286_v61, %v3293_v0  ;;  %v3755_v12 = vld [vmem:[#allocation2 + $0x4] sm:$0xf]  ;;  %v3569_v38 = vsel %vm12875_vm6, %v3295_v21, %v3568_v42  ;;  %v3802_v41 = vld [vmem:[#allocation2 + $0x8] sm:$0x1] }
 0x362   :  { %v3662_v36 = vsel %vm12875_vm6, 0, %v3661_v35  ;;  %3574 = vst [vmem:[#allocation2 + $0x70] sm:$0xf] %v3311_v45  ;;  %3577 = vst [vmem:[#allocation2 + $0x74] sm:$0x1] %v3576_v18  ;;  %v3336_v27 = vor.u32 %v3334_v60, %v3333_v54  ;;  %v3337_v31 = vrot.slane %v3333_v54, 4  ;;  %v2981_v47 = vadd.f32 %v10906_v10, %v12855_v25 }
 0x363   :  { %3663 = vst [vmem:[#allocation2 + $0x6c] sm:$0x1] %v3662_v36  ;;  %v3658_v28 = vld [vmem:[#allocation2 + $0x60] sm:$0x1]  ;;  %3567 = vst [vmem:[#allocation2 + $0x64] sm:$0xf] %v3294_v5 }
 0x364   :  { %v13074_v50 = vrot.slane %v3314_v62, 7  ;;  %v3756_v30 = vld [vmem:[#allocation2 + $0xc] sm:$0xf]  ;;  %v3659_v49 = vsel %vm12875_vm6, 0, %v3658_v28  ;;  %3570 = vst [vmem:[#allocation2 + $0x68] sm:$0x1] %v3569_v38  ;;  %v3586_v6 = vsel %vm12866_vm5, %v3336_v27, %v3585_v52 }
 0x365   :  { %v3339_v61 = vshrl.u32 %v9520_v43, 16  ;;  %v3342_v44 = vshll.u32 %v9520_v43, 16  ;;  %v13079_v19 = vpop.f32.mrb[32].mxu0  ;;  %3660 = vst [vmem:[#allocation2 + $0x60] sm:$0x1] %v3659_v49  ;;  %v3824_v42 = vrot.slane %v3822_v23, 4 }
 0x366   :  { %v3319_v4 = vor.u32 %v3317_v15, %v13074_v50  ;;  %v3320_v20 = vrot.slane %v13074_v50, 4  ;;  %v13085_v2 = vpop.f32.mrb[33].mxu0  ;;  %3587 = vst [vmem:[#allocation2 + $0x84] sm:$0xf] %v3586_v6  ;;  %v3017_v51 = vmax.f32 %v2981_v47, 0.0  ;;  %v3827_v1 = vrot.slane %v3825_v29, 5 }
 0x367   :  { %v3341_v60 = vrot.slane %v3339_v61, 7  ;;  %v3831_v39 = vshll.u32 %v3755_v12, 16  ;;  %v13087_v10 = vpop.f32.mrb[34].mxu0  ;;  %v3589_v21 = vld [vmem:[#allocation2 + $0x8c] sm:$0x1]  ;;  %v3835_v35 = vshrl.u32 %v3755_v12, 16  ;;  %v10909_v50 = vadd.f32 %v13021_v13, %v12840_v46 }
 0x368   :  { %v3579_v0 = vsel %vm12866_vm5, %v3319_v4, %v3578_v11  ;;  %v3841_v52 = vshll.u32 %v3802_v41, 16  ;;  %v3846_v54 = vshrl.u32 %v3756_v30, 16  ;;  %v13091_v62 = vpop.f32.mrb[35].mxu0  ;;  %v9518_v43 = vpack.c.bf16 %v3017_v51, %v3017_v51  ;;  %v3757_v45 = vld [vmem:[#allocation2 + $0x10] sm:$0xf] }
 0x369   :  { %3580 = vst [vmem:[#allocation2 + $0x78] sm:$0xf] %v3579_v0  ;;  %v3344_v23 = vor.u32 %v3342_v44, %v3341_v60  ;;  %v3346_v15 = vrot.slane %v3341_v60, 4  ;;  %v3828_v36 = vor.u32 %v3827_v1, %v3824_v42  ;;  %v3833_v18 = vrot.slane %v3831_v39, 5  ;;  %v3716_v38 = vld [vmem:[#allocation2 + $0x74] sm:$0x1] }
 0x36a   :  { %v3837_v29 = vrot.slane %v3835_v35, 4  ;;  %v3843_v5 = vrot.slane %v3841_v52, 5  ;;  %v3848_v28 = vrot.slane %v3846_v54, 4  ;;  %v3322_v27 = vshrl.u32 %v9518_v43, 16  ;;  %v3803_v61 = vld [vmem:[#allocation2 + $0x14] sm:$0x1] }
 0x36b   :  { %v3345_v11 = vsel %vm12881_vm7, %v3337_v31, %v3344_v23  ;;  %v3590_v12 = vsel %vm12875_vm6, %v3346_v15, %v3589_v21  ;;  %v3325_v49 = vshll.u32 %v9518_v43, 16  ;;  %v3717_v44 = vsel %vm12916_vm8, 0, %v3716_v38  ;;  %v3713_v47 = vld [vmem:[#allocation2 + $0x68] sm:$0x1]  ;;  %v3582_v60 = vld [vmem:[#allocation2 + $0x80] sm:$0x1] }
 0x36c   :  { %3588 = vst [vmem:[#allocation2 + $0x88] sm:$0xf] %v3345_v11  ;;  %3591 = vst [vmem:[#allocation2 + $0x8c] sm:$0x1] %v3590_v12  ;;  %v3829_v41 = vrot.slane %v3828_v36, 4  ;;  %v3838_v6 = vor.u32 %v3837_v29, %v3833_v18  ;;  %v3849_v4 = vshll.u32 %v3756_v30, 16  ;;  %v2987_v46 = vadd.f32 %v10909_v50, %v12855_v25 }
 0x36d   :  { %3718 = vst [vmem:[#allocation2 + $0x74] sm:$0x1] %v3717_v44  ;;  %v3714_v42 = vsel %vm12916_vm8, 0, %v3713_v47  ;;  %v3324_v31 = vrot.slane %v3322_v27, 7  ;;  %v3855_v1 = vshll.u32 %v3757_v45, 16  ;;  %v3859_v39 = vshrl.u32 %v3757_v45, 16 }
 0x36e   :  { %3715 = vst [vmem:[#allocation2 + $0x68] sm:$0x1] %v3714_v42  ;;  %v3667_v0 = vld [vmem:[#allocation2 + $0x84] sm:$0x1]  ;;  %v3834_v21 = vsel %vm13103_vm11, %v3829_v41, %v3833_v18  ;;  %v3839_v30 = vrot.slane %v3838_v6, 4  ;;  %v3851_v35 = vrot.slane %v3849_v4, 5  ;;  %v10907_v44 = vadd.f32 %v13007_v56, %v12836_v9 }
 0x36f   :  { %v3865_v52 = vshll.u32 %v3803_v61, 16  ;;  %v3668_v54 = vsel %vm12875_vm6, 0, %v3667_v0  ;;  %v3327_v23 = vor.u32 %v3325_v49, %v3324_v31  ;;  %v3329_v15 = vrot.slane %v3324_v31, 4  ;;  %v3758_v12 = vld [vmem:[#allocation2 + $0x18] sm:$0xf] }
 0x370   :  { %v3857_v43 = vrot.slane %v3855_v1, 5  ;;  %3669 = vst [vmem:[#allocation2 + $0x84] sm:$0x1] %v3668_v54  ;;  %v3664_v36 = vld [vmem:[#allocation2 + $0x78] sm:$0x1]  ;;  %v3844_v29 = vsel %vm13103_vm11, %v3839_v30, %v3843_v5  ;;  %v3852_v45 = vor.u32 %v3851_v35, %v3848_v28  ;;  %v3861_v38 = vrot.slane %v3859_v39, 4 }
 0x371   :  { %v3867_v11 = vrot.slane %v3865_v52, 5  ;;  %v3665_v18 = vsel %vm12875_vm6, 0, %v3664_v36  ;;  %v3328_v27 = vsel %vm12881_vm7, %v3320_v20, %v3327_v23  ;;  %v3583_v49 = vsel %vm12875_vm6, %v3329_v15, %v3582_v60  ;;  %v3759_v6 = vld [vmem:[#allocation2 + $0x1c] sm:$0xf]  ;;  %v11531_v54 = vld [vmem:[#allocation3 + $0x8] sm:$0xff]  }
 0x372   :  { %v9200_v61 = vcombine.low %v3834_v21, %v3844_v29  ;;  %3666 = vst [vmem:[#allocation2 + $0x78] sm:$0x1] %v3665_v18  ;;  %3581 = vst [vmem:[#allocation2 + $0x7c] sm:$0xf] %v3328_v27  ;;  %v3853_v5 = vrot.slane %v3852_v45, 4  ;;  %v3862_v28 = vor.u32 %v3861_v38, %v3857_v43  ;;  %v10908_v47 = vadd.f32 %v13012_v3, %v12838_v37  ;;  %v11642_v18 = vld [vmem:[#allocation3] sm:$0xff]  }
 0x373   :  { %3584 = vst [vmem:[#allocation2 + $0x80] sm:$0x1] %v3583_v49  ;;  %v3722_v41 = vld [vmem:[#allocation2 + $0x8c] sm:$0x1]  ;;  %v10910_v20 = vadd.f32 %v13027_v14, %v12842_v34  ;;  %v3870_v4 = vshrl.u32 %v3758_v12, 16  ;;  %v3873_v42 = vshll.u32 %v3758_v12, 16  ;;  %v2986_v37 = vadd.f32 %v10907_v44, %v12855_v25 }
 0x374   :  { %10467 = vmatprep.mubr.bf16.mxu1 %v9200_v61  ;;  %v3723_v31 = vsel %vm12916_vm8, 0, %v3722_v41  ;;  %v3858_v9 = vsel %vm13103_vm11, %v3853_v5, %v3857_v43  ;;  %v3863_v56 = vrot.slane %v3862_v28, 4  ;;  %v2984_v3 = vadd.f32 %v10908_v47, %v12855_v25  ;;  %v3804_v34 = vld [vmem:[#allocation2 + $0x20] sm:$0x1]  ;;  %v11532_v5 = vld [vmem:[#allocation3 + $0x10] sm:$0xff]  }
 0x375   :  { %3724 = vst [vmem:[#allocation2 + $0x8c] sm:$0x1] %v3723_v31  ;;  %v2985_v13 = vadd.f32 %v10910_v20, %v12855_v25  ;;  %v3872_v14 = vrot.slane %v3870_v4, 4  ;;  %v3022_v1 = vmax.f32 %v2986_v37, 0.0  ;;  %v3875_v39 = vrot.slane %v3873_v42, 5 }
 0x376   :  { %v3868_v60 = vsel %vm13103_vm11, %v3863_v56, %v3867_v11  ;;  %v3879_v0 = vshll.u32 %v3759_v6, 16  ;;  %v3020_v30 = vmax.f32 %v2984_v3, 0.0  ;;  %v3023_v35 = vmax.f32 %v2987_v46, 0.0  ;;  %v3599_v28 = vld [vmem:[#allocation2 + $0x9c] sm:$0xf] }
 0x377   :  { %v9201_v21 = vcombine.low %v3858_v9, %v3868_v60  ;;  %v3021_v52 = vmax.f32 %v2985_v13, 0.0  ;;  %v9523_v23 = vpack.c.bf16 %v3022_v1, %v3022_v1  ;;  %v3876_v15 = vor.u32 %v3875_v39, %v3872_v14  ;;  %v3760_v20 = vld [vmem:[#allocation2 + $0x24] sm:$0xf]  ;;  %v3592_v4 = vld [vmem:[#allocation2 + $0x90] sm:$0xf] }
 0x378   :  { %v13139_v43 = vrot.slane %v3879_v0, 5  ;;  %v3883_v36 = vshrl.u32 %v3759_v6, 16  ;;  %v9521_v25 = vpack.c.bf16 %v3020_v30, %v3020_v30  ;;  %v9524_v45 = vpack.c.bf16 %v3023_v35, %v3023_v35  ;;  %v3603_v42 = vld [vmem:[#allocation2 + $0xa4] sm:$0x1]  ;;  %v3596_v46 = vld [vmem:[#allocation2 + $0x98] sm:$0x1] }
 0x379   :  { %10468 = vmatmul.mubr.bf16.vlgmr.msra.gmra.mrb[20].mxu1 %v9201_v21  ;;  %v9522_v38 = vpack.c.bf16 %v3021_v52, %v3021_v52  ;;  %v3889_v12 = vshll.u32 %v3804_v34, 16  ;;  %v3365_v27 = vshrl.u32 %v9523_v23, 16  ;;  %v3368_v49 = vshll.u32 %v9523_v23, 16  ;;  %v3761_v39 = vld [vmem:[#allocation2 + $0x28] sm:$0xf]  ;;  %v11533_v21 = vld [vmem:[#allocation3 + $0x18] sm:$0xff]  }
 0x37a   :  { %v3719_v29 = vld [vmem:[#allocation2 + $0x80] sm:$0x1]  ;;  %10500 = vmatpush3.bf16.msra.mxu1 %v11642_v18  ;;  %v13143_v61 = vrot.slane %v3876_v15, 4  ;;  %v3348_v44 = vshrl.u32 %v9521_v25, 16  ;;  %v3351_v47 = vshll.u32 %v9521_v25, 16  ;;  %v3373_v41 = vshrl.u32 %v9524_v45, 16 }
 0x37b   :  { %v3720_v11 = vsel %vm12916_vm8, 0, %v3719_v29  ;;  %v3376_v50 = vshll.u32 %v9524_v45, 16  ;;  %10501 = vmatprep.subr.bf16.mxu1 %v11531_v54  ;;  %v3367_v6 = vrot.slane %v3365_v27, 7  ;;  %v3356_v31 = vshrl.u32 %v9522_v38, 16  ;;  %v3805_v45 = vld [vmem:[#allocation2 + $0x2c] sm:$0x1] }
 0x37c   :  { %3721 = vst [vmem:[#allocation2 + $0x80] sm:$0x1] %v3720_v11  ;;  %v3359_v9 = vshll.u32 %v9522_v38, 16  ;;  %v3882_v56 = vsel %vm13103_vm11, %v13143_v61, %v13139_v43  ;;  %v3350_v37 = vrot.slane %v3348_v44, 7  ;;  %v3375_v3 = vrot.slane %v3373_v41, 7  ;;  %v11534_v41 = vld [vmem:[#allocation3 + $0x20] sm:$0xff]  }
 0x37d   :  { %v3885_v13 = vrot.slane %v3883_v36, 4  ;;  %v3891_v34 = vrot.slane %v3889_v12, 5  ;;  %v3370_v14 = vor.u32 %v3368_v49, %v3367_v6  ;;  %v3371_v60 = vrot.slane %v3367_v6, 4 }
 0x37e   :  { %v3358_v1 = vrot.slane %v3356_v31, 7  ;;  %v3894_v0 = vshrl.u32 %v3760_v20, 16  ;;  %10502 = vmatpush3.bf16.msra.mxu1 %v11531_v54  ;;  %v3353_v30 = vor.u32 %v3351_v47, %v3350_v37  ;;  %v3354_v35 = vrot.slane %v3350_v37, 4 }
 0x37f   :  { %v3378_v52 = vor.u32 %v3376_v50, %v3375_v3  ;;  %v3380_v23 = vrot.slane %v3375_v3, 4  ;;  %10503 = vmatprep.subr.bf16.mxu1 %v11532_v5  ;;  %v3600_v15 = vsel %vm12866_vm5, %v3370_v14, %v3599_v28  ;;  %v3886_v36 = vor.u32 %v3885_v13, %v13139_v43  ;;  %v11535_v13 = vld [vmem:[#allocation3 + $0x28] sm:$0xff]  }
 0x380   :  { %v3361_v29 = vor.u32 %v3359_v9, %v3358_v1  ;;  %v3363_v25 = vrot.slane %v3358_v1, 4  ;;  %3601 = vst [vmem:[#allocation2 + $0x9c] sm:$0xf] %v3600_v15  ;;  %v3593_v38 = vsel %vm12866_vm5, %v3353_v30, %v3592_v4  ;;  %v3896_v11 = vrot.slane %v3894_v0, 4 }
 0x381   :  { %v3379_v54 = vsel %vm12881_vm7, %v3371_v60, %v3378_v52  ;;  %v3604_v12 = vsel %vm12875_vm6, %v3380_v23, %v3603_v42  ;;  %3594 = vst [vmem:[#allocation2 + $0x90] sm:$0xf] %v3593_v38  ;;  %v3887_v27 = vrot.slane %v3886_v36, 4  ;;  %v3897_v49 = vshll.u32 %v3760_v20, 16  ;;  %v13170_v20 = vld [vmem:[#allocation2 + $0x30] sm:$0xf] }
 0x382   :  { %3602 = vst [vmem:[#allocation2 + $0xa0] sm:$0xf] %v3379_v54  ;;  %3605 = vst [vmem:[#allocation2 + $0xa4] sm:$0x1] %v3604_v12  ;;  %v3362_v18 = vsel %vm12881_vm7, %v3354_v35, %v3361_v29  ;;  %v3597_v43 = vsel %vm12875_vm6, %v3363_v25, %v3596_v46  ;;  %10504 = vmatpush3.bf16.msra.mxu1 %v11532_v5  ;;  %v3903_v61 = vshll.u32 %v3761_v39, 16  ;;  %v3907_v28 = vshrl.u32 %v3761_v39, 16 }
 0x383   :  { %3595 = vst [vmem:[#allocation2 + $0x94] sm:$0xf] %v3362_v18  ;;  %3598 = vst [vmem:[#allocation2 + $0x98] sm:$0x1] %v3597_v43  ;;  %v3913_v44 = vshll.u32 %v3805_v45, 16  ;;  %v10911_v47 = vadd.f32 %v13048_v8, %v12844_v26  ;;  %10505 = vmatprep.subr.bf16.mxu1 %v11533_v21  ;;  %v3892_v50 = vsel %vm13103_vm11, %v3887_v27, %v3891_v34  ;;  %v3899_v6 = vrot.slane %v3897_v49, 5 }
 0x384   :  { %v10912_v4 = vadd.f32 %v13052_v22, %v12846_v16  ;;  %v10913_v5 = vadd.f32 %v13058_v58, %v12848_v17  ;;  %v9202_v42 = vcombine.low %v3882_v56, %v3892_v50  ;;  %v3905_v31 = vrot.slane %v3903_v61, 5  ;;  %v13175_v26 = vld [vmem:[%s14689_s2] ss:$0 sm:$0xff]  ;;  %v13201_v18 = vld [vmem:[#allocation2 + $0x34] sm:$0xf]  ;;  %v11536_v43 = vld [vmem:[#allocation3 + $0x30] sm:$0xff]  }
 0x385   :  { %v3909_v9 = vrot.slane %v3907_v28, 4  ;;  %v3915_v37 = vrot.slane %v3913_v44, 5  ;;  %v3900_v3 = vor.u32 %v3899_v6, %v3896_v11  ;;  %v2990_v8 = vadd.f32 %v13175_v26, %v10911_v47  ;;  %v3613_v27 = vld [vmem:[#allocation2 + $0xb4] sm:$0xf] }
 0x386   :  { %v2988_v46 = vadd.f32 %v13175_v26, %v10912_v4  ;;  %v2991_v16 = vadd.f32 %v13175_v26, %v10913_v5  ;;  %10506 = vmatpush3.bf16.msra.mxu1 %v11533_v21  ;;  %10471 = vmatprep.mubr.bf16.mxu1 %v9202_v42  ;;  %v10914_v22 = vadd.f32 %v13060_v59, %v12850_v24  ;;  %v3918_v58 = vshrl.u32 %v13170_v20, 16 }
 0x387   :  { %v3910_v17 = vor.u32 %v3909_v9, %v3905_v31  ;;  %v3921_v56 = vshll.u32 %v13170_v20, 16  ;;  %10507 = vmatprep.subr.bf16.mxu1 %v11534_v41  ;;  %v3673_v34 = vld [vmem:[#allocation2 + $0x9c] sm:$0x1]  ;;  %v3901_v14 = vrot.slane %v3900_v3, 4  ;;  %v3026_v60 = vmax.f32 %v2990_v8, 0.0 }
 0x388   :  { %v3024_v1 = vmax.f32 %v2988_v46, 0.0  ;;  %v3027_v39 = vmax.f32 %v2991_v16, 0.0  ;;  %v3674_v0 = vsel %vm12875_vm6, 0, %v3673_v34  ;;  %v3670_v21 = vld [vmem:[#allocation2 + $0x90] sm:$0x1]  ;;  %v2989_v52 = vadd.f32 %v13175_v26, %v10914_v22 }
 0x389   :  { %v3728_v30 = vld [vmem:[#allocation2 + $0xa4] sm:$0x1]  ;;  %v3911_v35 = vrot.slane %v3910_v17, 4  ;;  %v13189_v24 = vadd.f32 %v13079_v19, %v12857_v32  ;;  %3675 = vst [vmem:[#allocation2 + $0x9c] sm:$0x1] %v3674_v0  ;;  %v3671_v59 = vsel %vm12875_vm6, 0, %v3670_v21  ;;  %v3906_v29 = vsel %vm13103_vm11, %v3901_v14, %v3905_v31 }
 0x38a   :  { %v3729_v23 = vsel %vm12916_vm8, 0, %v3728_v30  ;;  %v3725_v15 = vld [vmem:[#allocation2 + $0x98] sm:$0x1]  ;;  %v9527_v25 = vpack.c.bf16 %v3026_v60, %v3026_v60  ;;  %10508 = vmatpush3.bf16.msra.mxu1 %v11534_v41  ;;  %3672 = vst [vmem:[#allocation2 + $0x90] sm:$0x1] %v3671_v59  ;;  %v9525_v19 = vpack.c.bf16 %v3024_v1, %v3024_v1  ;;  %v9528_v45 = vpack.c.bf16 %v3027_v39, %v3027_v39  ;;  %v11537_v17 = vld [vmem:[#allocation3 + $0x38] sm:$0xff]  }
 0x38b   :  { %3730 = vst [vmem:[#allocation2 + $0xa4] sm:$0x1] %v3729_v23  ;;  %v3726_v36 = vsel %vm12916_vm8, 0, %v3725_v15  ;;  %v3916_v32 = vsel %vm13103_vm11, %v3911_v35, %v3915_v37  ;;  %10509 = vmatprep.subr.bf16.mxu1 %v11535_v13  ;;  %v3025_v11 = vmax.f32 %v2989_v52, 0.0  ;;  %v3606_v41 = vld [vmem:[#allocation2 + $0xa8] sm:$0xf] }
 0x38c   :  { %3727 = vst [vmem:[#allocation2 + $0x98] sm:$0x1] %v3726_v36  ;;  %v9203_v38 = vcombine.low %v3906_v29, %v3916_v32  ;;  %v3399_v54 = vshrl.u32 %v9527_v25, 16  ;;  %v3402_v12 = vshll.u32 %v9527_v25, 16  ;;  %v3382_v49 = vshrl.u32 %v9525_v19, 16  ;;  %v13217_v32 = vld [vmem:[#allocation3 + $0x80] sm:$0xff]  }
 0x38d   :  { %v3385_v61 = vshll.u32 %v9525_v19, 16  ;;  %v3407_v28 = vshrl.u32 %v9528_v45, 16  ;;  %v3410_v44 = vshll.u32 %v9528_v45, 16  ;;  %v9526_v50 = vpack.c.bf16 %v3025_v11, %v3025_v11  ;;  %v3617_v8 = vld [vmem:[#allocation2 + $0xbc] sm:$0x1] }
 0x38e   :  { %10472 = vmatmul.mubr.bf16.gmra.mrb[24].mxu1 %v9203_v38  ;;  %v3401_v47 = vrot.slane %v3399_v54, 7  ;;  %v3920_v6 = vrot.slane %v3918_v58, 4  ;;  %v3923_v4 = vrot.slane %v3921_v56, 5  ;;  %v3384_v5 = vrot.slane %v3382_v49, 7  ;;  %v3806_v58 = vld [vmem:[#allocation2 + $0x38] sm:$0x1] }
 0x38f   :  { %v3409_v42 = vrot.slane %v3407_v28, 7  ;;  %v3927_v31 = vshll.u32 %v13201_v18, 16  ;;  %v3931_v9 = vshrl.u32 %v13201_v18, 16  ;;  %10510 = vmatpush3.bf16.msra.mxu1 %v11535_v13  ;;  %v3390_v46 = vshrl.u32 %v9526_v50, 16  ;;  %v13207_v21 = vld [vmem:[#allocation2 + $0x3c] sm:$0xf] }
 0x390   :  { %v3404_v37 = vor.u32 %v3402_v12, %v3401_v47  ;;  %v3405_v3 = vrot.slane %v3401_v47, 4  ;;  %v3393_v16 = vshll.u32 %v9526_v50, 16  ;;  %10511 = vmatprep.subr.bf16.mxu1 %v11536_v43  ;;  %v3387_v22 = vor.u32 %v3385_v61, %v3384_v5  ;;  %v13209_v13 = vld [vmem:[#allocation2 + $0x40] sm:$0xf]  ;;  %v3610_v59 = vld [vmem:[#allocation2 + $0xb0] sm:$0x1] }
 0x391   :  { %v3388_v34 = vrot.slane %v3384_v5, 4  ;;  %v3412_v14 = vor.u32 %v3410_v44, %v3409_v42  ;;  %v3414_v60 = vrot.slane %v3409_v42, 4  ;;  %v3392_v1 = vrot.slane %v3390_v46, 7  ;;  %v3807_v45 = vld [vmem:[#allocation2 + $0x44] sm:$0x1] }
 0x392   :  { %v3614_v56 = vsel %vm12866_vm5, %v3404_v37, %v3613_v27  ;;  %v3924_v39 = vor.u32 %v3923_v4, %v3920_v6  ;;  %v3929_v0 = vrot.slane %v3927_v31, 5  ;;  %v3607_v30 = vsel %vm12866_vm5, %v3387_v22, %v3606_v41  ;;  %v13240_v37 = vld [vmem:[#allocation2 + $0x48] sm:$0xf] }
 0x393   :  { %3615 = vst [vmem:[#allocation2 + $0xb4] sm:$0xf] %v3614_v56  ;;  %v3413_v35 = vsel %vm12881_vm7, %v3405_v3, %v3412_v14  ;;  %v3618_v52 = vsel %vm12875_vm6, %v3414_v60, %v3617_v8  ;;  %v3933_v23 = vrot.slane %v3931_v9, 4  ;;  %10512 = vmatpush3.bf16.msra.mxu1 %v11536_v43  ;;  %3608 = vst [vmem:[#allocation2 + $0xa8] sm:$0xf] %v3607_v30  ;;  %v3397_v29 = vrot.slane %v3392_v1, 4 }
 0x394   :  { %3616 = vst [vmem:[#allocation2 + $0xb8] sm:$0xf] %v3413_v35  ;;  %3619 = vst [vmem:[#allocation2 + $0xbc] sm:$0x1] %v3618_v52  ;;  %v3395_v15 = vor.u32 %v3393_v16, %v3392_v1  ;;  %v3925_v25 = vrot.slane %v3924_v39, 4  ;;  %v3937_v36 = vshll.u32 %v3806_v58, 16  ;;  %10513 = vmatprep.subr.bf16.mxu1 %v11537_v17  ;;  %v2994_v6 = vadd.f32 %v13175_v26, %v13189_v24 }
 0x395   :  { %v3934_v19 = vor.u32 %v3933_v23, %v3929_v0  ;;  %v3942_v38 = vshrl.u32 %v13207_v21, 16  ;;  %v3945_v54 = vshll.u32 %v13207_v21, 16  ;;  %v3951_v12 = vshll.u32 %v13209_v13, 16 }
 0x396   :  { %v3396_v11 = vsel %vm12881_vm7, %v3388_v34, %v3395_v15  ;;  %v3611_v43 = vsel %vm12875_vm6, %v3397_v29, %v3610_v59  ;;  %v3930_v27 = vsel %vm13103_vm11, %v3925_v25, %v3929_v0  ;;  %v3939_v49 = vrot.slane %v3937_v36, 5 }
 0x397   :  { %3609 = vst [vmem:[#allocation2 + $0xac] sm:$0xf] %v3396_v11  ;;  %3612 = vst [vmem:[#allocation2 + $0xb0] sm:$0x1] %v3611_v43  ;;  %v3935_v61 = vrot.slane %v3934_v19, 4  ;;  %v3944_v28 = vrot.slane %v3942_v38, 4  ;;  %10514 = vmatpush3.bf16.msra.mxu1 %v11537_v17  ;;  %v10916_v4 = vadd.f32 %v13085_v2, %v12871_v48  ;;  %v10917_v31 = vadd.f32 %v13087_v10, %v12885_v40 }
 0x398   :  { %v3947_v44 = vrot.slane %v3945_v54, 5  ;;  %v3953_v47 = vrot.slane %v3951_v12, 5  ;;  %v3955_v41 = vshrl.u32 %v13209_v13, 16  ;;  %v3961_v50 = vshll.u32 %v3807_v45, 16  ;;  %10547 = vmatprep.subr.bf16.mxu1 %v13217_v32  ;;  %v13258_v19 = vld [vmem:[#allocation2 + $0x4c] sm:$0xf] }
 0x399   :  { %v3940_v5 = vsel %vm13103_vm11, %v3935_v61, %v3939_v49  ;;  %v10918_v9 = vadd.f32 %v13091_v62, %v12889_v55  ;;  %v3030_v16 = vmax.f32 %v2994_v6, 0.0  ;;  %v2992_v34 = vadd.f32 %v13175_v26, %v10916_v4  ;;  %v3627_v54 = vld [vmem:[#allocation2 + $0xcc] sm:$0xf]  ;;  %v3620_v61 = vld [vmem:[#allocation2 + $0xc0] sm:$0xf] }
 0x39a   :  { %v3948_v42 = vor.u32 %v3947_v44, %v3944_v28  ;;  %v3679_v3 = vld [vmem:[#allocation2 + $0xb4] sm:$0x1]  ;;  %v9204_v8 = vcombine.low %v3930_v27, %v3940_v5  ;;  %v3957_v24 = vrot.slane %v3955_v41, 4  ;;  %v3963_v46 = vrot.slane %v3961_v50, 5  ;;  %v3676_v2 = vld [vmem:[#allocation2 + $0xa8] sm:$0x1] }
 0x39b   :  { %v3680_v48 = vsel %vm12875_vm6, 0, %v3679_v3  ;;  %v3734_v17 = vld [vmem:[#allocation2 + $0xbc] sm:$0x1]  ;;  %v2995_v40 = vadd.f32 %v13175_v26, %v10917_v31  ;;  %v3677_v55 = vsel %vm12875_vm6, 0, %v3676_v2  ;;  %v9531_v14 = vpack.c.bf16 %v3030_v16, %v3030_v16  ;;  %v3631_v50 = vld [vmem:[#allocation2 + $0xd4] sm:$0x1] }
 0x39c   :  { %v3949_v22 = vrot.slane %v3948_v42, 4  ;;  %3681 = vst [vmem:[#allocation2 + $0xb4] sm:$0x1] %v3680_v48  ;;  %v3735_v10 = vsel %vm12916_vm8, 0, %v3734_v17  ;;  %10475 = vmatprep.mubr.bf16.mxu1 %v9204_v8  ;;  %v3958_v62 = vor.u32 %v3957_v24, %v3953_v47  ;;  %3678 = vst [vmem:[#allocation2 + $0xa8] sm:$0x1] %v3677_v55  ;;  %v2993_v1 = vadd.f32 %v13175_v26, %v10918_v9 }
 0x39d   :  { %3736 = vst [vmem:[#allocation2 + $0xbc] sm:$0x1] %v3735_v10  ;;  %v3028_v58 = vmax.f32 %v2992_v34, 0.0  ;;  %v3031_v56 = vmax.f32 %v2995_v40, 0.0  ;;  %v3433_v30 = vshrl.u32 %v9531_v14, 16  ;;  %v3436_v35 = vshll.u32 %v9531_v14, 16 }
 0x39e   :  { %v3954_v60 = vsel %vm13103_vm11, %v3949_v22, %v3953_v47  ;;  %v3731_v39 = vld [vmem:[#allocation2 + $0xb0] sm:$0x1]  ;;  %v3959_v0 = vrot.slane %v3958_v62, 4  ;;  %v3966_v52 = vshrl.u32 %v13240_v37, 16  ;;  %v3029_v29 = vmax.f32 %v2993_v1, 0.0 }
 0x39f   :  { %v3732_v59 = vsel %vm12916_vm8, 0, %v3731_v39  ;;  %v9529_v23 = vpack.c.bf16 %v3028_v58, %v3028_v58  ;;  %v9532_v15 = vpack.c.bf16 %v3031_v56, %v3031_v56  ;;  %v3435_v36 = vrot.slane %v3433_v30, 7  ;;  %v13264_v9 = vld [vmem:[#allocation2 + $0x50] sm:$0x1]  ;;  %v13267_v8 = vld [vmem:[#allocation2 + $0x58] sm:$0xf] }
 0x3a0   :  { %3733 = vst [vmem:[#allocation2 + $0xb0] sm:$0x1] %v3732_v59  ;;  %v3964_v25 = vsel %vm13103_vm11, %v3959_v0, %v3963_v46  ;;  %v3968_v26 = vrot.slane %v3966_v52, 4  ;;  %v3969_v45 = vshll.u32 %v13240_v37, 16  ;;  %v9530_v44 = vpack.c.bf16 %v3029_v29, %v3029_v29  ;;  %v13269_v2 = vld [vmem:[#allocation2 + $0x54] sm:$0xf] }
 0x3a1   :  { %v9205_v38 = vcombine.low %v3954_v60, %v3964_v25  ;;  %v3416_v12 = vshrl.u32 %v9529_v23, 16  ;;  %v3419_v11 = vshll.u32 %v9529_v23, 16  ;;  %v3441_v43 = vshrl.u32 %v9532_v15, 16  ;;  %v3624_v14 = vld [vmem:[#allocation2 + $0xc8] sm:$0x1] }
 0x3a2   :  { %v3438_v27 = vor.u32 %v3436_v35, %v3435_v36  ;;  %v3439_v49 = vrot.slane %v3435_v36, 4  ;;  %v3444_v28 = vshll.u32 %v9532_v15, 16  ;;  %v3971_v6 = vrot.slane %v3969_v45, 5  ;;  %v13278_v0 = vld [vmem:[#allocation2 + $0x5c] sm:$0x1] }
 0x3a3   :  { %10476 = vmatmul.mubr.bf16.gmra.mrb[28].mxu1 %v9205_v38  ;;  %v3418_v47 = vrot.slane %v3416_v12, 7  ;;  %v3443_v41 = vrot.slane %v3441_v43, 7  ;;  %v3975_v4 = vshll.u32 %v13258_v19, 16  ;;  %v3424_v42 = vshrl.u32 %v9530_v44, 16  ;;  %v13284_v59 = vld [vmem:[#allocation2 + $0x60] sm:$0xf] }
 0x3a4   :  { %v3628_v5 = vsel %vm12866_vm5, %v3438_v27, %v3627_v54  ;;  %v3427_v31 = vshll.u32 %v9530_v44, 16  ;;  %v3979_v3 = vshrl.u32 %v13258_v19, 16  ;;  %v3972_v22 = vor.u32 %v3971_v6, %v3968_v26  ;;  %v13293_v54 = vld [vmem:[#allocation2 + $0x64] sm:$0xf]  ;;  %v13306_v6 = vld [vmem:[#allocation2 + $0x68] sm:$0x1] }
 0x3a5   :  { %3629 = vst [vmem:[#allocation2 + $0xcc] sm:$0xf] %v3628_v5  ;;  %v3421_v24 = vor.u32 %v3419_v11, %v3418_v47  ;;  %v3422_v46 = vrot.slane %v3418_v47, 4  ;;  %v3446_v16 = vor.u32 %v3444_v28, %v3443_v41  ;;  %v3448_v48 = vrot.slane %v3443_v41, 4  ;;  %v13302_v47 = vld [vmem:[#allocation2 + $0x6c] sm:$0xf] }
 0x3a6   :  { %v3426_v17 = vrot.slane %v3424_v42, 7  ;;  %v3977_v34 = vrot.slane %v3975_v4, 5  ;;  %v3981_v40 = vrot.slane %v3979_v3, 4  ;;  %v3985_v60 = vshll.u32 %v13264_v9, 16  ;;  %v13304_v41 = vld [vmem:[#allocation2 + $0x70] sm:$0xf] }
 0x3a7   :  { %v3621_v55 = vsel %vm12866_vm5, %v3421_v24, %v3620_v61  ;;  %v3447_v10 = vsel %vm12881_vm7, %v3439_v49, %v3446_v16  ;;  %v3632_v62 = vsel %vm12875_vm6, %v3448_v48, %v3631_v50  ;;  %v3973_v1 = vrot.slane %v3972_v22, 4 }
 0x3a8   :  { %3622 = vst [vmem:[#allocation2 + $0xc0] sm:$0xf] %v3621_v55  ;;  %3630 = vst [vmem:[#allocation2 + $0xd0] sm:$0xf] %v3447_v10  ;;  %v3429_v58 = vor.u32 %v3427_v31, %v3426_v17  ;;  %v3431_v56 = vrot.slane %v3426_v17, 4  ;;  %v3982_v39 = vor.u32 %v3981_v40, %v3977_v34  ;;  %v3987_v7 = vrot.slane %v3985_v60, 5 }
 0x3a9   :  { %3633 = vst [vmem:[#allocation2 + $0xd4] sm:$0x1] %v3632_v62  ;;  %3752 = vst [vmem:[#allocation2 + $0xd0] sm:$0xf] %v11740_v63  ;;  %v3990_v30 = vshrl.u32 %v13269_v2, 16  ;;  %v3993_v35 = vshll.u32 %v13269_v2, 16  ;;  %v3978_v29 = vsel %vm13103_vm11, %v3973_v1, %v3977_v34 }
 0x3aa   :  { %v3999_v52 = vshll.u32 %v13267_v8, 16  ;;  %v3430_v23 = vsel %vm12881_vm7, %v3422_v46, %v3429_v58  ;;  %v3625_v15 = vsel %vm12875_vm6, %v3431_v56, %v3624_v14  ;;  %v3983_v25 = vrot.slane %v3982_v39, 4  ;;  %v13315_v40 = vld [vmem:[#allocation2 + $0x74] sm:$0x1]  ;;  %v13320_v60 = vld [vmem:[#allocation2 + $0x78] sm:$0xf] }
 0x3ab   :  { %3623 = vst [vmem:[#allocation2 + $0xc4] sm:$0xf] %v3430_v23  ;;  %3626 = vst [vmem:[#allocation2 + $0xc8] sm:$0x1] %v3625_v15  ;;  %v3992_v36 = vrot.slane %v3990_v30, 4  ;;  %v3995_v26 = vrot.slane %v3993_v35, 5 }
 0x3ac   :  { %v4001_v45 = vrot.slane %v3999_v52, 5  ;;  %v4003_v38 = vshrl.u32 %v13267_v8, 16  ;;  %v3685_v12 = vld [vmem:[#allocation2 + $0xcc] sm:$0x1]  ;;  %v3988_v57 = vsel %vm13103_vm11, %v3983_v25, %v3987_v7  ;;  %v4009_v11 = vshll.u32 %v13278_v0, 16 }
 0x3ad   :  { %v4014_v43 = vshrl.u32 %v13284_v59, 16  ;;  %v4017_v27 = vshll.u32 %v13284_v59, 16  ;;  %v3686_v49 = vsel %vm12875_vm6, 0, %v3685_v12  ;;  %v9206_v61 = vcombine.low %v3978_v29, %v3988_v57  ;;  %v13330_v23 = vld [vmem:[#allocation2 + $0x7c] sm:$0xf] }
 0x3ae   :  { %v3996_v28 = vor.u32 %v3995_v26, %v3992_v36  ;;  %v4005_v44 = vrot.slane %v4003_v38, 4  ;;  %3687 = vst [vmem:[#allocation2 + $0xcc] sm:$0x1] %v3686_v49  ;;  %v4011_v50 = vrot.slane %v4009_v11, 5  ;;  %v4023_v42 = vshll.u32 %v13293_v54, 16 }
 0x3af   :  { %v4016_v4 = vrot.slane %v4014_v43, 4  ;;  %v4019_v5 = vrot.slane %v4017_v27, 5  ;;  %3751 = vst [vmem:[#allocation2 + $0xcc] sm:$0xf] %v11740_v63  ;;  %v3682_v31 = vld [vmem:[#allocation2 + $0xc0] sm:$0x1]  ;;  %10479 = vmatprep.mubr.bf16.mxu1 %v9206_v61 }
 0x3b0   :  { %v3740_v3 = vld [vmem:[#allocation2 + $0xd4] sm:$0x1]  ;;  %v3997_v24 = vrot.slane %v3996_v28, 4  ;;  %v4006_v46 = vor.u32 %v4005_v44, %v4001_v45  ;;  %v4027_v16 = vshrl.u32 %v13293_v54, 16  ;;  %v3683_v48 = vsel %vm12875_vm6, 0, %v3682_v31 }
 0x3b1   :  { %v3741_v17 = vsel %vm12916_vm8, 0, %v3740_v3  ;;  %v4020_v22 = vor.u32 %v4019_v5, %v4016_v4  ;;  %v4025_v34 = vrot.slane %v4023_v42, 5  ;;  %3684 = vst [vmem:[#allocation2 + $0xc0] sm:$0x1] %v3683_v48  ;;  %v4033_v14 = vshll.u32 %v13306_v6, 16 }
 0x3b2   :  { %3742 = vst [vmem:[#allocation2 + $0xd4] sm:$0x1] %v3741_v17  ;;  %v4002_v55 = vsel %vm13103_vm11, %v3997_v24, %v4001_v45  ;;  %v4007_v10 = vrot.slane %v4006_v46, 4  ;;  %v4029_v62 = vrot.slane %v4027_v16, 4  ;;  %v3737_v53 = vld [vmem:[#allocation2 + $0xc8] sm:$0x1] }
 0x3b3   :  { %3753 = vst [vmem:[#allocation2 + $0xd4] sm:$0x1] %v11740_v63  ;;  %v4021_v58 = vrot.slane %v4020_v22, 4  ;;  %v4038_v56 = vshrl.u32 %v13302_v47, 16  ;;  %v4041_v1 = vshll.u32 %v13302_v47, 16  ;;  %v4047_v39 = vshll.u32 %v13304_v41, 16 }
 0x3b4   :  { %v3738_v7 = vsel %vm12916_vm8, 0, %v3737_v53  ;;  %v4012_v30 = vsel %vm13103_vm11, %v4007_v10, %v4011_v50  ;;  %v4030_v35 = vor.u32 %v4029_v62, %v4025_v34  ;;  %v4035_v52 = vrot.slane %v4033_v14, 5  ;;  %v13336_v12 = vld [vmem:[#allocation2 + $0x80] sm:$0x1]  ;;  %v13341_v27 = vld [vmem:[#allocation2 + $0x88] sm:$0xf] }
 0x3b5   :  { %3739 = vst [vmem:[#allocation2 + $0xc8] sm:$0x1] %v3738_v7  ;;  %v9207_v63 = vcombine.low %v4002_v55, %v4012_v30  ;;  %v4026_v15 = vsel %vm13103_vm11, %v4021_v58, %v4025_v34  ;;  %v4040_v29 = vrot.slane %v4038_v56, 4  ;;  %v4043_v25 = vrot.slane %v4041_v1, 5  ;;  %v13346_v50 = vld [vmem:[#allocation2 + $0x84] sm:$0xf] }
 0x3b6   :  { %v4031_v36 = vrot.slane %v4030_v35, 4  ;;  %v4049_v26 = vrot.slane %v4047_v39, 5  ;;  %v4051_v45 = vshrl.u32 %v13304_v41, 16  ;;  %v4057_v33 = vshll.u32 %v13315_v40, 16  ;;  %v13351_v22 = vld [vmem:[#allocation2 + $0x8c] sm:$0x1] }
 0x3b7   :  { %10480 = vmatmul.mubr.bf16.gmra.mrb[32].mxu1 %v9207_v63  ;;  %v4044_v38 = vor.u32 %v4043_v25, %v4040_v29  ;;  %v4062_v57 = vshrl.u32 %v13320_v60, 16  ;;  %v4065_v11 = vshll.u32 %v13320_v60, 16  ;;  %v4071_v43 = vshll.u32 %v13330_v23, 16  ;;  %v13357_v7 = vld [vmem:[#allocation2 + $0x90] sm:$0xf] }
 0x3b8   :  { %v4036_v49 = vsel %vm13103_vm11, %v4031_v36, %v4035_v52  ;;  %v4053_v61 = vrot.slane %v4051_v45, 4  ;;  %v4059_v28 = vrot.slane %v4057_v33, 5  ;;  %v4075_v44 = vshrl.u32 %v13330_v23, 16  ;;  %v13366_v45 = vld [vmem:[#allocation2 + $0x98] sm:$0x1] }
 0x3b9   :  { %v9208_v4 = vcombine.low %v4026_v15, %v4036_v49  ;;  %v4045_v5 = vrot.slane %v4044_v38, 4  ;;  %v4064_v42 = vrot.slane %v4062_v57, 4  ;;  %v4067_v31 = vrot.slane %v4065_v11, 5  ;;  %v13362_v15 = vld [vmem:[#allocation2 + $0x94] sm:$0xf] }
 0x3ba   :  { %v4054_v3 = vor.u32 %v4053_v61, %v4049_v26  ;;  %v4073_v24 = vrot.slane %v4071_v43, 5  ;;  %v4077_v46 = vrot.slane %v4075_v44, 4  ;;  %v4081_v16 = vshll.u32 %v13336_v12, 16  ;;  %v13372_v43 = vld [vmem:[#allocation2 + $0x9c] sm:$0xf] }
 0x3bb   :  { %10483 = vmatprep.mubr.bf16.mxu1 %v9208_v4  ;;  %v4050_v48 = vsel %vm13103_vm11, %v4045_v5, %v4049_v26  ;;  %v4068_v17 = vor.u32 %v4067_v31, %v4064_v42  ;;  %v4086_v34 = vshrl.u32 %v13346_v50, 16  ;;  %v4089_v55 = vshll.u32 %v13346_v50, 16 }
 0x3bc   :  { %v4055_v10 = vrot.slane %v4054_v3, 4  ;;  %v4078_v62 = vor.u32 %v4077_v46, %v4073_v24  ;;  %v4083_v14 = vrot.slane %v4081_v16, 5  ;;  %v4095_v53 = vshll.u32 %v13341_v27, 16  ;;  %v13377_v3 = vld [vmem:[#allocation2 + $0xa0] sm:$0xf] }
 0x3bd   :  { %v4069_v58 = vrot.slane %v4068_v17, 4  ;;  %v4088_v56 = vrot.slane %v4086_v34, 4  ;;  %v4091_v1 = vrot.slane %v4089_v55, 5  ;;  %v4099_v39 = vshrl.u32 %v13341_v27, 16 }
 0x3be   :  { %v4060_v30 = vsel %vm13103_vm11, %v4055_v10, %v4059_v28  ;;  %v4079_v35 = vrot.slane %v4078_v62, 4  ;;  %v4097_v52 = vrot.slane %v4095_v53, 5  ;;  %v4105_v63 = vshll.u32 %v13351_v22, 16 }
 0x3bf   :  { %v9209_v29 = vcombine.low %v4050_v48, %v4060_v30  ;;  %v4074_v25 = vsel %vm13103_vm11, %v4069_v58, %v4073_v24  ;;  %v4092_v36 = vor.u32 %v4091_v1, %v4088_v56  ;;  %v4101_v26 = vrot.slane %v4099_v39, 4  ;;  %v13381_v48 = vld [vmem:[#allocation2 + $0xa4] sm:$0x1] }
 0x3c0   :  { %v4084_v33 = vsel %vm13103_vm11, %v4079_v35, %v4083_v14  ;;  %v4107_v38 = vrot.slane %v4105_v63, 5  ;;  %v4110_v57 = vshrl.u32 %v13357_v7, 16  ;;  %v4113_v11 = vshll.u32 %v13357_v7, 16  ;;  %v13385_v14 = vld [vmem:[#allocation2 + $0xa8] sm:$0xf] }
 0x3c1   :  { %10484 = vmatmul.mubr.bf16.gmra.mrb[36].mxu1 %v9209_v29  ;;  %v9210_v49 = vcombine.low %v4074_v25, %v4084_v33  ;;  %v4093_v61 = vrot.slane %v4092_v36, 4  ;;  %v4102_v28 = vor.u32 %v4101_v26, %v4097_v52  ;;  %v4119_v44 = vshll.u32 %v13362_v15, 16  ;;  %v13391_v63 = vld [vmem:[#allocation2 + $0xac] sm:$0xf]  ;;  %v13394_v26 = vld [vmem:[#allocation2 + $0xb0] sm:$0x1] }
 0x3c2   :  { %v4112_v4 = vrot.slane %v4110_v57, 4  ;;  %v4115_v5 = vrot.slane %v4113_v11, 5  ;;  %v4123_v42 = vshrl.u32 %v13362_v15, 16  ;;  %v4129_v31 = vshll.u32 %v13366_v45, 16 }
 0x3c3   :  { %10487 = vmatprep.mubr.bf16.mxu1 %v9210_v49  ;;  %v4098_v24 = vsel %vm13103_vm11, %v4093_v61, %v4097_v52  ;;  %v4103_v46 = vrot.slane %v4102_v28, 4  ;;  %v4121_v16 = vrot.slane %v4119_v44, 5  ;;  %v4134_v17 = vshrl.u32 %v13372_v43, 16  ;;  %v13402_v28 = vld [vmem:[#allocation2 + $0xb8] sm:$0xf] }
 0x3c4   :  { %v4116_v34 = vor.u32 %v4115_v5, %v4112_v4  ;;  %v4125_v55 = vrot.slane %v4123_v42, 4  ;;  %v4131_v10 = vrot.slane %v4129_v31, 5  ;;  %v4137_v62 = vshll.u32 %v13372_v43, 16 }
 0x3c5   :  { %v4108_v53 = vsel %vm13103_vm11, %v4103_v46, %v4107_v38  ;;  %v4136_v58 = vrot.slane %v4134_v17, 4  ;;  %v4143_v56 = vshll.u32 %v13377_v3, 16  ;;  %v4147_v1 = vshrl.u32 %v13377_v3, 16  ;;  %v13397_v38 = vld [vmem:[#allocation2 + $0xb4] sm:$0xf] }
 0x3c6   :  { %v9211_v39 = vcombine.low %v4098_v24, %v4108_v53  ;;  %v4117_v30 = vrot.slane %v4116_v34, 4  ;;  %v4126_v35 = vor.u32 %v4125_v55, %v4121_v16  ;;  %v4139_v52 = vrot.slane %v4137_v62, 5 }
 0x3c7   :  { %v4145_v29 = vrot.slane %v4143_v56, 5  ;;  %v4149_v25 = vrot.slane %v4147_v1, 4  ;;  %v4153_v36 = vshll.u32 %v13381_v48, 16  ;;  %v4158_v33 = vshrl.u32 %v13385_v14, 16  ;;  %v13411_v1 = vld [vmem:[#allocation2 + $0xbc] sm:$0x1] }
 0x3c8   :  { %v4122_v57 = vsel %vm13103_vm11, %v4117_v30, %v4121_v16  ;;  %v4127_v11 = vrot.slane %v4126_v35, 4  ;;  %v4140_v49 = vor.u32 %v4139_v52, %v4136_v58  ;;  %v4161_v61 = vshll.u32 %v13385_v14, 16 }
 0x3c9   :  { %10488 = vmatmul.mubr.bf16.gmra.mrb[40].mxu1 %v9211_v39  ;;  %v4150_v44 = vor.u32 %v4149_v25, %v4145_v29  ;;  %v4155_v4 = vrot.slane %v4153_v36, 5  ;;  %v4160_v5 = vrot.slane %v4158_v33, 4  ;;  %v4167_v42 = vshll.u32 %v13391_v63, 16 }
 0x3ca   :  { %v4132_v31 = vsel %vm13103_vm11, %v4127_v11, %v4131_v10  ;;  %v4141_v24 = vrot.slane %v4140_v49, 4  ;;  %v4163_v46 = vrot.slane %v4161_v61, 5  ;;  %v4171_v17 = vshrl.u32 %v13391_v63, 16 }
 0x3cb   :  { %v9212_v16 = vcombine.low %v4122_v57, %v4132_v31  ;;  %v4151_v34 = vrot.slane %v4150_v44, 4  ;;  %v4169_v55 = vrot.slane %v4167_v42, 5  ;;  %v4177_v62 = vshll.u32 %v13394_v26, 16 }
 0x3cc   :  { %v4146_v53 = vsel %vm13103_vm11, %v4141_v24, %v4145_v29  ;;  %v4164_v58 = vor.u32 %v4163_v46, %v4160_v5  ;;  %v4173_v56 = vrot.slane %v4171_v17, 4  ;;  %v4182_v39 = vshrl.u32 %v13397_v38, 16 }
 0x3cd   :  { %10491 = vmatprep.mubr.bf16.mxu1 %v9212_v16  ;;  %v4156_v10 = vsel %vm13103_vm11, %v4151_v34, %v4155_v4  ;;  %v4179_v30 = vrot.slane %v4177_v62, 5  ;;  %v4185_v35 = vshll.u32 %v13397_v38, 16  ;;  %v4191_v52 = vshll.u32 %v13402_v28, 16  ;;  %v11555_v62 = vld [vmem:[#allocation3 + $0xa8] sm:$0xff]  }
 0x3ce   :  { %v9213_v25 = vcombine.low %v4146_v53, %v4156_v10  ;;  %v4165_v36 = vrot.slane %v4164_v58, 4  ;;  %v4174_v33 = vor.u32 %v4173_v56, %v4169_v55  ;;  %v4184_v57 = vrot.slane %v4182_v39, 4  ;;  %v4810_v56 = vld [vmem:[#allocation2 + $0x78] sm:$0xe]  ;;  %v4811_v58 = vld [vmem:[#allocation2 + $0x84] sm:$0xe] }
 0x3cf   :  { %v4187_v29 = vrot.slane %v4185_v35, 5  ;;  %v4193_v11 = vrot.slane %v4191_v52, 5  ;;  %v4195_v49 = vshrl.u32 %v13402_v28, 16  ;;  %v4201_v61 = vshll.u32 %v13411_v1, 16 }
 0x3d0   :  { %v4170_v44 = vsel %vm13103_vm11, %v4165_v36, %v4169_v55  ;;  %v4175_v5 = vrot.slane %v4174_v33, 4  ;;  %v9230_v46 = vcombine.low %v13240_v37, %v13258_v19  ;;  %v11644_v33 = vld [vmem:[#allocation2] sm:$0xf]  ;;  %v4926_v53 = vrot.slane %v13336_v12, 5  ;;  %v4812_v55 = vld [vmem:[#allocation2 + $0x90] sm:$0xe] }
 0x3d1   :  { %10492 = vmatmul.mubr.bf16.gmra.mrb[44].mxu1 %v9213_v25  ;;  %v4188_v4 = vor.u32 %v4187_v29, %v4184_v57  ;;  %v4197_v42 = vrot.slane %v4195_v49, 4  ;;  %v4203_v24 = vrot.slane %v4201_v61, 5  ;;  %v13448_v57 = vld [vmem:[#allocation2 + $0x4] sm:$0xf]  ;;  %v4806_v61 = vld [vmem:[#allocation2 + $0x48] sm:$0xe] }
 0x3d2   :  { %v4180_v31 = vsel %vm13103_vm11, %v4175_v5, %v4179_v30  ;;  %v9224_v29 = vcombine.low %v11644_v33, %v13448_v57  ;;  %v11543_v49 = vld [vmem:[#allocation3 + $0x88] sm:$0xff]   ;;  %v13451_v5 = vld [vmem:[#allocation2 + $0x10] sm:$0xf]  ;;  %v4809_v25 = vld [vmem:[#allocation2 + $0x6c] sm:$0xe]  ;;  %v4909_v30 = vrot.slane %v13293_v54, 5 }
 0x3d3   :  { %v9214_v17 = vcombine.low %v4170_v44, %v4180_v31  ;;  %v4189_v16 = vrot.slane %v4188_v4, 4  ;;  %v4198_v34 = vor.u32 %v4197_v42, %v4193_v11  ;;  %v11646_v44 = vld [vmem:[#allocation2 + $0xc] sm:$0xf]  ;;  %v4895_v42 = vrot.slane %v13258_v19, 5  ;;  %v11648_v31 = vld [vmem:[#allocation2 + $0x18] sm:$0xf] }
 0x3d4   :  { %v9225_v4 = vcombine.low %v11646_v44, %v13451_v5  ;;  %v4808_v33 = vld [vmem:[#allocation2 + $0x60] sm:$0xe]  ;;  %v9257_v52 = vrot.slane %v4809_v25, 9  ;;  %v9259_v12 = vrot.slane %v4811_v58, 9  ;;  %v9260_v58 = vrot.slane %v4812_v55, 9  ;;  %v11561_v37 = vld [vmem:[#allocation3 + $0xb8] sm:$0xff]  }
 0x3d5   :  { %10495 = vmatprep.mubr.bf16.mxu1 %v9214_v17  ;;  %v4194_v39 = vsel %vm13103_vm11, %v4189_v16, %v4193_v11  ;;  %v4199_v10 = vrot.slane %v4198_v34, 4  ;;  %v4898_v16 = vrot.slane %v13264_v9, 5  ;;  %v4807_v34 = vld [vmem:[#allocation2 + $0x54] sm:$0xe]  ;;  %v9229_v9 = vcombine.low %v13207_v21, %v13209_v13  ;;  %v11558_v13 = vld [vmem:[#allocation3 + $0xb0] sm:$0xff]  }
 0x3d6   :  { %v9256_v35 = vrot.slane %v4808_v33, 9  ;;  %v4911_v33 = vrot.slane %v4909_v30, 4  ;;  %v14762_v19 = vcombine.low %v13269_v2, %v13267_v8  ;;  %v14767_v2 = vcombine.low %v13357_v7, %v13362_v15 }
 0x3d7   :  { %v4204_v36 = vsel %vm13103_vm11, %v4199_v10, %v4203_v24  ;;  %v13455_v24 = vld [vmem:[#allocation2 + $0x1c] sm:$0xf]  ;;  %v4897_v10 = vrot.slane %v4895_v42, 4  ;;  %v4860_v7 = vrot.slane %v13451_v5, 5 }
 0x3d8   :  { %v9215_v11 = vcombine.low %v4194_v39, %v4204_v36  ;;  %v9226_v17 = vcombine.low %v11648_v31, %v13455_v24  ;;  %v9254_v39 = vrot.slane %v4806_v61, 9  ;;  %v4902_v36 = vrot.slane %v13267_v8, 5  ;;  %v7329_v61 = vld [vmem:[#allocation2 + $0x60] sm:$0xf] }
 0x3d9   :  { %v9228_v31 = vcombine.low %v13170_v20, %v13201_v18  ;;  %v13481_v20 = vsel %vm13470_vm14, %v4897_v10, %v4898_v16  ;;  %v9255_v18 = vrot.slane %v4807_v34, 9  ;;  %v4916_v34 = vrot.slane %v13304_v41, 5 }
 0x3da   :  { %10496 = vmatmul.mubr.bf16.gmra.mrb[48].mxu1 %v9215_v11  ;;  %v13461_v11 = vld [vmem:[#allocation2 + $0x28] sm:$0xf]  ;;  %v4930_v10 = vrot.slane %v13341_v27, 5  ;;  %v14766_v8 = vcombine.low %v13346_v50, %v13341_v27 }
 0x3db   :  { %10515 = vmatprep.mubr.bf16.mxu1 %v9224_v29  ;;  %v11650_v29 = vld [vmem:[#allocation2 + $0x24] sm:$0xf]  ;;  %v13511_v25 = vsel %vm13470_vm14, %v9257_v52, %v4916_v34 }
 0x3dc   :  { %v9227_v44 = vcombine.low %v11650_v29, %v13461_v11  ;;  %v4904_v29 = vrot.slane %v4902_v36, 4 }
 0x3e2   :  { %10516 = vmatmul.mubr.bf16.vlgmr.msra.gmra.mrb[20].mxu1 %v9225_v4  ;;  %v4905_v4 = vrot.slane %v13278_v0, 5  ;;  %v4912_v0 = vrot.slane %v13306_v6, 5  ;;  %v4923_v6 = vrot.slane %v13330_v23, 5 }
 0x3e3   :  { %10519 = vmatprep.mubr.bf16.mxu1 %v9226_v17  ;;  %10548 = vmatpush3.bf16.msra.mxu1 %v13217_v32  ;;  %v11546_v32 = vld [vmem:[#allocation3 + $0x90] sm:$0xff]   ;;  %v13477_v17 = vsel %vm13470_vm14, %v9254_v39, %v4895_v42  ;;  %v13489_v42 = vsel %vm13470_vm14, %v9255_v18, %v4902_v36  ;;  %v4919_v39 = vrot.slane %v13315_v40, 5  ;;  %v11549_v36 = vld [vmem:[#allocation3 + $0x98] sm:$0xff]   ;;  %v13502_v18 = vsel %vm13470_vm14, %v9256_v35, %v4909_v30 }
 0x3e4   :  { %10549 = vmatprep.subr.bf16.mxu1 %v11543_v49  ;;  %v13493_v16 = vsel %vm13470_vm14, %v4904_v29, %v4905_v4  ;;  %v4918_v4 = vrot.slane %v4916_v34, 4  ;;  %v9258_v29 = vrot.slane %v4810_v56, 9  ;;  %v13507_v40 = vsel %vm13470_vm14, %v4911_v33, %v4912_v0  ;;  %v4813_v33 = vld [vmem:[#allocation2 + $0x9c] sm:$0xe]  ;;  %v4815_v30 = vld [vmem:[#allocation2 + $0xb4] sm:$0xe] }
 0x3e5   :  { %v4933_v35 = vrot.slane %v13351_v22, 5  ;;  %v4932_v34 = vrot.slane %v4930_v10, 4  ;;  %v9261_v52 = vrot.slane %v4813_v33, 9 }
 0x3e6   :  { %v13518_v56 = vsel %vm13470_vm14, %v4918_v4, %v4919_v39  ;;  %v13525_v0 = vsel %vm13470_vm14, %v9258_v29, %v4923_v6  ;;  %v11552_v39 = vld [vmem:[#allocation3 + $0xa0] sm:$0xff]   ;;  %v4814_v4 = vld [vmem:[#allocation2 + $0xa8] sm:$0xe]  ;;  %v4944_v29 = vrot.slane %v13377_v3, 5 }
 0x3e7   :  { %10550 = vmatpush3.bf16.msra.mxu1 %v11543_v49  ;;  %v4925_v49 = vrot.slane %v4923_v6, 4  ;;  %v13537_v6 = vsel %vm13470_vm14, %v9259_v12, %v4930_v10 }
 0x3e8   :  { %10551 = vmatprep.subr.bf16.mxu1 %v11546_v32  ;;  %v4946_v12 = vrot.slane %v4944_v29, 4  ;;  %v13559_v33 = vsel %vm13470_vm14, %v9261_v52, %v4944_v29 }
 0x3ea   :  { %10520 = vmatmul.mubr.bf16.gmra.mrb[24].mxu1 %v9227_v44  ;;  %v13529_v44 = vsel %vm13470_vm14, %v4925_v49, %v4926_v53  ;;  %v13541_v53 = vsel %vm13470_vm14, %v4932_v34, %v4933_v35  ;;  %v4947_v49 = vrot.slane %v13381_v48, 5  ;;  %v9262_v35 = vrot.slane %v4814_v4, 9 }
 0x3eb   :  { %10523 = vmatprep.mubr.bf16.mxu1 %v9228_v31  ;;  %10552 = vmatpush3.bf16.msra.mxu1 %v11546_v32  ;;  %v4937_v31 = vrot.slane %v13362_v15, 5  ;;  %v4940_v32 = vrot.slane %v13366_v45, 5  ;;  %v4951_v45 = vrot.slane %v13391_v63, 5  ;;  %v4954_v34 = vrot.slane %v13394_v26, 5 }
 0x3ec   :  { %10553 = vmatprep.subr.bf16.mxu1 %v11549_v36  ;;  %v9263_v26 = vrot.slane %v4815_v30, 9  ;;  %v4961_v4 = vrot.slane %v13411_v1, 5  ;;  %v4867_v15 = vrot.slane %v13455_v24, 5  ;;  %v6437_v30 = vld [vmem:[#allocation2 + $0x90] sm:$0xe] }
 0x3ed   :  { %v4939_v22 = vrot.slane %v4937_v31, 4  ;;  %v13550_v10 = vsel %vm13470_vm14, %v9260_v58, %v4937_v31  ;;  %v4953_v55 = vrot.slane %v4951_v45, 4  ;;  %v13566_v31 = vsel %vm13470_vm14, %v4946_v12, %v4947_v49  ;;  %v11652_v12 = vld [vmem:[#allocation2 + $0x8] sm:$0x1] }
 0x3ee   :  { %v14764_v49 = vcombine.low %v13302_v47, %v13304_v41  ;;  %v4856_v47 = vrot.slane %v11652_v12, 5  ;;  %v14768_v41 = vcombine.low %v13372_v43, %v13377_v3  ;;  %v14770_v43 = vcombine.low %v13397_v38, %v13402_v28  ;;  %v4801_v3 = vld [vmem:[#allocation2 + $0xc] sm:$0xe]  ;;  %v4804_v12 = vld [vmem:[#allocation2 + $0x30] sm:$0xe] }
 0x3ef   :  { %10554 = vmatpush3.bf16.msra.mxu1 %v11549_v36  ;;  %v13555_v48 = vsel %vm13470_vm14, %v4939_v22, %v4940_v32  ;;  %v4958_v36 = vrot.slane %v13402_v28, 5  ;;  %v13576_v22 = vsel %vm13470_vm14, %v9262_v35, %v4951_v45  ;;  %v13580_v32 = vsel %vm13470_vm14, %v4953_v55, %v4954_v34 }
 0x3f0   :  { %10555 = vmatprep.subr.bf16.mxu1 %v11552_v39  ;;  %v4862_v34 = vrot.slane %v4860_v7, 4  ;;  %v4874_v38 = vrot.slane %v13461_v11, 5  ;;  %v14790_v21 = vcombine.low %v13550_v10, %v13555_v48 }
 0x3f1   :  { %v4960_v29 = vrot.slane %v4958_v36, 4  ;;  %v13589_v1 = vsel %vm13470_vm14, %v9263_v26, %v4958_v36  ;;  %v4802_v36 = vld [vmem:[#allocation2 + $0x18] sm:$0xe]  ;;  %v4869_v26 = vrot.slane %v4867_v15, 4 }
 0x3f2   :  { %10524 = vmatmul.mubr.bf16.gmra.mrb[28].mxu1 %v9229_v9  ;;  %v9250_v5 = vrot.slane %v4802_v36, 9  ;;  %v11566_v36 = vld [vmem:[#allocation3 + $0xe0] sm:$0xff]  }
 0x3f3   :  { %10527 = vmatprep.mubr.bf16.mxu1 %v9230_v46  ;;  %10556 = vmatpush3.bf16.msra.mxu1 %v11552_v39  ;;  %v13593_v9 = vsel %vm13470_vm14, %v4960_v29, %v4961_v4  ;;  %v14763_v46 = vcombine.low %v13284_v59, %v13293_v54  ;;  %v11562_v39 = vld [vmem:[#allocation3 + $0xc0] sm:$0xff]   ;;  %v4853_v59 = vrot.slane %v13448_v57, 5  ;;  %v4800_v54 = vld [vmem:[#allocation2] sm:$0xe]  ;;  %v11653_v57 = vld [vmem:[#allocation2 + $0x14] sm:$0x1] }
 0x3f4   :  { %10557 = vmatprep.subr.bf16.mxu1 %v11555_v62  ;;  %v9248_v55 = vrot.slane %v4800_v54, 9  ;;  %v4863_v35 = vrot.slane %v11653_v57, 5  ;;  %v9249_v4 = vrot.slane %v4801_v3, 9  ;;  %v11657_v54 = vld [vmem:[#allocation2 + $0x38] sm:$0x1] }
 0x3f5   :  { %v4855_v45 = vrot.slane %v4853_v59, 4  ;;  %v11659_v3 = vld [vmem:[#allocation2 + $0x44] sm:$0x1] }
 0x3f6   :  { %v4864_v29 = vsel %vm13470_vm14, %v4862_v34, %v4863_v35  ;;  %v11565_v35 = vld [vmem:[#allocation3 + $0xd8] sm:$0xff]  }
 0x3f7   :  { %10558 = vmatpush3.bf16.msra.mxu1 %v11555_v62  ;;  %v14765_v62 = vcombine.low %v13320_v60, %v13330_v23  ;;  %v14769_v60 = vcombine.low %v13385_v14, %v13391_v63  ;;  %v4854_v23 = vsel %vm13470_vm14, %v9248_v55, %v4853_v59  ;;  %v4857_v27 = vsel %vm13470_vm14, %v4855_v45, %v4856_v47  ;;  %v11654_v14 = vld [vmem:[#allocation2 + $0x20] sm:$0x1]  ;;  %v4803_v59 = vld [vmem:[#allocation2 + $0x24] sm:$0xe]  ;;  %v11564_v47 = vld [vmem:[#allocation3 + $0xd0] sm:$0xff]  }
 0x3f8   :  { %10559 = vmatprep.subr.bf16.mxu1 %v11558_v13  ;;  %v9264_v50 = vcombine.low %v4854_v23, %v4857_v27  ;;  %v4870_v63 = vrot.slane %v11654_v14, 5  ;;  %v4884_v55 = vrot.slane %v11657_v54, 5  ;;  %v4876_v45 = vrot.slane %v4874_v38, 4 }
 0x3f9   :  { %v9252_v23 = vrot.slane %v4804_v12, 9  ;;  %v4891_v14 = vrot.slane %v11659_v3, 5  ;;  %v6430_v12 = vld [vmem:[#allocation2 + $0x3c] sm:$0xe] }
 0x3fa   :  { %10528 = vmatmul.mubr.bf16.gmra.mrb[32].mxu1 %v14762_v19  ;;  %v4871_v24 = vsel %vm13470_vm14, %v4869_v26, %v4870_v63  ;;  %v11563_v19 = vld [vmem:[#allocation3 + $0xc8] sm:$0xff]   ;;  %v4805_v63 = vld [vmem:[#allocation2 + $0x3c] sm:$0xe] }
 0x3fb   :  { %10531 = vmatprep.mubr.bf16.mxu1 %v14763_v46  ;;  %10560 = vmatpush3.bf16.msra.mxu1 %v11558_v13  ;;  %v4861_v13 = vsel %vm13470_vm14, %v9249_v4, %v4860_v7  ;;  %v11655_v46 = vld [vmem:[#allocation2 + $0x34] sm:$0xf]  ;;  %v11658_v7 = vld [vmem:[#allocation2 + $0x40] sm:$0xf]  ;;  %v9253_v26 = vrot.slane %v4805_v63, 9 }
 0x3fc   :  { %10561 = vmatprep.subr.bf16.mxu1 %v11561_v37  ;;  %v9265_v28 = vcombine.low %v4861_v13, %v4864_v29  ;;  %v14771_v13 = vcombine.low %v13477_v17, %v13481_v20  ;;  %v13665_v17 = vld [vmem:[#allocation2 + $0x44] sm:$0x1]  ;;  %v13667_v20 = vld [vmem:[#allocation2 + $0x4c] sm:$0xf]  ;;  %v6432_v63 = vld [vmem:[#allocation2 + $0x54] sm:$0xe] }
 0x3ff   :  { %10562 = vmatpush3.bf16.msra.mxu1 %v11561_v37  ;;  %v4868_v37 = vsel %vm13470_vm14, %v9250_v5, %v4867_v15  ;;  %v4888_v15 = vrot.slane %v11658_v7, 5 }
 0x400   :  { %10595 = vmatprep.subr.bf16.mxu1 %v11562_v39 }
 0x401   :  { %v4890_v34 = vrot.slane %v4888_v15, 4  ;;  %v4889_v29 = vsel %vm13470_vm14, %v9253_v26, %v4888_v15 }
 0x402   :  { %10532 = vmatmul.mubr.bf16.gmra.mrb[36].mxu1 %v14764_v49  ;;  %v4881_v49 = vrot.slane %v11655_v46, 5  ;;  %v6428_v46 = vld [vmem:[#allocation2 + $0x24] sm:$0xe] }
 0x403   :  { %10535 = vmatprep.mubr.bf16.mxu1 %v14765_v62  ;;  %v9266_v62 = vcombine.low %v4868_v37, %v4871_v24  ;;  %v4892_v4 = vsel %vm13470_vm14, %v4890_v34, %v4891_v14  ;;  %v11567_v24 = vld [vmem:[#allocation3 + $0xe8] sm:$0xff]   ;;  %v13657_v37 = vld [vmem:[#allocation2 + $0x2c] sm:$0x1]  ;;  %v9338_v54 = vrot.slane %v6428_v46, 9  ;;  %v6527_v14 = vrot.slane %v13667_v20, 5 }
 0x404   :  { %v4883_v11 = vrot.slane %v4881_v49, 4  ;;  %v4882_v57 = vsel %vm13470_vm14, %v9252_v23, %v4881_v49  ;;  %v9269_v5 = vcombine.low %v4889_v29, %v4892_v4  ;;  %v11569_v49 = vld [vmem:[#allocation3 + $0xf8] sm:$0xff]   ;;  %v6431_v23 = vld [vmem:[#allocation2 + $0x48] sm:$0xe]  ;;  %v13702_v34 = vld [vmem:[#allocation2 + $0x64] sm:$0xf] }
 0x405   :  { %v9341_v3 = vrot.slane %v6431_v23, 9 }
 0x406   :  { %v4885_v27 = vsel %vm13470_vm14, %v4883_v11, %v4884_v55  ;;  %v14773_v11 = vcombine.low %v13502_v18, %v13507_v40  ;;  %v13689_v40 = vld [vmem:[#allocation2 + $0x5c] sm:$0x1] }
 0x407   :  { %v13723_v46 = vsel %vm13470_vm14, %v9341_v3, %v6527_v14  ;;  %v13752_v3 = vld [vmem:[#allocation2 + $0x80] sm:$0x1] }
 0x408   :  { %14776 = vst [vmem:[#allocation11_spill] sm:$0xff] %v13723_v46  ;;  %v11592_v46 = vld [vmem:[#allocation2 + $0xc0] sm:$0xff]  }
 0x40a   :  { %10536 = vmatmul.mubr.bf16.gmra.mrb[40].mxu1 %v14766_v8  ;;  %v11656_v8 = vld [vmem:[#allocation2 + $0x2c] sm:$0x1] }
 0x40b   :  { %10539 = vmatprep.mubr.bf16.mxu1 %v14767_v2  ;;  %v4877_v2 = vrot.slane %v11656_v8, 5  ;;  %v6429_v8 = vld [vmem:[#allocation2 + $0x30] sm:$0xe] }
 0x412   :  { %10540 = vmatmul.mubr.bf16.gmra.mrb[44].mxu1 %v14768_v41  ;;  %v9251_v41 = vrot.slane %v4803_v59, 9  ;;  %v14772_v59 = vcombine.low %v13489_v42, %v13493_v16  ;;  %v13680_v42 = vld [vmem:[#allocation3 + $0x100] sm:$0xff]  }
 0x413   :  { %10543 = vmatprep.mubr.bf16.mxu1 %v14769_v60  ;;  %v4878_v60 = vsel %vm13470_vm14, %v4876_v45, %v4877_v2  ;;  %v13663_v2 = vld [vmem:[#allocation2 + $0x40] sm:$0xf]  ;;  %v6509_v45 = vrot.slane %v13657_v37, 5  ;;  %v13682_v16 = vld [vmem:[#allocation2 + $0x58] sm:$0xf] }
 0x41a   :  { %10544 = vmatmul.mubr.bf16.gmra.mrb[48].mxu1 %v14770_v43  ;;  %v9268_v43 = vcombine.low %v4882_v57, %v4885_v27  ;;  %v6520_v57 = vrot.slane %v13663_v2, 5 }
 0x41b   :  { %10563 = vmatprep.mubr.bf16.mxu1 %v9264_v50  ;;  %v4875_v50 = vsel %vm13470_vm14, %v9251_v41, %v4874_v38  ;;  %v11568_v38 = vld [vmem:[#allocation3 + $0xf0] sm:$0xff]   ;;  %v9339_v41 = vrot.slane %v6429_v8, 9 }
 0x41c   :  { %v6522_v29 = vrot.slane %v6520_v57, 4 }
 0x422   :  { %10564 = vmatmul.mubr.bf16.vlgmr.msra.gmra.mrb[20].mxu1 %v9265_v28  ;;  %v13655_v28 = vld [vmem:[#allocation2 + $0x28] sm:$0xf] }
 0x423   :  { %10567 = vmatprep.mubr.bf16.mxu1 %v9266_v62  ;;  %10596 = vmatpush3.bf16.msra.mxu1 %v11562_v39  ;;  %v9267_v39 = vcombine.low %v4875_v50, %v4878_v60  ;;  %v13661_v62 = vld [vmem:[#allocation2 + $0x38] sm:$0x1]  ;;  %v6506_v55 = vrot.slane %v13655_v28, 5 }
 0x424   :  { %10597 = vmatprep.subr.bf16.mxu1 %v11563_v19  ;;  %v6516_v18 = vrot.slane %v13661_v62, 5 }
 0x425   :  { %v13686_v27 = vsel %vm13470_vm14, %v9338_v54, %v6506_v55  ;;  %v6508_v50 = vrot.slane %v6506_v55, 4  ;;  %v9342_v55 = vrot.slane %v6432_v63, 9 }
 0x427   :  { %10598 = vmatpush3.bf16.msra.mxu1 %v11563_v19  ;;  %v13659_v19 = vld [vmem:[#allocation2 + $0x34] sm:$0xf] }
 0x428   :  { %10599 = vmatprep.subr.bf16.mxu1 %v11564_v47  ;;  %v6513_v60 = vrot.slane %v13659_v19, 5 }
 0x42a   :  { %10568 = vmatmul.mubr.bf16.gmra.mrb[24].mxu1 %v9267_v39  ;;  %v13693_v7 = vsel %vm13470_vm14, %v9339_v41, %v6513_v60  ;;  %v6515_v15 = vrot.slane %v6513_v60, 4  ;;  %v9340_v39 = vrot.slane %v6430_v12, 9  ;;  %v6537_v12 = vrot.slane %v13689_v40, 5  ;;  %v13737_v41 = vld [vmem:[#allocation2 + $0x7c] sm:$0xf] }
 0x42b   :  { %10571 = vmatprep.mubr.bf16.mxu1 %v9268_v43  ;;  %10600 = vmatpush3.bf16.msra.mxu1 %v11564_v47  ;;  %v13677_v47 = vld [vmem:[#allocation2 + $0x50] sm:$0x1]  ;;  %v6523_v43 = vrot.slane %v13665_v17, 5  ;;  %v6436_v60 = vld [vmem:[#allocation2 + $0x84] sm:$0xe] }
 0x42c   :  { %10601 = vmatprep.subr.bf16.mxu1 %v11565_v35  ;;  %v13708_v26 = vsel %vm13470_vm14, %v6515_v15, %v6516_v18  ;;  %v13712_v4 = vsel %vm13470_vm14, %v9340_v39, %v6520_v57  ;;  %v6530_v8 = vrot.slane %v13677_v47, 5  ;;  %v6541_v18 = vrot.slane %v13702_v34, 5  ;;  %v6434_v15 = vld [vmem:[#allocation2 + $0x6c] sm:$0xe] }
 0x42d   :  { %14774 = vst [vmem:[#allocation9_spill] sm:$0xff] %v13708_v26  ;;  %14775 = vst [vmem:[#allocation10_spill] sm:$0xff] %v13712_v4  ;;  %v13730_v54 = vsel %vm13470_vm14, %v6522_v29, %v6523_v43  ;;  %v14780_v39 = vcombine.low %v13525_v0, %v13529_v44  ;;  %v6435_v43 = vld [vmem:[#allocation2 + $0x78] sm:$0xe]  ;;  %v9346_v58 = vrot.slane %v6436_v60, 9 }
 0x42e   :  { %14777 = vst [vmem:[#allocation12_spill] sm:$0xff] %v13730_v54  ;;  %v6543_v0 = vrot.slane %v6541_v18, 4  ;;  %v8071_v4 = vld [vmem:[#allocation2 + $0x60] sm:$0xe]  ;;  %v7343_v26 = vld [vmem:[#allocation2 + $0x98] sm:$0x1] }
 0x42f   :  { %10602 = vmatpush3.bf16.msra.mxu1 %v11565_v35  ;;  %v13698_v35 = vsel %vm13470_vm14, %v6508_v50, %v6509_v45  ;;  %v6534_v45 = vrot.slane %v13682_v16, 5 }
 0x430   :  { %10603 = vmatprep.subr.bf16.mxu1 %v11566_v36 }
 0x431   :  { %v13758_v63 = vsel %vm13470_vm14, %v9342_v55, %v6534_v45  ;;  %v13773_v55 = vld [vmem:[#allocation2 + $0x94] sm:$0xf] }
 0x432   :  { %10572 = vmatmul.mubr.bf16.gmra.mrb[28].mxu1 %v9269_v5  ;;  %v6433_v5 = vld [vmem:[#allocation2 + $0x60] sm:$0xe]  ;;  %14781 = vst [vmem:[#allocation14_spill] sm:$0xff] %v13758_v63 }
 0x433   :  { %10575 = vmatprep.mubr.bf16.mxu1 %v14771_v13  ;;  %10604 = vmatpush3.bf16.msra.mxu1 %v11566_v36  ;;  %v13717_v13 = vld [vmem:[#allocation2 + $0x70] sm:$0xf]  ;;  %v9343_v50 = vrot.slane %v6433_v5, 9  ;;  %v13765_v5 = vld [vmem:[#allocation2 + $0x8c] sm:$0x1]  ;;  %v6558_v36 = vrot.slane %v13752_v3, 5 }
 0x434   :  { %10605 = vmatprep.subr.bf16.mxu1 %v11567_v24  ;;  %v6548_v44 = vrot.slane %v13717_v13, 5 }
 0x435   :  { %v13762_v29 = vsel %vm13470_vm14, %v9343_v50, %v6541_v18 }
 0x436   :  { %14782 = vst [vmem:[#allocation15_spill] sm:$0xff] %v13762_v29  ;;  %v6550_v18 = vrot.slane %v6548_v44, 4 }
 0x437   :  { %10606 = vmatpush3.bf16.msra.mxu1 %v11567_v24  ;;  %v13715_v24 = vld [vmem:[#allocation2 + $0x68] sm:$0x1] }
 0x438   :  { %10607 = vmatprep.subr.bf16.mxu1 %v11568_v38  ;;  %v6544_v57 = vrot.slane %v13715_v24, 5 }
 0x43a   :  { %10576 = vmatmul.mubr.bf16.gmra.mrb[32].mxu1 %v14772_v59  ;;  %v13726_v59 = vld [vmem:[#allocation2 + $0x74] sm:$0x1]  ;;  %v13779_v50 = vsel %vm13470_vm14, %v6543_v0, %v6544_v57 }
 0x43b   :  { %10579 = vmatprep.mubr.bf16.mxu1 %v14773_v11  ;;  %10608 = vmatpush3.bf16.msra.mxu1 %v11568_v38  ;;  %v14778_v11 = vcombine.low %v13511_v25, %v13518_v56  ;;  %v6536_v56 = vrot.slane %v6534_v45, 4  ;;  %14784 = vst [vmem:[#allocation17_spill] sm:$0xff] %v13779_v50  ;;  %v9345_v25 = vrot.slane %v6435_v43, 9  ;;  %v5707_v38 = vld [vmem:[#allocation2 + $0x98] sm:$0x1]  ;;  %v9347_v50 = vrot.slane %v6437_v30, 9 }
 0x43c   :  { %10609 = vmatprep.subr.bf16.mxu1 %v11569_v49  ;;  %v13788_v45 = vld [vmem:[#allocation2 + $0xa0] sm:$0xf]  ;;  %v6572_v29 = vrot.slane %v5707_v38, 5 }
 0x43f   :  { %10610 = vmatpush3.bf16.msra.mxu1 %v11569_v49  ;;  %v6529_v49 = vrot.slane %v6527_v14, 4  ;;  %v13754_v14 = vld [vmem:[#allocation2 + $0x88] sm:$0xf] }
 0x440   :  { %10643 = vmatprep.subr.bf16.mxu1 %v13680_v42  ;;  %v6562_v0 = vrot.slane %v13754_v14, 5 }
 0x441   :  { %v13743_v23 = vsel %vm13470_vm14, %v6529_v49, %v6530_v8  ;;  %v13769_v49 = vsel %vm13470_vm14, %v6536_v56, %v6537_v12  ;;  %v9344_v8 = vrot.slane %v6434_v15, 9  ;;  %v6565_v12 = vrot.slane %v13765_v5, 5 }
 0x442   :  { %10580 = vmatmul.mubr.bf16.gmra.mrb[36].mxu1 %v14778_v11  ;;  %14779 = vst [vmem:[#allocation13_spill] sm:$0xff] %v13743_v23  ;;  %14783 = vst [vmem:[#allocation16_spill] sm:$0xff] %v13769_v49  ;;  %v6551_v11 = vrot.slane %v13726_v59, 5  ;;  %v6438_v49 = vld [vmem:[#allocation2 + $0x9c] sm:$0xe]  ;;  %v13817_v60 = vsel %vm13470_vm14, %v9346_v58, %v6562_v0 }
 0x443   :  { %10583 = vmatprep.mubr.bf16.mxu1 %v14780_v39  ;;  %v6555_v39 = vrot.slane %v13737_v41, 5  ;;  %v13785_v15 = vsel %vm13470_vm14, %v9344_v8, %v6548_v44  ;;  %v5710_v44 = vld [vmem:[#allocation2 + $0xa4] sm:$0x1]  ;;  %v5712_v8 = vld [vmem:[#allocation2 + $0xac] sm:$0xf]  ;;  %14791 = vst [vmem:[#allocation22_spill] sm:$0xff] %v13817_v60 }
 0x444   :  { %14785 = vst [vmem:[#allocation18_spill] sm:$0xff] %v13785_v15  ;;  %v13792_v57 = vsel %vm13470_vm14, %v6550_v18, %v6551_v11  ;;  %v6569_v11 = vrot.slane %v13773_v55, 5  ;;  %v6564_v18 = vrot.slane %v6562_v0, 4  ;;  %v6579_v10 = vrot.slane %v5710_v44, 5  ;;  %v7325_v23 = vld [vmem:[#allocation2 + $0x50] sm:$0x1] }
 0x445   :  { %v6557_v56 = vrot.slane %v6555_v39, 4  ;;  %14786 = vst [vmem:[#allocation19_spill] sm:$0xff] %v13792_v57  ;;  %v13796_v43 = vsel %vm13470_vm14, %v9345_v25, %v6555_v39  ;;  %v14789_v25 = vcombine.low %v13537_v6, %v13541_v53  ;;  %v6576_v6 = vrot.slane %v13788_v45, 5  ;;  %v6439_v53 = vld [vmem:[#allocation2 + $0xa8] sm:$0xe] }
 0x446   :  { %14787 = vst [vmem:[#allocation20_spill] sm:$0xff] %v13796_v43  ;;  %v5716_v57 = vld [vmem:[#allocation2 + $0xbc] sm:$0x1]  ;;  %v13822_v30 = vsel %vm13470_vm14, %v6564_v18, %v6565_v12  ;;  %v13826_v38 = vsel %vm13470_vm14, %v9347_v50, %v6569_v11  ;;  %v6583_v48 = vrot.slane %v5712_v8, 5  ;;  %v5719_v39 = vld [vmem:[#allocation2 + $0xc8] sm:$0x1] }
 0x447   :  { %v13804_v52 = vsel %vm13470_vm14, %v6557_v56, %v6558_v36  ;;  %v5713_v36 = vld [vmem:[#allocation2 + $0xb0] sm:$0x1]  ;;  %v6571_v56 = vrot.slane %v6569_v11, 4  ;;  %14792 = vst [vmem:[#allocation23_spill] sm:$0xff] %v13822_v30  ;;  %14793 = vst [vmem:[#allocation24_spill] sm:$0xff] %v13826_v38  ;;  %v6578_v43 = vrot.slane %v6576_v6, 4 }
 0x448   :  { %14788 = vst [vmem:[#allocation21_spill] sm:$0xff] %v13804_v52  ;;  %v9348_v52 = vrot.slane %v6438_v49, 9  ;;  %v9349_v18 = vrot.slane %v6439_v53, 9  ;;  %v6585_v15 = vrot.slane %v6583_v48, 4  ;;  %v6586_v50 = vrot.slane %v5713_v36, 5  ;;  %v11582_v30 = vld [vmem:[#allocation2 + $0x6c] sm:$0xff]  }
 0x449   :  { %v13832_v0 = vsel %vm13470_vm14, %v6571_v56, %v6572_v29  ;;  %v6440_v11 = vld [vmem:[#allocation2 + $0xb4] sm:$0xe]  ;;  %v13842_v8 = vsel %vm13470_vm14, %v6578_v43, %v6579_v10  ;;  %v6593_v29 = vrot.slane %v5716_v57, 5  ;;  %v6441_v56 = vld [vmem:[#allocation2 + $0xc0] sm:$0xe]  ;;  %v14799_v57 = vcombine.low %v13559_v33, %v13566_v31 }
 0x44a   :  { %10584 = vmatmul.mubr.bf16.gmra.mrb[40].mxu1 %v14789_v25  ;;  %v5715_v25 = vld [vmem:[#allocation2 + $0xb8] sm:$0xf]  ;;  %14794 = vst [vmem:[#allocation25_spill] sm:$0xff] %v13832_v0  ;;  %v13838_v44 = vsel %vm13470_vm14, %v9348_v52, %v6576_v6  ;;  %14796 = vst [vmem:[#allocation27_spill] sm:$0xff] %v13842_v8  ;;  %v13848_v53 = vsel %vm13470_vm14, %v9349_v18, %v6583_v48  ;;  %v13852_v36 = vsel %vm13470_vm14, %v6585_v15, %v6586_v50  ;;  %v11575_v50 = vld [vmem:[#allocation3 + $0x108] sm:$0xff]  }
 0x44b   :  { %10587 = vmatprep.mubr.bf16.mxu1 %v14790_v21  ;;  %v5718_v21 = vld [vmem:[#allocation2 + $0xc4] sm:$0xf]  ;;  %14795 = vst [vmem:[#allocation26_spill] sm:$0xff] %v13838_v44  ;;  %v6590_v58 = vrot.slane %v5715_v25, 5  ;;  %14797 = vst [vmem:[#allocation28_spill] sm:$0xff] %v13848_v53  ;;  %v9350_v43 = vrot.slane %v6440_v11, 9  ;;  %v14800_v48 = vcombine.low %v13576_v22, %v13580_v32 }
 0x44c   :  { %14798 = vst [vmem:[#allocation29_spill] sm:$0xff] %v13852_v36  ;;  %v6597_v52 = vrot.slane %v5718_v21, 5  ;;  %v6600_v25 = vrot.slane %v5719_v39, 5  ;;  %v9351_v49 = vrot.slane %v6441_v56, 9  ;;  %v11570_v32 = vld [vmem:[#allocation2 + $0xc] sm:$0xff]   ;;  %v11571_v18 = vld [vmem:[#allocation2 + $0x18] sm:$0xff]  }
 0x44d   :  { %v6592_v10 = vrot.slane %v6590_v58, 4  ;;  %v13864_v15 = vsel %vm13470_vm14, %v9350_v43, %v6590_v58  ;;  %v14805_v58 = vcombine.low %v13589_v1, %v13593_v9  ;;  %v11573_v11 = vld [vmem:[#allocation2 + $0x24] sm:$0xff]   ;;  %v11574_v56 = vld [vmem:[#allocation2 + $0x30] sm:$0xff]   ;;  %v5675_v9 = vld [vmem:[#allocation2 + $0x18] sm:$0xf] }
 0x44e   :  { %v6599_v12 = vrot.slane %v6597_v52, 4  ;;  %14801 = vst [vmem:[#allocation30_spill] sm:$0xff] %v13864_v15  ;;  %v13874_v33 = vsel %vm13470_vm14, %v9351_v49, %v6597_v52  ;;  %v11581_v49 = vld [vmem:[#allocation3 + $0x118] sm:$0xff]   ;;  %v5678_v22 = vld [vmem:[#allocation2 + $0x24] sm:$0xf] }
 0x44f   :  { %v13868_v21 = vsel %vm13470_vm14, %v6592_v10, %v6593_v29  ;;  %14803 = vst [vmem:[#allocation32_spill] sm:$0xff] %v13874_v33  ;;  %v11578_v29 = vld [vmem:[#allocation3 + $0x110] sm:$0xff]   ;;  %v11576_v10 = vld [vmem:[#allocation2 + $0x3c] sm:$0xff]   ;;  %v13886_v1 = vld [vmem:[#allocation2 + $0x10] sm:$0xf]  ;;  %v5769_v15 = vshrl.u32 %v5678_v22, 16 }
 0x450   :  { %14802 = vst [vmem:[#allocation31_spill] sm:$0xff] %v13868_v21  ;;  %v13878_v31 = vsel %vm13470_vm14, %v6599_v12, %v6600_v25  ;;  %v5672_v12 = vld [vmem:[#allocation2 + $0xc] sm:$0xf]  ;;  %v5676_v25 = vld [vmem:[#allocation2 + $0x1c] sm:$0xf]  ;;  %v11579_v39 = vld [vmem:[#allocation2 + $0x54] sm:$0xff]  }
 0x451   :  { %14804 = vst [vmem:[#allocation33_spill] sm:$0xff] %v13878_v31  ;;  %v5721_v52 = vshrl.u32 %v5672_v12, 16  ;;  %v5724_v43 = vshll.u32 %v5672_v12, 16  ;;  %v5758_v12 = vshrl.u32 %v5676_v25, 16  ;;  %v5684_v38 = vld [vmem:[#allocation2 + $0x3c] sm:$0xf] }
 0x452   :  { %10588 = vmatmul.mubr.bf16.gmra.mrb[44].mxu1 %v14799_v57  ;;  %v11584_v57 = vld [vmem:[#allocation3 + $0x120] sm:$0xff]   ;;  %v5817_v60 = vshrl.u32 %v5684_v38, 16  ;;  %v5820_v63 = vshll.u32 %v5684_v38, 16 }
 0x453   :  { %10591 = vmatprep.mubr.bf16.mxu1 %v14800_v48  ;;  %v5726_v48 = vrot.slane %v5724_v43, 5  ;;  %v13894_v43 = vld [vmem:[#allocation2 + $0x20] sm:$0x1]  ;;  %v5760_v36 = vrot.slane %v5758_v12, 4 }
 0x45a   :  { %10592 = vmatmul.mubr.bf16.gmra.mrb[48].mxu1 %v14805_v58  ;;  %v5734_v58 = vshrl.u32 %v13886_v1, 16 }
 0x45b   :  { %10611 = vmatprep.mubr.bf16.mxu1 %v11570_v32  ;;  %v5730_v32 = vshll.u32 %v13886_v1, 16 }
 0x45d   :  { %v13892_v31 = vrot.slane %v5730_v32, 5  ;;  %v5764_v32 = vshll.u32 %v13894_v43, 16 }
 0x45f   :  { %v5766_v0 = vrot.slane %v5764_v32, 5 }
 0x462   :  { %10612 = vmatmul.mubr.bf16.vlgmr.msra.gmra.mrb[20].mxu1 %v11571_v18  ;;  %v5745_v18 = vshrl.u32 %v5675_v9, 16 }
 0x463   :  { %10615 = vmatprep.mubr.bf16.mxu1 %v11573_v11  ;;  %10644 = vmatpush3.bf16.msra.mxu1 %v13680_v42  ;;  %v5723_v42 = vrot.slane %v5721_v52, 4  ;;  %v5754_v11 = vshll.u32 %v5676_v25, 16  ;;  %v5736_v52 = vrot.slane %v5734_v58, 4  ;;  %v5681_v58 = vld [vmem:[#allocation2 + $0x30] sm:$0xf] }
 0x464   :  { %10645 = vmatprep.subr.bf16.mxu1 %v11575_v50  ;;  %v5747_v33 = vrot.slane %v5745_v18, 4 }
 0x465   :  { %v5727_v6 = vor.u32 %v5726_v48, %v5723_v42  ;;  %v13896_v25 = vrot.slane %v5754_v11, 5  ;;  %v5737_v42 = vor.u32 %v5736_v52, %v13892_v31  ;;  %v5778_v11 = vshll.u32 %v13655_v28, 16  ;;  %v11593_v52 = vld [vmem:[#allocation3 + $0x138] sm:$0xff]  }
 0x467   :  { %10646 = vmatpush3.bf16.msra.mxu1 %v11575_v50  ;;  %v5748_v50 = vshll.u32 %v5675_v9, 16  ;;  %v5772_v9 = vshll.u32 %v5678_v22, 16  ;;  %v13898_v53 = vrot.slane %v5727_v6, 4  ;;  %v5761_v12 = vor.u32 %v5760_v36, %v13896_v25 }
 0x468   :  { %10647 = vmatprep.subr.bf16.mxu1 %v11578_v29  ;;  %v5793_v6 = vshrl.u32 %v5681_v58, 16  ;;  %v5738_v8 = vrot.slane %v5737_v42, 4  ;;  %v5806_v42 = vshrl.u32 %v13659_v19, 16 }
 0x469   :  { %v5750_v21 = vrot.slane %v5748_v50, 5  ;;  %v5771_v50 = vrot.slane %v5769_v15, 4  ;;  %v5774_v22 = vrot.slane %v5772_v9, 5  ;;  %v5733_v15 = vsel %vm13103_vm11, %v13898_v53, %v13892_v31  ;;  %v13914_v53 = vld [vmem:[#allocation3 + $0x140] sm:$0xff]  }
 0x46a   :  { %10616 = vmatmul.mubr.bf16.gmra.mrb[24].mxu1 %v11574_v56  ;;  %v11577_v56 = vld [vmem:[#allocation2 + $0x48] sm:$0xff]   ;;  %v5826_v31 = vshll.u32 %v13663_v2, 16 }
 0x46b   :  { %10619 = vmatprep.mubr.bf16.mxu1 %v11576_v10  ;;  %10648 = vmatpush3.bf16.msra.mxu1 %v11578_v29  ;;  %v11587_v10 = vld [vmem:[#allocation3 + $0x128] sm:$0xff]   ;;  %v13890_v29 = vld [vmem:[#allocation2 + $0x14] sm:$0x1]  ;;  %v5751_v18 = vor.u32 %v5750_v21, %v5747_v33  ;;  %v5775_v36 = vor.u32 %v5774_v22, %v5771_v50  ;;  %v13910_v33 = vrot.slane %v5778_v11, 5 }
 0x46c   :  { %10649 = vmatprep.subr.bf16.mxu1 %v11581_v49  ;;  %v5740_v48 = vshll.u32 %v13890_v29, 16 }
 0x46d   :  { %v5752_v21 = vrot.slane %v5751_v18, 4  ;;  %v5830_v18 = vshrl.u32 %v13663_v2, 16  ;;  %v5808_v2 = vrot.slane %v5806_v42, 4 }
 0x46e   :  { %v5742_v44 = vrot.slane %v5740_v48, 5  ;;  %v5795_v48 = vrot.slane %v5793_v6, 4 }
 0x46f   :  { %10650 = vmatpush3.bf16.msra.mxu1 %v11581_v49  ;;  %v11590_v49 = vld [vmem:[#allocation3 + $0x130] sm:$0xff]  }
 0x470   :  { %10651 = vmatprep.subr.bf16.mxu1 %v11584_v57  ;;  %v5743_v11 = vsel %vm13103_vm11, %v5738_v8, %v5742_v44  ;;  %v5812_v44 = vshll.u32 %v13661_v62, 16  ;;  %v5819_v8 = vrot.slane %v5817_v60, 4 }
 0x471   :  { %v13935_v42 = vcombine.low %v5733_v15, %v5743_v11 }
 0x472   :  { %10620 = vmatmul.mubr.bf16.gmra.mrb[28].mxu1 %v11577_v56  ;;  %v5796_v56 = vshll.u32 %v5681_v58, 16  ;;  %v5802_v58 = vshll.u32 %v13659_v19, 16  ;;  %v5757_v19 = vsel %vm13103_vm11, %v5752_v21, %v13896_v25  ;;  %v13931_v25 = vrot.slane %v5826_v31, 5 }
 0x473   :  { %10623 = vmatprep.mubr.bf16.mxu1 %v11579_v39  ;;  %10652 = vmatpush3.bf16.msra.mxu1 %v11584_v57  ;;  %v5782_v39 = vshrl.u32 %v13655_v28, 16  ;;  %v11580_v57 = vld [vmem:[#allocation2 + $0x60] sm:$0xff]   ;;  %v5687_v28 = vld [vmem:[#allocation2 + $0x48] sm:$0xf] }
 0x474   :  { %10653 = vmatprep.subr.bf16.mxu1 %v11587_v10  ;;  %v5798_v32 = vrot.slane %v5796_v56, 5  ;;  %v5841_v50 = vshrl.u32 %v5687_v28, 16  ;;  %v5844_v22 = vshll.u32 %v5687_v28, 16  ;;  %v5822_v56 = vrot.slane %v5820_v63, 5  ;;  %v11583_v28 = vld [vmem:[#allocation2 + $0x78] sm:$0xff]  }
 0x475   :  { %v5784_v9 = vrot.slane %v5782_v39, 4  ;;  %v13927_v39 = vrot.slane %v5802_v58, 5 }
 0x476   :  { %v5799_v6 = vor.u32 %v5798_v32, %v5795_v48  ;;  %v5843_v21 = vrot.slane %v5841_v50, 4  ;;  %v5814_v50 = vrot.slane %v5812_v44, 5  ;;  %v5860_v44 = vshll.u32 %v13677_v47, 16 }
 0x477   :  { %10654 = vmatpush3.bf16.msra.mxu1 %v11587_v10  ;;  %v5762_v10 = vrot.slane %v5761_v12, 4  ;;  %v5785_v12 = vor.u32 %v5784_v9, %v13910_v33  ;;  %v5854_v9 = vshrl.u32 %v13667_v20, 16  ;;  %v5809_v60 = vor.u32 %v5808_v2, %v13927_v39 }
 0x478   :  { %10655 = vmatprep.subr.bf16.mxu1 %v11590_v49  ;;  %v5800_v31 = vrot.slane %v5799_v6, 4  ;;  %v5902_v47 = vshrl.u32 %v13702_v34, 16 }
 0x479   :  { %v5767_v38 = vsel %vm13103_vm11, %v5762_v10, %v5766_v0  ;;  %v5846_v0 = vrot.slane %v5844_v22, 5  ;;  %v5850_v10 = vshll.u32 %v13667_v20, 16  ;;  %v5786_v32 = vrot.slane %v5785_v12, 4 }
 0x47a   :  { %10624 = vmatmul.mubr.bf16.gmra.mrb[32].mxu1 %v11580_v57  ;;  %v5690_v57 = vld [vmem:[#allocation2 + $0x54] sm:$0xf]  ;;  %v13937_v62 = vcombine.low %v5757_v19, %v5767_v38  ;;  %v5836_v22 = vshll.u32 %v13665_v17, 16  ;;  %v5856_v19 = vrot.slane %v5854_v9, 4  ;;  %v5805_v17 = vsel %vm13103_vm11, %v5800_v31, %v13927_v39 }
 0x47b   :  { %10627 = vmatprep.mubr.bf16.mxu1 %v11582_v30  ;;  %10656 = vmatpush3.bf16.msra.mxu1 %v11590_v49  ;;  %v5776_v30 = vrot.slane %v5775_v36, 4  ;;  %v5788_v49 = vshll.u32 %v13657_v37, 16  ;;  %v5832_v37 = vrot.slane %v5830_v18, 4  ;;  %v11585_v36 = vld [vmem:[#allocation2 + $0x84] sm:$0xff]   ;;  %v5865_v58 = vshrl.u32 %v5690_v57, 16 }
 0x47c   :  { %10657 = vmatprep.subr.bf16.mxu1 %v11593_v52  ;;  %v5823_v18 = vor.u32 %v5822_v56, %v5819_v8  ;;  %v5847_v15 = vor.u32 %v5846_v0, %v5843_v21  ;;  %v5852_v11 = vrot.slane %v5850_v10, 5  ;;  %v11586_v8 = vld [vmem:[#allocation2 + $0x90] sm:$0xff]   ;;  %v5838_v21 = vrot.slane %v5836_v22, 5  ;;  %v11588_v10 = vld [vmem:[#allocation2 + $0x9c] sm:$0xff]  }
 0x47d   :  { %v5790_v63 = vrot.slane %v5788_v49, 5  ;;  %v5781_v48 = vsel %vm13103_vm11, %v5776_v30, %v13910_v33  ;;  %v5833_v20 = vor.u32 %v5832_v37, %v13931_v25  ;;  %v5867_v38 = vrot.slane %v5865_v58, 4  ;;  %v5693_v30 = vld [vmem:[#allocation2 + $0x60] sm:$0xf] }
 0x47e   :  { %v5878_v33 = vshrl.u32 %v13682_v16, 16  ;;  %v5824_v6 = vrot.slane %v5823_v18, 4  ;;  %v5848_v0 = vrot.slane %v5847_v15, 4  ;;  %v5889_v58 = vshrl.u32 %v5693_v30, 16 }
 0x47f   :  { %10658 = vmatpush3.bf16.msra.mxu1 %v11593_v52  ;;  %v5868_v52 = vshll.u32 %v5690_v57, 16  ;;  %v5791_v2 = vsel %vm13103_vm11, %v5786_v32, %v5790_v63  ;;  %v5810_v57 = vrot.slane %v5809_v60, 4  ;;  %v5834_v37 = vrot.slane %v5833_v20, 4 }
 0x480   :  { %10691 = vmatprep.subr.bf16.mxu1 %v13914_v53  ;;  %v13949_v12 = vcombine.low %v5781_v48, %v5791_v2  ;;  %v5880_v39 = vrot.slane %v5878_v33, 4  ;;  %v5898_v60 = vshll.u32 %v13702_v34, 16  ;;  %v5829_v48 = vsel %vm13103_vm11, %v5824_v6, %v13931_v25  ;;  %v13977_v25 = vld [vmem:[#allocation2 + $0x1c] sm:$0xf] }
 0x481   :  { %v5870_v49 = vrot.slane %v5868_v52, 5  ;;  %v5815_v56 = vsel %vm13103_vm11, %v5810_v57, %v5814_v50  ;;  %v5892_v52 = vshll.u32 %v5693_v30, 16  ;;  %v5862_v32 = vrot.slane %v5860_v44, 5  ;;  %14806 = vst [vmem:[#allocation34_spill] sm:$0xff] %v13977_v25  ;;  %v11589_v30 = vld [vmem:[#allocation2 + $0xa8] sm:$0xff]  }
 0x482   :  { %10628 = vmatmul.mubr.bf16.gmra.mrb[36].mxu1 %v11583_v28  ;;  %v5874_v28 = vshll.u32 %v13682_v16, 16  ;;  %v5857_v16 = vor.u32 %v5856_v19, %v5852_v11  ;;  %v13964_v50 = vcombine.low %v5805_v17, %v5815_v56  ;;  %v5839_v20 = vsel %vm13103_vm11, %v5834_v37, %v5838_v21  ;;  %v13997_v56 = vld [vmem:[#allocation2 + $0x78] sm:$0xf] }
 0x483   :  { %10631 = vmatprep.mubr.bf16.mxu1 %v11585_v36  ;;  %v5696_v36 = vld [vmem:[#allocation2 + $0x6c] sm:$0xf]  ;;  %v5871_v9 = vor.u32 %v5870_v49, %v5867_v38  ;;  %v5853_v22 = vsel %vm13103_vm11, %v5848_v0, %v5852_v11  ;;  %v5884_v15 = vshll.u32 %v13689_v40, 16  ;;  %v13973_v38 = vrot.slane %v5889_v58, 4  ;;  %v13986_v11 = vld [vmem:[#allocation2 + $0x20] sm:$0x1] }
 0x484   :  { %v13957_v63 = vrot.slane %v5874_v28, 5  ;;  %v5913_v31 = vshrl.u32 %v5696_v36, 16  ;;  %v5916_v18 = vshll.u32 %v5696_v36, 16  ;;  %v5858_v19 = vrot.slane %v5857_v16, 4  ;;  %14807 = vst [vmem:[#allocation35_spill] sm:$0xff] %v13986_v11  ;;  %v11591_v21 = vld [vmem:[#allocation2 + $0xb4] sm:$0xff]  }
 0x485   :  { %v13971_v34 = vrot.slane %v5871_v9, 4  ;;  %v13975_v49 = vrot.slane %v5892_v52, 5  ;;  %v13979_v2 = vcombine.low %v5829_v48, %v5839_v20  ;;  %v13982_v28 = vrot.slane %v5898_v60, 5  ;;  %v13988_v40 = vld [vmem:[#allocation2 + $0x28] sm:$0xf] }
 0x486   :  { %v5881_v57 = vor.u32 %v5880_v39, %v13957_v63  ;;  %v13984_v33 = vrot.slane %v5902_v47, 4  ;;  %14808 = vst [vmem:[#allocation36_spill] sm:$0xff] %v13988_v40  ;;  %v5863_v17 = vsel %vm13103_vm11, %v5858_v19, %v5862_v32  ;;  %v13992_v6 = vrot.slane %v5913_v31, 4  ;;  %v8065_v37 = vld [vmem:[#allocation2 + $0x18] sm:$0xe] }
 0x487   :  { %v13994_v44 = vrot.slane %v5916_v18, 5  ;;  %v13999_v0 = vcombine.low %v5853_v22, %v5863_v17  ;;  %v14001_v36 = vrot.slane %v5884_v15, 5  ;;  %v5926_v16 = vshrl.u32 %v13717_v13, 16  ;;  %v14005_v9 = vld [vmem:[#allocation2 + $0x2c] sm:$0x1] }
 0x488   :  { %14809 = vst [vmem:[#allocation37_spill] sm:$0xff] %v14005_v9  ;;  %v14013_v39 = vld [vmem:[#allocation2 + $0x34] sm:$0xf]  ;;  %v14015_v60 = vld [vmem:[#allocation2 + $0x38] sm:$0x1]  ;;  %v8131_v47 = vrot.slane %v13977_v25, 5 }
 0x489   :  { %14810 = vst [vmem:[#allocation38_spill] sm:$0xff] %v14013_v39  ;;  %14811 = vst [vmem:[#allocation39_spill] sm:$0xff] %v14015_v60  ;;  %v8134_v48 = vrot.slane %v13986_v11, 5  ;;  %v9424_v18 = vrot.slane %v8065_v37, 9  ;;  %v8066_v20 = vld [vmem:[#allocation2 + $0x24] sm:$0xe] }
 0x48a   :  { %10632 = vmatmul.mubr.bf16.gmra.mrb[40].mxu1 %v11586_v8  ;;  %v5922_v8 = vshll.u32 %v13717_v13, 16  ;;  %v14019_v13 = vrot.slane %v5881_v57, 4  ;;  %v14028_v19 = vld [vmem:[#allocation2 + $0x40] sm:$0xf]  ;;  %v14030_v17 = vld [vmem:[#allocation2 + $0x44] sm:$0x1] }
 0x48b   :  { %10635 = vmatprep.mubr.bf16.mxu1 %v11588_v10  ;;  %14812 = vst [vmem:[#allocation40_spill] sm:$0xff] %v14028_v19  ;;  %14813 = vst [vmem:[#allocation41_spill] sm:$0xff] %v14030_v17  ;;  %v8138_v57 = vrot.slane %v13988_v40, 5  ;;  %v14033_v58 = vrot.slane %v5926_v16, 4  ;;  %v14036_v31 = vld [vmem:[#allocation2 + $0x4c] sm:$0xf]  ;;  %v14040_v37 = vsel %vm13470_vm14, %v9424_v18, %v8131_v47 }
 0x48c   :  { %v14026_v15 = vrot.slane %v5922_v8, 5  ;;  %14814 = vst [vmem:[#allocation42_spill] sm:$0xff] %v14036_v31  ;;  %14815 = vst [vmem:[#allocation43_spill] sm:$0xff] %v14040_v37  ;;  %v8141_v8 = vrot.slane %v14005_v9, 5  ;;  %v7327_v22 = vld [vmem:[#allocation2 + $0x58] sm:$0xf] }
 0x48d   :  { %v9425_v52 = vrot.slane %v8066_v20, 9  ;;  %v8140_v11 = vrot.slane %v8138_v57, 4  ;;  %v8145_v16 = vrot.slane %v14013_v39, 5  ;;  %v8068_v40 = vld [vmem:[#allocation2 + $0x3c] sm:$0xe]  ;;  %v8148_v18 = vrot.slane %v14015_v60, 5 }
 0x48e   :  { %v7328_v9 = vld [vmem:[#allocation2 + $0x5c] sm:$0x1]  ;;  %v8069_v32 = vld [vmem:[#allocation2 + $0x48] sm:$0xe]  ;;  %v9427_v54 = vrot.slane %v8068_v40, 9 }
 0x48f   :  { %v14059_v20 = vsel %vm13470_vm14, %v8140_v11, %v8141_v8  ;;  %v8147_v39 = vrot.slane %v8145_v16, 4  ;;  %v8070_v37 = vld [vmem:[#allocation2 + $0x54] sm:$0xe]  ;;  %v14065_v60 = vld [vmem:[#allocation2 + $0x64] sm:$0xf]  ;;  %v8159_v8 = vrot.slane %v14036_v31, 5 }
 0x490   :  { %14818 = vst [vmem:[#allocation46_spill] sm:$0xff] %v14059_v20  ;;  %14819 = vst [vmem:[#allocation47_spill] sm:$0xff] %v14065_v60  ;;  %v7333_v40 = vld [vmem:[#allocation2 + $0x70] sm:$0xf]  ;;  %v7334_v25 = vld [vmem:[#allocation2 + $0x74] sm:$0x1] }
 0x491   :  { %v8072_v20 = vld [vmem:[#allocation2 + $0x6c] sm:$0xe] }
 0x492   :  { %10636 = vmatmul.mubr.bf16.gmra.mrb[44].mxu1 %v11589_v30  ;;  %v8133_v30 = vrot.slane %v8131_v47, 4  ;;  %v8152_v47 = vrot.slane %v14028_v19, 5  ;;  %v8166_v19 = vrot.slane %v7327_v22, 5 }
 0x493   :  { %10639 = vmatprep.mubr.bf16.mxu1 %v11591_v21  ;;  %v8067_v21 = vld [vmem:[#allocation2 + $0x30] sm:$0xe] }
 0x494   :  { %v14045_v10 = vsel %vm13470_vm14, %v8133_v30, %v8134_v48  ;;  %v14055_v48 = vsel %vm13470_vm14, %v9425_v52, %v8138_v57  ;;  %v9426_v30 = vrot.slane %v8067_v21, 9  ;;  %v7331_v52 = vld [vmem:[#allocation2 + $0x68] sm:$0x1]  ;;  %v14073_v57 = vsel %vm13470_vm14, %v8147_v39, %v8148_v18 }
 0x495   :  { %14816 = vst [vmem:[#allocation44_spill] sm:$0xff] %v14045_v10  ;;  %14817 = vst [vmem:[#allocation45_spill] sm:$0xff] %v14055_v48  ;;  %v8155_v10 = vrot.slane %v14030_v17, 5  ;;  %v8162_v21 = vrot.slane %v7325_v23, 5  ;;  %v8154_v48 = vrot.slane %v8152_v47, 4  ;;  %v9428_v17 = vrot.slane %v8069_v32, 9 }
 0x496   :  { %v14069_v11 = vsel %vm13470_vm14, %v9426_v30, %v8145_v16  ;;  %14821 = vst [vmem:[#allocation49_spill] sm:$0xff] %v14073_v57  ;;  %v7336_v16 = vld [vmem:[#allocation2 + $0x7c] sm:$0xf]  ;;  %v14081_v39 = vsel %vm13470_vm14, %v9427_v54, %v8152_v47  ;;  %v8161_v18 = vrot.slane %v8159_v8, 4  ;;  %v9429_v30 = vrot.slane %v8070_v37, 9 }
 0x497   :  { %14820 = vst [vmem:[#allocation48_spill] sm:$0xff] %v14069_v11  ;;  %14822 = vst [vmem:[#allocation50_spill] sm:$0xff] %v14081_v39  ;;  %v8169_v23 = vrot.slane %v7328_v9, 5  ;;  %v14085_v31 = vsel %vm13470_vm14, %v8154_v48, %v8155_v10  ;;  %v14089_v32 = vsel %vm13470_vm14, %v9428_v17, %v8159_v8  ;;  %v8168_v22 = vrot.slane %v8166_v19, 4  ;;  %v7337_v57 = vld [vmem:[#allocation2 + $0x80] sm:$0x1] }
 0x498   :  { %14823 = vst [vmem:[#allocation51_spill] sm:$0xff] %v14085_v31  ;;  %v7340_v11 = vld [vmem:[#allocation2 + $0x8c] sm:$0x1]  ;;  %v14096_v9 = vsel %vm13470_vm14, %v8161_v18, %v8162_v21  ;;  %v9430_v37 = vrot.slane %v8071_v4, 9  ;;  %v8176_v10 = vrot.slane %v7331_v52, 5  ;;  %v14102_v48 = vsel %vm13470_vm14, %v9429_v30, %v8166_v19  ;;  %v11595_v39 = vld [vmem:[#allocation3 + $0x148] sm:$0xff]  }
 0x499   :  { %14824 = vst [vmem:[#allocation52_spill] sm:$0xff] %v14096_v9  ;;  %v7342_v47 = vld [vmem:[#allocation2 + $0x94] sm:$0xf]  ;;  %14825 = vst [vmem:[#allocation53_spill] sm:$0xff] %v14102_v48  ;;  %v14106_v8 = vsel %vm13470_vm14, %v8168_v22, %v8169_v23  ;;  %v8073_v54 = vld [vmem:[#allocation2 + $0x78] sm:$0xe] }
 0x49a   :  { %10640 = vmatmul.mubr.bf16.gmra.mrb[48].mxu1 %v11592_v46  ;;  %v7339_v46 = vld [vmem:[#allocation2 + $0x88] sm:$0xf]  ;;  %14826 = vst [vmem:[#allocation54_spill] sm:$0xff] %v14106_v8  ;;  %v9431_v18 = vrot.slane %v8072_v20, 9  ;;  %v8180_v4 = vrot.slane %v7333_v40, 5  ;;  %v8183_v52 = vrot.slane %v7334_v25, 5 }
 0x49b   :  { %10659 = vmatprep.mubr.bf16.mxu1 %v13935_v42  ;;  %v8173_v42 = vrot.slane %v14065_v60, 5  ;;  %v8074_v31 = vld [vmem:[#allocation2 + $0x84] sm:$0xe]  ;;  %v8187_v30 = vrot.slane %v7336_v16, 5  ;;  %v8190_v23 = vrot.slane %v7337_v57, 5  ;;  %v9432_v25 = vrot.slane %v8073_v54, 9 }
 0x49c   :  { %v7345_v22 = vld [vmem:[#allocation2 + $0xa0] sm:$0xf]  ;;  %v7346_v9 = vld [vmem:[#allocation2 + $0xa4] sm:$0x1]  ;;  %v8182_v40 = vrot.slane %v8180_v4, 4  ;;  %v8194_v21 = vrot.slane %v7339_v46, 5 }
 0x49d   :  { %v8175_v60 = vrot.slane %v8173_v42, 4  ;;  %v14112_v17 = vsel %vm13470_vm14, %v9430_v37, %v8173_v42  ;;  %v8075_v8 = vld [vmem:[#allocation2 + $0x90] sm:$0xe]  ;;  %v7348_v48 = vld [vmem:[#allocation2 + $0xac] sm:$0xf]  ;;  %v14123_v42 = vsel %vm13470_vm14, %v9431_v18, %v8180_v4  ;;  %v9433_v37 = vrot.slane %v8074_v31, 9 }
 0x49e   :  { %14827 = vst [vmem:[#allocation55_spill] sm:$0xff] %v14123_v42  ;;  %v8197_v16 = vrot.slane %v7340_v11, 5  ;;  %v7351_v57 = vld [vmem:[#allocation2 + $0xb8] sm:$0xf]  ;;  %v14129_v54 = vsel %vm13470_vm14, %v8182_v40, %v8183_v52  ;;  %v8196_v46 = vrot.slane %v8194_v21, 4  ;;  %v11596_v4 = vld [vmem:[#allocation3 + $0x150] sm:$0xff]  }
 0x49f   :  { %v14116_v19 = vsel %vm13470_vm14, %v8175_v60, %v8176_v10  ;;  %v8189_v60 = vrot.slane %v8187_v30, 4  ;;  %14828 = vst [vmem:[#allocation56_spill] sm:$0xff] %v14129_v54  ;;  %v8201_v10 = vrot.slane %v7342_v47, 5  ;;  %v8076_v18 = vld [vmem:[#allocation2 + $0x9c] sm:$0xe]  ;;  %v9434_v11 = vrot.slane %v8075_v8, 9 }
 0x4a0   :  { %v7349_v31 = vld [vmem:[#allocation2 + $0xb0] sm:$0x1]  ;;  %v8204_v52 = vrot.slane %v7343_v26, 5  ;;  %v7352_v40 = vld [vmem:[#allocation2 + $0xbc] sm:$0x1]  ;;  %v14145_v47 = vsel %vm13470_vm14, %v9433_v37, %v8194_v21  ;;  %v8208_v8 = vrot.slane %v7345_v22, 5 }
 0x4a1   :  { %14830 = vst [vmem:[#allocation58_spill] sm:$0xff] %v14145_v47  ;;  %v8203_v20 = vrot.slane %v8201_v10, 4  ;;  %v8211_v26 = vrot.slane %v7346_v9, 5  ;;  %v8078_v54 = vld [vmem:[#allocation2 + $0xb4] sm:$0xe]  ;;  %v14155_v21 = vsel %vm13470_vm14, %v9434_v11, %v8201_v10  ;;  %v8225_v47 = vrot.slane %v7352_v40, 5 }
 0x4a2   :  { %10660 = vmatmul.mubr.bf16.vlgmr.msra.gmra.mrb[20].mxu1 %v13937_v62  ;;  %v14133_v62 = vsel %vm13470_vm14, %v9432_v25, %v8187_v30  ;;  %v14149_v25 = vsel %vm13470_vm14, %v8196_v46, %v8197_v16  ;;  %v7354_v42 = vld [vmem:[#allocation2 + $0xc4] sm:$0xf]  ;;  %v7355_v30 = vld [vmem:[#allocation2 + $0xc8] sm:$0x1]  ;;  %v8215_v16 = vrot.slane %v7348_v48, 5  ;;  %v8218_v46 = vrot.slane %v7349_v31, 5 }
 0x4a3   :  { %10663 = vmatprep.mubr.bf16.mxu1 %v13949_v12  ;;  %10692 = vmatpush3.bf16.msra.mxu1 %v13914_v53  ;;  %v14139_v53 = vsel %vm13470_vm14, %v8189_v60, %v8190_v23  ;;  %14831 = vst [vmem:[#allocation59_spill] sm:$0xff] %v14149_v25  ;;  %v8077_v12 = vld [vmem:[#allocation2 + $0xa8] sm:$0xe]  ;;  %v9435_v60 = vrot.slane %v8076_v18, 9  ;;  %v14159_v37 = vsel %vm13470_vm14, %v8203_v20, %v8204_v52  ;;  %v8210_v9 = vrot.slane %v8208_v8, 4  ;;  %v14902_v51 = vld [vmem:[#allocation52_spill] sm:$0xff] }
 0x4a4   :  { %10693 = vmatprep.subr.bf16.mxu1 %v11595_v39  ;;  %14829 = vst [vmem:[#allocation57_spill] sm:$0xff] %v14139_v53  ;;  %v11597_v53 = vld [vmem:[#allocation3 + $0x158] sm:$0xff]   ;;  %v9450_v22 = vcombine.low %v14155_v21, %v14159_v37  ;;  %v9436_v18 = vrot.slane %v8077_v12, 9  ;;  %v8079_v23 = vld [vmem:[#allocation2 + $0xc0] sm:$0xe]  ;;  %v8217_v10 = vrot.slane %v8215_v16, 4 }
 0x4a5   :  { %v14165_v25 = vsel %vm13470_vm14, %v9435_v60, %v8208_v8  ;;  %v9437_v11 = vrot.slane %v8078_v54, 9  ;;  %v14170_v48 = vsel %vm13470_vm14, %v8210_v9, %v8211_v26  ;;  %v5702_v12 = vld [vmem:[#allocation2 + $0x84] sm:$0xf]  ;;  %v9438_v52 = vrot.slane %v8079_v23, 9  ;;  %v11598_v60 = vld [vmem:[#allocation3 + $0x160] sm:$0xff]   ;;  %v9466_v21 = vld [vmem:[%s14687_s0 + $0x49] sm:$0xff] }
 0x4a6   :  { %v14174_v20 = vsel %vm13470_vm14, %v9436_v18, %v8215_v16  ;;  %v9451_v54 = vcombine.low %v14165_v25, %v14170_v48  ;;  %v8232_v40 = vrot.slane %v7355_v30, 5  ;;  %v14832_v26 = vshrl.u32 %v13997_v56, 16  ;;  %v5708_v9 = vld [vmem:[#allocation2 + $0x9c] sm:$0xf]  ;;  %v9464_v48 = vld [vmem:[%s14687_s0 + $0x31] sm:$0xff] }
 0x4a7   :  { %10694 = vmatpush3.bf16.msra.mxu1 %v11595_v39  ;;  %v8222_v39 = vrot.slane %v7351_v57, 5  ;;  %v8229_v57 = vrot.slane %v7354_v42, 5  ;;  %v14833_v23 = vshll.u32 %v13997_v56, 16  ;;  %v5961_v18 = vshrl.u32 %v5702_v12, 16 }
 0x4a8   :  { %10695 = vmatprep.subr.bf16.mxu1 %v11596_v4  ;;  %v5939_v16 = vrot.slane %v14832_v26, 4  ;;  %v5887_v56 = vsel %vm13103_vm11, %v14019_v13, %v14001_v36  ;;  %v14835_v26 = vshll.u32 %v13715_v24, 16  ;;  %v5929_v36 = vor.u32 %v14033_v58, %v14026_v15  ;;  %v5705_v24 = vld [vmem:[#allocation2 + $0x90] sm:$0xf]  ;;  %v11599_v13 = vld [vmem:[#allocation3 + $0x168] sm:$0xff]  }
 0x4a9   :  { %v8224_v31 = vrot.slane %v8222_v39, 4  ;;  %v14187_v42 = vsel %vm13470_vm14, %v9437_v11, %v8222_v39  ;;  %v5942_v30 = vrot.slane %v14833_v23, 5  ;;  %v14202_v39 = vsel %vm13470_vm14, %v9438_v52, %v8229_v57 }
 0x4aa   :  { %10664 = vmatmul.mubr.bf16.gmra.mrb[24].mxu1 %v13964_v50  ;;  %v14181_v50 = vsel %vm13470_vm14, %v8217_v10, %v8218_v46  ;;  %v5950_v46 = vshrl.u32 %v13737_v41, 16  ;;  %v5964_v10 = vshll.u32 %v5702_v12, 16  ;;  %v14834_v11 = vor.u32 %v13975_v49, %v13973_v38 }
 0x4ab   :  { %10667 = vmatprep.mubr.bf16.mxu1 %v13979_v2  ;;  %10696 = vmatpush3.bf16.msra.mxu1 %v11596_v4  ;;  %v9452_v8 = vcombine.low %v14174_v20, %v14181_v50  ;;  %v14191_v2 = vsel %vm13470_vm14, %v8224_v31, %v8225_v47  ;;  %v8231_v4 = vrot.slane %v8229_v57, 4  ;;  %v5910_v12 = vrot.slane %v14835_v26, 5  ;;  %v9467_v50 = vld [vmem:[%s14687_s0 + $0x51] sm:$0xff] }
 0x4ac   :  { %10697 = vmatprep.subr.bf16.mxu1 %v11597_v53  ;;  %v5896_v31 = vrot.slane %v14834_v11, 4  ;;  %v14836_v52 = vsel %vm13103_vm11, %v13971_v34, %v13957_v63  ;;  %v5970_v38 = vshll.u32 %v13754_v14, 16  ;;  %v5974_v49 = vshrl.u32 %v13754_v14, 16 }
 0x4ad   :  { %v14206_v47 = vsel %vm13470_vm14, %v8231_v4, %v8232_v40  ;;  %v9318_v40 = vcombine.low %v14836_v52, %v5887_v56  ;;  %v14838_v23 = vor.u32 %v13994_v44, %v13992_v6  ;;  %v14839_v63 = vshll.u32 %v13737_v41, 16 }
 0x4ae   :  { %v5952_v58 = vrot.slane %v5950_v46, 4  ;;  %v14840_v56 = vshll.u32 %v13726_v59, 16  ;;  %v5943_v26 = vor.u32 %v5942_v30, %v5939_v16  ;;  %v5963_v52 = vrot.slane %v5961_v18, 4  ;;  %v11600_v30 = vld [vmem:[#allocation3 + $0x170] sm:$0xff]  }
 0x4af   :  { %10698 = vmatpush3.bf16.msra.mxu1 %v11597_v53  ;;  %v14837_v53 = vor.u32 %v13984_v33, %v13982_v28  ;;  %v5920_v11 = vrot.slane %v14838_v23, 4  ;;  %v14236_v34 = vrot.slane %v14839_v63, 5  ;;  %v5966_v57 = vrot.slane %v5964_v10, 5 }
 0x4b0   :  { %10699 = vmatprep.subr.bf16.mxu1 %v11598_v60  ;;  %v5934_v14 = vrot.slane %v14840_v56, 5  ;;  %v5901_v33 = vsel %vm13103_vm11, %v5896_v31, %v13982_v28  ;;  %v5985_v6 = vshrl.u32 %v5705_v24, 16  ;;  %v5988_v44 = vshll.u32 %v5705_v24, 16 }
 0x4b1   :  { %v5906_v4 = vrot.slane %v14837_v53, 4  ;;  %v5930_v46 = vrot.slane %v5929_v36, 4  ;;  %v14247_v59 = vrot.slane %v5970_v38, 5  ;;  %v5976_v16 = vrot.slane %v5974_v49, 4 }
 0x4b2   :  { %10668 = vmatmul.mubr.bf16.gmra.mrb[28].mxu1 %v13999_v0  ;;  %v5956_v0 = vshll.u32 %v13752_v3, 16  ;;  %v5925_v18 = vsel %vm13103_vm11, %v5920_v11, %v14026_v15  ;;  %v5953_v28 = vor.u32 %v5952_v58, %v14236_v34  ;;  %v6009_v10 = vshrl.u32 %v5708_v9, 16  ;;  %v5711_v58 = vld [vmem:[#allocation2 + $0xa8] sm:$0xf] }
 0x4b3   :  { %10671 = vmatprep.mubr.bf16.mxu1 %v9318_v40  ;;  %v5911_v41 = vsel %vm13103_vm11, %v5906_v4, %v5910_v12  ;;  %10700 = vmatpush3.bf16.msra.mxu1 %v11598_v60  ;;  %v6012_v31 = vshll.u32 %v5708_v9, 16  ;;  %v5935_v60 = vsel %vm13103_vm11, %v5930_v46, %v5934_v14  ;;  %v5944_v12 = vrot.slane %v5943_v26, 4  ;;  %v11601_v9 = vld [vmem:[#allocation3 + $0x178] sm:$0xff]  }
 0x4b4   :  { %10701 = vmatprep.subr.bf16.mxu1 %v11599_v13  ;;  %v5967_v40 = vor.u32 %v5966_v57, %v5963_v52  ;;  %v5980_v3 = vshll.u32 %v13765_v5, 16  ;;  %v5987_v36 = vrot.slane %v5985_v6, 4  ;;  %v5990_v38 = vrot.slane %v5988_v44, 5 }
 0x4b5   :  { %v5994_v49 = vshll.u32 %v13773_v55, 16  ;;  %v5998_v24 = vshrl.u32 %v13773_v55, 16  ;;  %v9319_v53 = vcombine.low %v5901_v33, %v5911_v41  ;;  %v9320_v15 = vcombine.low %v5925_v18, %v5935_v60  ;;  %v5714_v41 = vld [vmem:[#allocation2 + $0xb4] sm:$0xf] }
 0x4b6   :  { %v5958_v4 = vrot.slane %v5956_v0, 5  ;;  %v5977_v23 = vor.u32 %v5976_v16, %v14247_v59  ;;  %v6011_v11 = vrot.slane %v6009_v10, 4  ;;  %v6014_v63 = vrot.slane %v6012_v31, 5  ;;  %v14266_v0 = vld [vmem:[#allocation3 + $0x180] sm:$0xff]  }
 0x4b7   :  { %10702 = vmatpush3.bf16.msra.mxu1 %v11599_v13  ;;  %v6018_v57 = vshll.u32 %v13788_v45, 16  ;;  %v6022_v5 = vshrl.u32 %v13788_v45, 16  ;;  %v5949_v55 = vsel %vm13103_vm11, %v5944_v12, %v14236_v34  ;;  %v5954_v13 = vrot.slane %v5953_v28, 4  ;;  %v11660_v16 = vld [vmem:[#allocation2 + $0x98] sm:$0x1] }
 0x4b8   :  { %10703 = vmatprep.subr.bf16.mxu1 %v11600_v30  ;;  %v5968_v56 = vrot.slane %v5967_v40, 4  ;;  %v5982_v14 = vrot.slane %v5980_v3, 5  ;;  %v5991_v26 = vor.u32 %v5990_v38, %v5987_v36  ;;  %v5996_v52 = vrot.slane %v5994_v49, 5  ;;  %v11661_v38 = vld [vmem:[#allocation2 + $0xa4] sm:$0x1] }
 0x4b9   :  { %v6000_v33 = vrot.slane %v5998_v24, 4  ;;  %v5959_v6 = vsel %vm13103_vm11, %v5954_v13, %v5958_v4  ;;  %v5978_v44 = vrot.slane %v5977_v23, 4  ;;  %v6033_v45 = vshrl.u32 %v5711_v58, 16 }
 0x4ba   :  { %10672 = vmatmul.mubr.bf16.gmra.mrb[32].mxu1 %v9319_v53  ;;  %v6036_v46 = vshll.u32 %v5711_v58, 16  ;;  %v6004_v34 = vshll.u32 %v11660_v16, 16  ;;  %v6015_v18 = vor.u32 %v6014_v63, %v6011_v11  ;;  %v6020_v28 = vrot.slane %v6018_v57, 5 }
 0x4bb   :  { %10675 = vmatprep.mubr.bf16.mxu1 %v9320_v15  ;;  %10704 = vmatpush3.bf16.msra.mxu1 %v11600_v30  ;;  %v6024_v10 = vrot.slane %v6022_v5, 4  ;;  %v9321_v31 = vcombine.low %v5949_v55, %v5959_v6  ;;  %v5973_v60 = vsel %vm13103_vm11, %v5968_v56, %v14247_v59  ;;  %v6057_v30 = vshrl.u32 %v5714_v41, 16  ;;  %v11662_v15 = vld [vmem:[#allocation2 + $0xac] sm:$0xf]  ;;  %v11663_v55 = vld [vmem:[#allocation2 + $0xb8] sm:$0xf] }
 0x4bc   :  { %10705 = vmatprep.subr.bf16.mxu1 %v11601_v9  ;;  %v6060_v12 = vshll.u32 %v5714_v41, 16  ;;  %v5983_v40 = vsel %vm13103_vm11, %v5978_v44, %v5982_v14  ;;  %v5992_v3 = vrot.slane %v5991_v26, 4  ;;  %v6001_v36 = vor.u32 %v6000_v33, %v5996_v52  ;;  %v5717_v14 = vld [vmem:[#allocation2 + $0xc0] sm:$0xf] }
 0x4bd   :  { %v6028_v49 = vshll.u32 %v11661_v38, 16  ;;  %v6035_v24 = vrot.slane %v6033_v45, 4  ;;  %v6038_v53 = vrot.slane %v6036_v46, 5  ;;  %v6042_v4 = vshll.u32 %v11662_v15, 16 }
 0x4be   :  { %v6046_v23 = vshrl.u32 %v11662_v15, 16  ;;  %v9322_v11 = vcombine.low %v5973_v60, %v5983_v40  ;;  %v6006_v63 = vrot.slane %v6004_v34, 5  ;;  %v6016_v59 = vrot.slane %v6015_v18, 4  ;;  %v11666_v15 = vld [vmem:[#allocation2 + $0xc4] sm:$0xf] }
 0x4bf   :  { %10706 = vmatpush3.bf16.msra.mxu1 %v11601_v9  ;;  %v6025_v57 = vor.u32 %v6024_v10, %v6020_v28  ;;  %v6059_v5 = vrot.slane %v6057_v30, 4  ;;  %v6062_v58 = vrot.slane %v6060_v12, 5  ;;  %v6066_v13 = vshll.u32 %v11663_v55, 16  ;;  %v11664_v12 = vld [vmem:[#allocation2 + $0xb0] sm:$0x1] }
 0x4c0   :  { %10739 = vmatprep.subr.bf16.mxu1 %v14266_v0  ;;  %v6070_v56 = vshrl.u32 %v11663_v55, 16  ;;  %v5997_v9 = vsel %vm13103_vm11, %v5992_v3, %v5996_v52  ;;  %v6030_v26 = vrot.slane %v6028_v49, 5  ;;  %v6002_v33 = vrot.slane %v6001_v36, 4  ;;  %v11665_v49 = vld [vmem:[#allocation2 + $0xbc] sm:$0x1] }
 0x4c1   :  { %v6039_v41 = vor.u32 %v6038_v53, %v6035_v24  ;;  %v6044_v6 = vrot.slane %v6042_v4, 5  ;;  %v6048_v44 = vrot.slane %v6046_v23, 4  ;;  %v6021_v45 = vsel %vm13103_vm11, %v6016_v59, %v6020_v28 }
 0x4c2   :  { %10676 = vmatmul.mubr.bf16.gmra.mrb[36].mxu1 %v9321_v31  ;;  %v6026_v46 = vrot.slane %v6025_v57, 4  ;;  %v6081_v16 = vshrl.u32 %v5717_v14, 16  ;;  %v6084_v34 = vshll.u32 %v5717_v14, 16  ;;  %v6007_v18 = vsel %vm13103_vm11, %v6002_v33, %v6006_v63  ;;  %v11667_v33 = vld [vmem:[#allocation2 + $0xc8] sm:$0x1] }
 0x4c3   :  { %10679 = vmatprep.mubr.bf16.mxu1 %v9322_v11  ;;  %v6063_v10 = vor.u32 %v6062_v58, %v6059_v5  ;;  %v6068_v31 = vrot.slane %v6066_v13, 5  ;;  %v6072_v60 = vrot.slane %v6070_v56, 4  ;;  %v9323_v30 = vcombine.low %v5997_v9, %v6007_v18 }
 0x4c4   :  { %v6031_v52 = vsel %vm13103_vm11, %v6026_v46, %v6030_v26  ;;  %v6052_v40 = vshll.u32 %v11664_v12, 16  ;;  %v6040_v36 = vrot.slane %v6039_v41, 4  ;;  %v6049_v38 = vor.u32 %v6048_v44, %v6044_v6 }
 0x4c5   :  { %v9324_v3 = vcombine.low %v6021_v45, %v6031_v52  ;;  %v6076_v28 = vshll.u32 %v11665_v49, 16  ;;  %v6083_v24 = vrot.slane %v6081_v16, 4  ;;  %v6086_v53 = vrot.slane %v6084_v34, 5 }
 0x4c6   :  { %v6090_v4 = vshll.u32 %v11666_v15, 16  ;;  %v6094_v23 = vshrl.u32 %v11666_v15, 16  ;;  %v6064_v11 = vrot.slane %v6063_v10, 4  ;;  %v6073_v63 = vor.u32 %v6072_v60, %v6068_v31 }
 0x4c7   :  { %v6054_v59 = vrot.slane %v6052_v40, 5  ;;  %v6045_v57 = vsel %vm13103_vm11, %v6040_v36, %v6044_v6  ;;  %v6078_v5 = vrot.slane %v6076_v28, 5  ;;  %v6050_v58 = vrot.slane %v6049_v38, 4 }
 0x4c8   :  { %v6087_v55 = vor.u32 %v6086_v53, %v6083_v24  ;;  %v6092_v13 = vrot.slane %v6090_v4, 5  ;;  %v6096_v56 = vrot.slane %v6094_v23, 4  ;;  %v6069_v14 = vsel %vm13103_vm11, %v6064_v11, %v6068_v31  ;;  %v6426_v31 = vld [vmem:[#allocation2 + $0xc] sm:$0xe]  ;;  %v6427_v24 = vld [vmem:[#allocation2 + $0x18] sm:$0xe] }
 0x4c9   :  { %v6074_v9 = vrot.slane %v6073_v63, 4  ;;  %v6055_v26 = vsel %vm13103_vm11, %v6050_v58, %v6054_v59  ;;  %v6100_v41 = vshll.u32 %v11667_v33, 16  ;;  %v6492_v6 = vrot.slane %v13886_v1, 5  ;;  %v11603_v63 = vld [vmem:[#allocation3 + $0x188] sm:$0xff]   ;;  %v14851_v33 = vld [vmem:[#allocation16_spill] sm:$0xff] }
 0x4ca   :  { %10680 = vmatmul.mubr.bf16.gmra.mrb[40].mxu1 %v9323_v30  ;;  %v9325_v44 = vcombine.low %v6045_v57, %v6055_v26  ;;  %v6088_v16 = vrot.slane %v6087_v55, 4  ;;  %v6097_v34 = vor.u32 %v6096_v56, %v6092_v13  ;;  %v6495_v18 = vrot.slane %v13890_v29, 5  ;;  %v11605_v57 = vld [vmem:[#allocation3 + $0x198] sm:$0xff]   ;;  %v14844_v55 = vld [vmem:[#allocation10_spill] sm:$0xff] }
 0x4cb   :  { %10683 = vmatprep.mubr.bf16.mxu1 %v9324_v3  ;;  %v6079_v45 = vsel %vm13103_vm11, %v6074_v9, %v6078_v5  ;;  %v6102_v10 = vrot.slane %v6100_v41, 5  ;;  %v6494_v60 = vrot.slane %v6492_v6, 4  ;;  %v9336_v12 = vrot.slane %v6426_v31, 9  ;;  %v11668_v3 = vld [vmem:[#allocation2 + $0x1c] sm:$0xf]  ;;  %v14850_v26 = vld [vmem:[#allocation14_spill] sm:$0xff] }
 0x4cc   :  { %v9326_v46 = vcombine.low %v6069_v14, %v6079_v45  ;;  %v6093_v30 = vsel %vm13103_vm11, %v6088_v16, %v6092_v13  ;;  %v6098_v52 = vrot.slane %v6097_v34, 4  ;;  %v6499_v36 = vrot.slane %v11668_v3, 5  ;;  %v14842_v5 = vld [vmem:[#allocation9_spill] sm:$0xff]  ;;  %v14845_v13 = vld [vmem:[#allocation12_spill] sm:$0xff]  ;;  %v14853_v45 = vld [vmem:[#allocation15_spill] sm:$0xff] }
 0x4cd   :  { %v6496_v40 = vsel %vm13470_vm14, %v6494_v60, %v6495_v18  ;;  %v6493_v29 = vsel %vm13470_vm14, %v9336_v12, %v6492_v6  ;;  %v6502_v28 = vrot.slane %v13894_v43, 5  ;;  %v9337_v15 = vrot.slane %v6427_v24, 9  ;;  %v11604_v43 = vld [vmem:[#allocation3 + $0x190] sm:$0xff]   ;;  %v11606_v14 = vld [vmem:[#allocation3 + $0x1a0] sm:$0xff]   ;;  %v14856_v16 = vld [vmem:[#allocation18_spill] sm:$0xff] }
 0x4ce   :  { %v6103_v1 = vsel %vm13103_vm11, %v6098_v52, %v6102_v10  ;;  %v9352_v49 = vcombine.low %v6493_v29, %v6496_v40  ;;  %v6501_v53 = vrot.slane %v6499_v36, 4  ;;  %v14841_v59 = vcombine.low %v13686_v27, %v13698_v35  ;;  %v11607_v27 = vld [vmem:[#allocation3 + $0x1a8] sm:$0xff]   ;;  %v14847_v35 = vld [vmem:[#allocation11_spill] sm:$0xff]  ;;  %v14854_v6 = vld [vmem:[#allocation17_spill] sm:$0xff] }
 0x4cf   :  { %v9327_v38 = vcombine.low %v6093_v30, %v6103_v1  ;;  %v6500_v23 = vsel %vm13470_vm14, %v9337_v15, %v6499_v36  ;;  %v14843_v58 = vcombine.low %v13693_v7, %v14842_v5  ;;  %v14846_v56 = vcombine.low %v14844_v55, %v14845_v13  ;;  %v11608_v7 = vld [vmem:[#allocation3 + $0x1b0] sm:$0xff]   ;;  %v11612_v10 = vld [vmem:[#allocation3 + $0x1c0] sm:$0xff]   ;;  %v14859_v31 = vld [vmem:[#allocation20_spill] sm:$0xff] }
 0x4d0   :  { %v6503_v4 = vsel %vm13470_vm14, %v6501_v53, %v6502_v28  ;;  %v14852_v41 = vcombine.low %v14850_v26, %v14851_v33  ;;  %v14857_v34 = vld [vmem:[#allocation19_spill] sm:$0xff]  ;;  %v14860_v60 = vld [vmem:[#allocation21_spill] sm:$0xff]  ;;  %v14862_v52 = vld [vmem:[#allocation22_spill] sm:$0xff] }
 0x4d1   :  { %v9353_v11 = vcombine.low %v6500_v23, %v6503_v4  ;;  %v14858_v18 = vcombine.low %v14856_v16, %v14857_v34  ;;  %v14861_v30 = vcombine.low %v14859_v31, %v14860_v60  ;;  %v14863_v12 = vld [vmem:[#allocation23_spill] sm:$0xff]  ;;  %v14865_v1 = vld [vmem:[#allocation24_spill] sm:$0xff]  ;;  %v14866_v3 = vld [vmem:[#allocation25_spill] sm:$0xff] }
 0x4d2   :  { %10684 = vmatmul.mubr.bf16.gmra.mrb[44].mxu1 %v9325_v44  ;;  %v11609_v44 = vld [vmem:[#allocation3 + $0x1b8] sm:$0xff]   ;;  %v14864_v40 = vcombine.low %v14862_v52, %v14863_v12  ;;  %v14867_v36 = vcombine.low %v14865_v1, %v14866_v3  ;;  %v14869_v29 = vld [vmem:[#allocation27_spill] sm:$0xff]  ;;  %v14872_v24 = vld [vmem:[#allocation29_spill] sm:$0xff] }
 0x4d3   :  { %10687 = vmatprep.mubr.bf16.mxu1 %v9326_v46  ;;  %v14855_v46 = vcombine.low %v14853_v45, %v14854_v6  ;;  %v14871_v28 = vld [vmem:[#allocation28_spill] sm:$0xff]  ;;  %v14874_v15 = vld [vmem:[#allocation30_spill] sm:$0xff]  ;;  %v14875_v4 = vld [vmem:[#allocation31_spill] sm:$0xff] }
 0x4d4   :  { %v14873_v53 = vcombine.low %v14871_v28, %v14872_v24  ;;  %v14876_v23 = vcombine.low %v14874_v15, %v14875_v4  ;;  %v11615_v5 = vld [vmem:[#allocation3 + $0x1c8] sm:$0xff]   ;;  %v11618_v55 = vld [vmem:[#allocation3 + $0x1d0] sm:$0xff]   ;;  %v7311_v45 = vld [vmem:[#allocation2 + $0x18] sm:$0xf] }
 0x4d5   :  { %v11614_v13 = vld [vmem:[#allocation2 + $0x3c] sm:$0xff]   ;;  %v11630_v26 = vld [vmem:[#allocation3 + $0x1f0] sm:$0xff]   ;;  %v7360_v16 = vshrl.u32 %v7311_v45, 16  ;;  %v7363_v34 = vshll.u32 %v7311_v45, 16  ;;  %v7314_v60 = vld [vmem:[#allocation2 + $0x24] sm:$0xf] }
 0x4d6   :  { %v11620_v33 = vld [vmem:[#allocation2 + $0x6c] sm:$0xff]   ;;  %v11623_v6 = vld [vmem:[#allocation2 + $0x84] sm:$0xff]   ;;  %v7384_v1 = vshrl.u32 %v7314_v60, 16  ;;  %v11626_v3 = vld [vmem:[#allocation2 + $0x9c] sm:$0xff]  }
 0x4d7   :  { %v7365_v52 = vrot.slane %v7363_v34, 5  ;;  %v7317_v28 = vld [vmem:[#allocation2 + $0x30] sm:$0xf]  ;;  %v11628_v24 = vld [vmem:[#allocation2 + $0xa8] sm:$0xff]  }
 0x4d8   :  { %v14882_v15 = vld [vmem:[#allocation35_spill] sm:$0xff] }
 0x4d9   :  { %v7379_v4 = vshll.u32 %v14882_v15, 16  ;;  %v7323_v34 = vld [vmem:[#allocation2 + $0x48] sm:$0xf] }
 0x4da   :  { %10688 = vmatmul.mubr.bf16.gmra.mrb[48].mxu1 %v9327_v38  ;;  %v14868_v38 = vld [vmem:[#allocation26_spill] sm:$0xff] }
 0x4db   :  { %10707 = vmatprep.mubr.bf16.mxu1 %v9352_v49  ;;  %v14870_v49 = vcombine.low %v14868_v38, %v14869_v29  ;;  %v14881_v38 = vld [vmem:[#allocation36_spill] sm:$0xff] }
 0x4dc   :  { %v7393_v29 = vshll.u32 %v14881_v38, 16 }
 0x4e2   :  { %10708 = vmatmul.mubr.bf16.vlgmr.msra.gmra.mrb[20].mxu1 %v9353_v11  ;;  %v11610_v11 = vld [vmem:[#allocation2 + $0x18] sm:$0xff]  }
 0x4e3   :  { %10711 = vmatprep.mubr.bf16.mxu1 %v14841_v59  ;;  %10740 = vmatpush3.bf16.msra.mxu1 %v14266_v0  ;;  %v14848_v0 = vld [vmem:[#allocation13_spill] sm:$0xff] }
 0x4e4   :  { %10741 = vmatprep.subr.bf16.mxu1 %v11603_v63  ;;  %v14849_v9 = vcombine.low %v14847_v35, %v14848_v0  ;;  %v14878_v59 = vld [vmem:[#allocation33_spill] sm:$0xff]  ;;  %v11627_v0 = vld [vmem:[#allocation3 + $0x1e8] sm:$0xff]  }
 0x4e5   :  { %v11617_v35 = vld [vmem:[#allocation2 + $0x54] sm:$0xff]  }
 0x4e7   :  { %10742 = vmatpush3.bf16.msra.mxu1 %v11603_v63  ;;  %v14877_v63 = vld [vmem:[#allocation32_spill] sm:$0xff] }
 0x4e8   :  { %10743 = vmatprep.subr.bf16.mxu1 %v11604_v43 }
 0x4ea   :  { %10712 = vmatmul.mubr.bf16.gmra.mrb[24].mxu1 %v14843_v58  ;;  %v11613_v58 = vld [vmem:[#allocation2 + $0x30] sm:$0xff]  }
 0x4eb   :  { %10715 = vmatprep.mubr.bf16.mxu1 %v14846_v56  ;;  %10744 = vmatpush3.bf16.msra.mxu1 %v11604_v43  ;;  %v14879_v43 = vcombine.low %v14877_v63, %v14878_v59  ;;  %v11621_v56 = vld [vmem:[#allocation3 + $0x1d8] sm:$0xff]   ;;  %v14883_v63 = vld [vmem:[#allocation37_spill] sm:$0xff] }
 0x4ec   :  { %10745 = vmatprep.subr.bf16.mxu1 %v11605_v57  ;;  %v7403_v59 = vshll.u32 %v14883_v63, 16 }
 0x4ef   :  { %10746 = vmatpush3.bf16.msra.mxu1 %v11605_v57  ;;  %v11611_v57 = vld [vmem:[#allocation2 + $0x24] sm:$0xff]  }
 0x4f0   :  { %10747 = vmatprep.subr.bf16.mxu1 %v11606_v14 }
 0x4f2   :  { %10716 = vmatmul.mubr.bf16.gmra.mrb[28].mxu1 %v14849_v9  ;;  %v11619_v9 = vld [vmem:[#allocation2 + $0x60] sm:$0xff]  }
 0x4f3   :  { %10719 = vmatprep.mubr.bf16.mxu1 %v14852_v41  ;;  %10748 = vmatpush3.bf16.msra.mxu1 %v11606_v14  ;;  %v11616_v14 = vld [vmem:[#allocation2 + $0x48] sm:$0xff]   ;;  %v11633_v41 = vld [vmem:[#allocation3 + $0x1f8] sm:$0xff]  }
 0x4f4   :  { %10749 = vmatprep.subr.bf16.mxu1 %v11607_v27 }
 0x4f7   :  { %10750 = vmatpush3.bf16.msra.mxu1 %v11607_v27  ;;  %v11624_v27 = vld [vmem:[#allocation3 + $0x1e0] sm:$0xff]  }
 0x4f8   :  { %10751 = vmatprep.subr.bf16.mxu1 %v11608_v7 }
 0x4fa   :  { %10720 = vmatmul.mubr.bf16.gmra.mrb[32].mxu1 %v14855_v46  ;;  %v11625_v46 = vld [vmem:[#allocation2 + $0x90] sm:$0xff]  }
 0x4fb   :  { %10723 = vmatprep.mubr.bf16.mxu1 %v14858_v18  ;;  %10752 = vmatpush3.bf16.msra.mxu1 %v11608_v7  ;;  %v11622_v7 = vld [vmem:[#allocation2 + $0x78] sm:$0xff]   ;;  %v14880_v18 = vld [vmem:[#allocation34_spill] sm:$0xff] }
 0x4fc   :  { %10753 = vmatprep.subr.bf16.mxu1 %v11609_v44  ;;  %v7373_v31 = vshrl.u32 %v14880_v18, 16 }
 0x4ff   :  { %10754 = vmatpush3.bf16.msra.mxu1 %v11609_v44  ;;  %v14348_v44 = vld [vmem:[#allocation3 + $0x200] sm:$0xff]  }
 0x500   :  { %10787 = vmatprep.subr.bf16.mxu1 %v11612_v10 }
 0x502   :  { %10724 = vmatmul.mubr.bf16.gmra.mrb[36].mxu1 %v14861_v30  ;;  %v7362_v30 = vrot.slane %v7360_v16, 4 }
 0x503   :  { %10727 = vmatprep.mubr.bf16.mxu1 %v14864_v40  ;;  %v7375_v40 = vrot.slane %v7373_v31, 4 }
 0x50a   :  { %10728 = vmatmul.mubr.bf16.gmra.mrb[40].mxu1 %v14867_v36  ;;  %v7387_v36 = vshll.u32 %v7314_v60, 16  ;;  %v14885_v60 = vld [vmem:[#allocation40_spill] sm:$0xff] }
 0x50b   :  { %10731 = vmatprep.mubr.bf16.mxu1 %v14870_v49  ;;  %v7397_v49 = vshrl.u32 %v14881_v38, 16  ;;  %v14376_v38 = vld [vmem:[#allocation2 + $0xd0] sm:$0xf] }
 0x512   :  { %10732 = vmatmul.mubr.bf16.gmra.mrb[44].mxu1 %v14873_v53  ;;  %v7366_v53 = vor.u32 %v7365_v52, %v7362_v30  ;;  %v7441_v30 = vshll.u32 %v14885_v60, 16  ;;  %v7445_v52 = vshrl.u32 %v14885_v60, 16  ;;  %v14888_v60 = vld [vmem:[#allocation41_spill] sm:$0xff] }
 0x513   :  { %10735 = vmatprep.mubr.bf16.mxu1 %v14876_v23 }
 0x51a   :  { %10736 = vmatmul.mubr.bf16.gmra.mrb[48].mxu1 %v14879_v43  ;;  %v7408_v43 = vshrl.u32 %v7317_v28, 16 }
 0x51b   :  { %10755 = vmatprep.mubr.bf16.mxu1 %v11610_v11  ;;  %v7386_v11 = vrot.slane %v7384_v1, 4 }
 0x522   :  { %10756 = vmatmul.mubr.bf16.vlgmr.msra.gmra.mrb[20].mxu1 %v11611_v57  ;;  %v7320_v57 = vld [vmem:[#allocation2 + $0x3c] sm:$0xf] }
 0x523   :  { %10759 = vmatprep.mubr.bf16.mxu1 %v11613_v58  ;;  %10788 = vmatpush3.bf16.msra.mxu1 %v11612_v10  ;;  %v7369_v10 = vshll.u32 %v14880_v18, 16  ;;  %v14360_v58 = vrot.slane %v7393_v29, 5  ;;  %v11631_v18 = vld [vmem:[#allocation2 + $0xc0] sm:$0xff]   ;;  %v14378_v29 = vld [vmem:[#allocation2 + $0xd4] sm:$0x1] }
 0x524   :  { %10789 = vmatprep.subr.bf16.mxu1 %v11615_v5  ;;  %v8239_v15 = vrot.slane %v14378_v29, 5 }
 0x525   :  { %v14353_v12 = vrot.slane %v7369_v10, 5 }
 0x527   :  { %10790 = vmatpush3.bf16.msra.mxu1 %v11615_v5  ;;  %v7376_v23 = vor.u32 %v7375_v40, %v14353_v12  ;;  %v7389_v5 = vrot.slane %v7387_v36, 5 }
 0x528   :  { %10791 = vmatprep.subr.bf16.mxu1 %v11618_v55 }
 0x529   :  { %v7390_v45 = vor.u32 %v7389_v5, %v7386_v11 }
 0x52a   :  { %10760 = vmatmul.mubr.bf16.gmra.mrb[24].mxu1 %v11614_v13  ;;  %v7411_v13 = vshll.u32 %v7317_v28, 16  ;;  %v7459_v28 = vshll.u32 %v7323_v34, 16 }
 0x52b   :  { %10763 = vmatprep.mubr.bf16.mxu1 %v11616_v14  ;;  %10792 = vmatpush3.bf16.msra.mxu1 %v11618_v55  ;;  %v7399_v55 = vrot.slane %v7397_v49, 4  ;;  %v7456_v49 = vshrl.u32 %v7323_v34, 16 }
 0x52c   :  { %10793 = vmatprep.subr.bf16.mxu1 %v11621_v56  ;;  %v7413_v16 = vrot.slane %v7411_v13, 5 }
 0x52f   :  { %10794 = vmatpush3.bf16.msra.mxu1 %v11621_v56  ;;  %v14884_v56 = vld [vmem:[#allocation38_spill] sm:$0xff] }
 0x530   :  { %10795 = vmatprep.subr.bf16.mxu1 %v11624_v27  ;;  %v7417_v14 = vshll.u32 %v14884_v56, 16 }
 0x532   :  { %10764 = vmatmul.mubr.bf16.gmra.mrb[28].mxu1 %v11617_v35  ;;  %v7367_v35 = vrot.slane %v7366_v53, 4  ;;  %v14367_v10 = vrot.slane %v7417_v14, 5  ;;  %v8236_v53 = vrot.slane %v14376_v38, 5  ;;  %v14887_v14 = vld [vmem:[#allocation42_spill] sm:$0xff] }
 0x533   :  { %10767 = vmatprep.mubr.bf16.mxu1 %v11619_v9  ;;  %10796 = vmatpush3.bf16.msra.mxu1 %v11624_v27  ;;  %v7421_v27 = vshrl.u32 %v14884_v56, 16  ;;  %v7432_v9 = vshrl.u32 %v7320_v57, 16 }
 0x534   :  { %10797 = vmatprep.subr.bf16.mxu1 %v11627_v0  ;;  %v7372_v40 = vsel %vm13103_vm11, %v7367_v35, %v14353_v12  ;;  %v14886_v12 = vld [vmem:[#allocation39_spill] sm:$0xff]  ;;  %v8238_v5 = vrot.slane %v8236_v53, 4 }
 0x535   :  { %v7423_v31 = vrot.slane %v7421_v27, 4  ;;  %v7427_v11 = vshll.u32 %v14886_v12, 16  ;;  %v7465_v27 = vshll.u32 %v14887_v14, 16 }
 0x537   :  { %10798 = vmatpush3.bf16.msra.mxu1 %v11627_v0  ;;  %v7381_v0 = vrot.slane %v7379_v4, 5  ;;  %v7391_v4 = vrot.slane %v7390_v45, 4  ;;  %v7424_v13 = vor.u32 %v7423_v31, %v14367_v10 }
 0x538   :  { %10799 = vmatprep.subr.bf16.mxu1 %v11630_v26 }
 0x53a   :  { %10768 = vmatmul.mubr.bf16.gmra.mrb[32].mxu1 %v11620_v33  ;;  %v7377_v33 = vrot.slane %v7376_v23, 4 }
 0x53b   :  { %10771 = vmatprep.mubr.bf16.mxu1 %v11622_v7  ;;  %10800 = vmatpush3.bf16.msra.mxu1 %v11630_v26  ;;  %v7435_v26 = vshll.u32 %v7320_v57, 16  ;;  %v11629_v7 = vld [vmem:[#allocation2 + $0xb4] sm:$0xff]   ;;  %v7447_v57 = vrot.slane %v7445_v52, 4  ;;  %v7425_v52 = vrot.slane %v7424_v13, 4 }
 0x53c   :  { %10801 = vmatprep.subr.bf16.mxu1 %v11633_v41  ;;  %v7382_v1 = vsel %vm13103_vm11, %v7377_v33, %v7381_v0  ;;  %v7458_v0 = vrot.slane %v7456_v49, 4  ;;  %v7326_v33 = vld [vmem:[#allocation2 + $0x54] sm:$0xf] }
 0x53d   :  { %v7437_v36 = vrot.slane %v7435_v26, 5  ;;  %v7469_v26 = vshrl.u32 %v14887_v14, 16  ;;  %v9400_v45 = vcombine.low %v7372_v40, %v7382_v1  ;;  %v7480_v1 = vshrl.u32 %v7326_v33, 16 }
 0x53f   :  { %10802 = vmatpush3.bf16.msra.mxu1 %v11633_v41  ;;  %v14364_v41 = vrot.slane %v7403_v59, 5  ;;  %v7471_v49 = vrot.slane %v7469_v26, 4  ;;  %v11635_v26 = vld [vmem:[#allocation3 + $0x208] sm:$0xff]  }
 0x540   :  { %10835 = vmatprep.subr.bf16.mxu1 %v14348_v44 }
 0x542   :  { %10772 = vmatmul.mubr.bf16.gmra.mrb[36].mxu1 %v11623_v6  ;;  %v7400_v6 = vor.u32 %v7399_v55, %v14360_v58  ;;  %v11632_v55 = vld [vmem:[#allocation2 + $0xcc] sm:$0xff]  }
 0x543   :  { %10775 = vmatprep.mubr.bf16.mxu1 %v11625_v46  ;;  %v7410_v46 = vrot.slane %v7408_v43, 4  ;;  %v7443_v43 = vrot.slane %v7441_v30, 5  ;;  %v7451_v30 = vshll.u32 %v14888_v60, 16 }
 0x544   :  { %v7401_v23 = vrot.slane %v7400_v6, 4  ;;  %v7396_v6 = vsel %vm13103_vm11, %v7391_v4, %v14360_v58  ;;  %v7507_v4 = vshll.u32 %v7329_v61, 16 }
 0x545   :  { %v7414_v59 = vor.u32 %v7413_v16, %v7410_v46  ;;  %v7429_v46 = vrot.slane %v7427_v11, 5  ;;  %v7448_v31 = vor.u32 %v7447_v57, %v7443_v43  ;;  %v11670_v57 = vld [vmem:[#allocation2 + $0x50] sm:$0x1] }
 0x546   :  { %v7406_v34 = vsel %vm13103_vm11, %v7401_v23, %v14364_v41  ;;  %v7504_v41 = vshrl.u32 %v7329_v61, 16 }
 0x547   :  { %v7430_v12 = vsel %vm13103_vm11, %v7425_v52, %v7429_v46  ;;  %v7449_v11 = vrot.slane %v7448_v31, 4  ;;  %v11671_v52 = vld [vmem:[#allocation2 + $0x5c] sm:$0x1] }
 0x54a   :  { %10776 = vmatmul.mubr.bf16.gmra.mrb[40].mxu1 %v11626_v3  ;;  %v7434_v3 = vrot.slane %v7432_v9, 4  ;;  %v7461_v9 = vrot.slane %v7459_v28, 5  ;;  %v11669_v28 = vld [vmem:[#allocation2 + $0x58] sm:$0xf] }
 0x54b   :  { %10779 = vmatprep.mubr.bf16.mxu1 %v11628_v24  ;;  %v8080_v24 = vld [vmem:[#allocation2 + $0xcc] sm:$0xe] }
 0x54c   :  { %v9439_v63 = vrot.slane %v8080_v24, 9  ;;  %v7438_v56 = vor.u32 %v7437_v36, %v7434_v3  ;;  %v7483_v3 = vshll.u32 %v7326_v33, 16  ;;  %v7462_v58 = vor.u32 %v7461_v9, %v7458_v0  ;;  %v14889_v9 = vld [vmem:[#allocation47_spill] sm:$0xff] }
 0x54d   :  { %v14403_v36 = vrot.slane %v7465_v27, 5  ;;  %v7489_v24 = vshll.u32 %v11669_v28, 16  ;;  %v7517_v46 = vshrl.u32 %v14889_v9, 16 }
 0x54e   :  { %v14387_v35 = vsel %vm13470_vm14, %v9439_v63, %v8236_v53  ;;  %v7439_v40 = vrot.slane %v7438_v56, 4  ;;  %v9401_v53 = vcombine.low %v7396_v6, %v7406_v34  ;;  %v7453_v63 = vrot.slane %v7451_v30, 5  ;;  %v7332_v56 = vld [vmem:[#allocation2 + $0x6c] sm:$0xf] }
 0x54f   :  { %v7485_v13 = vrot.slane %v7483_v3, 5  ;;  %v7463_v14 = vrot.slane %v7462_v58, 4  ;;  %v7472_v27 = vor.u32 %v7471_v49, %v14403_v36  ;;  %v14413_v0 = vrot.slane %v7489_v24, 5  ;;  %v11672_v49 = vld [vmem:[#allocation2 + $0x70] sm:$0xf] }
 0x550   :  { %v7509_v6 = vrot.slane %v7507_v4, 5  ;;  %v7531_v31 = vshll.u32 %v7332_v56, 16  ;;  %v7541_v24 = vshrl.u32 %v11672_v49, 16 }
 0x551   :  { %v7468_v3 = vsel %vm13103_vm11, %v7463_v14, %v14403_v36  ;;  %v7473_v58 = vrot.slane %v7472_v27, 4 }
 0x552   :  { %10780 = vmatmul.mubr.bf16.gmra.mrb[44].mxu1 %v11629_v7  ;;  %v14392_v7 = vsel %vm13470_vm14, %v8238_v5, %v8239_v15  ;;  %v7493_v15 = vshrl.u32 %v11669_v28, 16  ;;  %v7475_v5 = vshll.u32 %v11670_v57, 16  ;;  %v7537_v28 = vshll.u32 %v11672_v49, 16 }
 0x553   :  { %10783 = vmatprep.mubr.bf16.mxu1 %v11631_v18  ;;  %v9455_v16 = vcombine.low %v14387_v35, %v14392_v7  ;;  %v7415_v18 = vrot.slane %v7414_v59, 4  ;;  %v7444_v59 = vsel %vm13103_vm11, %v7439_v40, %v7443_v43  ;;  %v7454_v43 = vsel %vm13103_vm11, %v7449_v11, %v7453_v63 }
 0x554   :  { %v7495_v33 = vrot.slane %v7493_v15, 4  ;;  %v9403_v60 = vcombine.low %v7444_v59, %v7454_v43  ;;  %v7477_v30 = vrot.slane %v7475_v5, 5  ;;  %v7499_v40 = vshll.u32 %v11671_v52, 16  ;;  %v11636_v15 = vld [vmem:[#allocation3 + $0x210] sm:$0xff]   ;;  %v11673_v5 = vld [vmem:[#allocation2 + $0x7c] sm:$0xf] }
 0x555   :  { %v7420_v23 = vsel %vm13103_vm11, %v7415_v18, %v14367_v10  ;;  %v7513_v10 = vshll.u32 %v14889_v9, 16  ;;  %v7528_v18 = vshrl.u32 %v7332_v56, 16  ;;  %v7533_v11 = vrot.slane %v7531_v31, 5  ;;  %v11674_v56 = vld [vmem:[#allocation2 + $0x68] sm:$0x1] }
 0x556   :  { %v9402_v34 = vcombine.low %v7420_v23, %v7430_v12  ;;  %v7519_v23 = vrot.slane %v7517_v46, 4  ;;  %v7501_v57 = vrot.slane %v7499_v40, 5  ;;  %v7561_v36 = vshll.u32 %v11673_v5, 16  ;;  %v7341_v43 = vld [vmem:[#allocation2 + $0x90] sm:$0xf] }
 0x557   :  { %v14424_v4 = vrot.slane %v7513_v10, 5  ;;  %v7530_v12 = vrot.slane %v7528_v18, 4  ;;  %v7523_v14 = vshll.u32 %v11674_v56, 16  ;;  %v14428_v27 = vrot.slane %v7537_v28, 5  ;;  %v7338_v10 = vld [vmem:[#allocation2 + $0x84] sm:$0xf] }
 0x558   :  { %v7543_v9 = vrot.slane %v7541_v24, 4  ;;  %v11675_v31 = vld [vmem:[#allocation2 + $0x74] sm:$0x1]  ;;  %v7600_v28 = vshrl.u32 %v7341_v43, 16  ;;  %v7603_v24 = vshll.u32 %v7341_v43, 16  ;;  %v11639_v43 = vld [vmem:[#allocation3 + $0x228] sm:$0xff]  }
 0x559   :  { %v7520_v46 = vor.u32 %v7519_v23, %v14424_v4  ;;  %v7534_v18 = vor.u32 %v7533_v11, %v7530_v12  ;;  %v7525_v23 = vrot.slane %v7523_v14, 5  ;;  %v11638_v12 = vld [vmem:[#allocation3 + $0x220] sm:$0xff]  }
 0x55a   :  { %10784 = vmatmul.mubr.bf16.gmra.mrb[48].mxu1 %v11632_v55  ;;  %v7482_v55 = vrot.slane %v7480_v1, 4  ;;  %v7335_v1 = vld [vmem:[#allocation2 + $0x78] sm:$0xf]  ;;  %v7544_v49 = vor.u32 %v7543_v9, %v14428_v27  ;;  %v7602_v9 = vrot.slane %v7600_v28, 4 }
 0x55b   :  { %10803 = vmatprep.mubr.bf16.mxu1 %v9400_v45  ;;  %v7506_v45 = vrot.slane %v7504_v41, 4  ;;  %v7552_v63 = vshrl.u32 %v7335_v1, 16  ;;  %v7535_v11 = vrot.slane %v7534_v18, 4 }
 0x55c   :  { %v7486_v61 = vor.u32 %v7485_v13, %v7482_v55  ;;  %v7565_v55 = vshrl.u32 %v11673_v5, 16  ;;  %v7478_v13 = vsel %vm13103_vm11, %v7473_v58, %v7477_v30  ;;  %v7579_v58 = vshll.u32 %v7338_v10, 16 }
 0x55d   :  { %v7510_v41 = vor.u32 %v7509_v6, %v7506_v45  ;;  %v7554_v52 = vrot.slane %v7552_v63, 4 }
 0x55e   :  { %v7487_v59 = vrot.slane %v7486_v61, 4  ;;  %v7547_v61 = vshll.u32 %v11675_v31, 16  ;;  %v7567_v40 = vrot.slane %v7565_v55, 4  ;;  %v11677_v55 = vld [vmem:[#allocation2 + $0x88] sm:$0xf]  ;;  %v7540_v31 = vsel %vm13103_vm11, %v7535_v11, %v14428_v27 }
 0x55f   :  { %v7511_v6 = vrot.slane %v7510_v41, 4  ;;  %v7521_v41 = vrot.slane %v7520_v46, 4  ;;  %v7589_v56 = vshrl.u32 %v11677_v55, 16  ;;  %v7344_v46 = vld [vmem:[#allocation2 + $0x9c] sm:$0xf]  ;;  %v11640_v11 = vld [vmem:[#allocation3 + $0x230] sm:$0xff]  }
 0x560   :  { %v7549_v63 = vrot.slane %v7547_v61, 5  ;;  %v7624_v28 = vshrl.u32 %v7344_v46, 16  ;;  %v11679_v27 = vld [vmem:[#allocation2 + $0xa0] sm:$0xf] }
 0x561   :  { %v7526_v14 = vsel %vm13103_vm11, %v7521_v41, %v7525_v23  ;;  %v7633_v41 = vshll.u32 %v11679_v27, 16  ;;  %v7637_v23 = vshrl.u32 %v11679_v27, 16 }
 0x562   :  { %10804 = vmatmul.mubr.bf16.vlgmr.msra.gmra.mrb[20].mxu1 %v9401_v53  ;;  %v7496_v53 = vor.u32 %v7495_v33, %v14413_v0  ;;  %v9404_v33 = vcombine.low %v7468_v3, %v7478_v13  ;;  %v7492_v3 = vsel %vm13103_vm11, %v7487_v59, %v14413_v0  ;;  %v11676_v0 = vld [vmem:[#allocation2 + $0x80] sm:$0x1]  ;;  %v7585_v13 = vshll.u32 %v11677_v55, 16  ;;  %v11681_v55 = vld [vmem:[#allocation2 + $0x98] sm:$0x1] }
 0x563   :  { %10807 = vmatprep.mubr.bf16.mxu1 %v9402_v34  ;;  %10836 = vmatpush3.bf16.msra.mxu1 %v14348_v44  ;;  %v7555_v44 = vshll.u32 %v7335_v1, 16  ;;  %v11637_v34 = vld [vmem:[#allocation3 + $0x218] sm:$0xff]   ;;  %v7576_v1 = vshrl.u32 %v7338_v10, 16 }
 0x564   :  { %10837 = vmatprep.subr.bf16.mxu1 %v11635_v26  ;;  %v7497_v45 = vrot.slane %v7496_v53, 4 }
 0x565   :  { %v7557_v30 = vrot.slane %v7555_v44, 5  ;;  %v7578_v5 = vrot.slane %v7576_v1, 4  ;;  %v14450_v1 = vrot.slane %v7585_v13, 5  ;;  %v7619_v13 = vshll.u32 %v11681_v55, 16 }
 0x566   :  { %v7502_v53 = vsel %vm13103_vm11, %v7497_v45, %v7501_v57  ;;  %v7545_v57 = vrot.slane %v7544_v49, 4 }
 0x567   :  { %10838 = vmatpush3.bf16.msra.mxu1 %v11635_v26  ;;  %v14431_v26 = vrot.slane %v7561_v36, 5  ;;  %v7558_v44 = vor.u32 %v7557_v30, %v7554_v52  ;;  %v7581_v36 = vrot.slane %v7579_v58, 5  ;;  %v9405_v10 = vcombine.low %v7492_v3, %v7502_v53  ;;  %v7347_v58 = vld [vmem:[#allocation2 + $0xa8] sm:$0xf] }
 0x568   :  { %10839 = vmatprep.subr.bf16.mxu1 %v11636_v15  ;;  %v7591_v3 = vrot.slane %v7589_v56, 4 }
 0x569   :  { %v7568_v59 = vor.u32 %v7567_v40, %v14431_v26  ;;  %v7559_v52 = vrot.slane %v7558_v44, 4  ;;  %v7582_v40 = vor.u32 %v7581_v36, %v7578_v5  ;;  %v11680_v44 = vld [vmem:[#allocation2 + $0x8c] sm:$0x1] }
 0x56a   :  { %10808 = vmatmul.mubr.bf16.gmra.mrb[24].mxu1 %v9403_v60  ;;  %v7516_v60 = vsel %vm13103_vm11, %v7511_v6, %v14424_v4  ;;  %v7605_v4 = vrot.slane %v7603_v24, 5  ;;  %v7627_v24 = vshll.u32 %v7344_v46, 16 }
 0x56b   :  { %10811 = vmatprep.mubr.bf16.mxu1 %v9404_v33  ;;  %10840 = vmatpush3.bf16.msra.mxu1 %v11636_v15  ;;  %v7571_v15 = vshll.u32 %v11676_v0, 16  ;;  %v11678_v33 = vld [vmem:[#allocation2 + $0x94] sm:$0xf]  ;;  %v9406_v18 = vcombine.low %v7516_v60, %v7526_v14  ;;  %v7569_v30 = vrot.slane %v7568_v59, 4  ;;  %v7595_v0 = vshll.u32 %v11680_v44, 16 }
 0x56c   :  { %10841 = vmatprep.subr.bf16.mxu1 %v11637_v34  ;;  %v7609_v45 = vshll.u32 %v11678_v33, 16  ;;  %v7613_v6 = vshrl.u32 %v11678_v33, 16  ;;  %v7606_v49 = vor.u32 %v7605_v4, %v7602_v9  ;;  %v7651_v59 = vshll.u32 %v7347_v58, 16 }
 0x56d   :  { %v7573_v61 = vrot.slane %v7571_v15, 5  ;;  %v7648_v15 = vshrl.u32 %v7347_v58, 16  ;;  %v7564_v5 = vsel %vm13103_vm11, %v7559_v52, %v14431_v26  ;;  %v7583_v36 = vrot.slane %v7582_v40, 4  ;;  %v11641_v26 = vld [vmem:[#allocation3 + $0x238] sm:$0xff]  }
 0x56e   :  { %v7611_v53 = vrot.slane %v7609_v45, 5  ;;  %v7615_v60 = vrot.slane %v7613_v6, 4  ;;  %v7607_v56 = vrot.slane %v7606_v49, 4  ;;  %v7626_v9 = vrot.slane %v7624_v28, 4  ;;  %v11682_v45 = vld [vmem:[#allocation2 + $0xac] sm:$0xf] }
 0x56f   :  { %10842 = vmatpush3.bf16.msra.mxu1 %v11637_v34  ;;  %v7550_v34 = vsel %vm13103_vm11, %v7545_v57, %v7549_v63  ;;  %v7592_v57 = vor.u32 %v7591_v3, %v14450_v1  ;;  %v7629_v4 = vrot.slane %v7627_v24, 5  ;;  %v14458_v14 = vrot.slane %v7633_v41, 5  ;;  %v11683_v3 = vld [vmem:[#allocation2 + $0xa4] sm:$0x1]  ;;  %v7353_v28 = vld [vmem:[#allocation2 + $0xc0] sm:$0xf] }
 0x570   :  { %10843 = vmatprep.subr.bf16.mxu1 %v11638_v12  ;;  %v9407_v63 = vcombine.low %v7540_v31, %v7550_v34  ;;  %v7639_v33 = vrot.slane %v7637_v23, 4  ;;  %v7657_v6 = vshll.u32 %v11682_v45, 16  ;;  %v7653_v31 = vrot.slane %v7651_v59, 5 }
 0x571   :  { %v7661_v34 = vshrl.u32 %v11682_v45, 16  ;;  %v7621_v52 = vrot.slane %v7619_v13, 5  ;;  %v7593_v40 = vrot.slane %v7592_v57, 4  ;;  %v7630_v58 = vor.u32 %v7629_v4, %v7626_v9  ;;  %v11684_v13 = vld [vmem:[#allocation2 + $0xb0] sm:$0x1] }
 0x572   :  { %10812 = vmatmul.mubr.bf16.gmra.mrb[28].mxu1 %v9405_v10  ;;  %v7616_v10 = vor.u32 %v7615_v60, %v7611_v53  ;;  %v7643_v49 = vshll.u32 %v11683_v3, 16  ;;  %v7612_v24 = vsel %vm13103_vm11, %v7607_v56, %v7611_v53  ;;  %v7640_v27 = vor.u32 %v7639_v33, %v14458_v14  ;;  %v11685_v56 = vld [vmem:[#allocation2 + $0xb8] sm:$0xf] }
 0x573   :  { %10815 = vmatprep.mubr.bf16.mxu1 %v9406_v18  ;;  %10844 = vmatpush3.bf16.msra.mxu1 %v11638_v12  ;;  %v7574_v12 = vsel %vm13103_vm11, %v7569_v30, %v7573_v61  ;;  %v7650_v18 = vrot.slane %v7648_v15, 4  ;;  %v7597_v61 = vrot.slane %v7595_v0, 5  ;;  %v7350_v30 = vld [vmem:[#allocation2 + $0xb4] sm:$0xf]  ;;  %v7659_v41 = vrot.slane %v7657_v6, 5 }
 0x574   :  { %10845 = vmatprep.subr.bf16.mxu1 %v11639_v43  ;;  %v9408_v46 = vcombine.low %v7564_v5, %v7574_v12  ;;  %v7617_v60 = vrot.slane %v7616_v10, 4  ;;  %v7672_v44 = vshrl.u32 %v7350_v30, 16  ;;  %v7675_v0 = vshll.u32 %v7350_v30, 16  ;;  %v7356_v10 = vld [vmem:[#allocation2 + $0xcc] sm:$0xf] }
 0x575   :  { %v7654_v23 = vor.u32 %v7653_v31, %v7650_v18  ;;  %v7696_v59 = vshrl.u32 %v7353_v28, 16  ;;  %v7631_v53 = vrot.slane %v7630_v58, 4  ;;  %v7641_v55 = vrot.slane %v7640_v27, 4 }
 0x576   :  { %v7622_v15 = vsel %vm13103_vm11, %v7617_v60, %v7621_v52  ;;  %v7667_v57 = vshll.u32 %v11684_v13, 16  ;;  %v7681_v9 = vshll.u32 %v11685_v56, 16  ;;  %v7685_v4 = vshrl.u32 %v11685_v56, 16 }
 0x577   :  { %10846 = vmatpush3.bf16.msra.mxu1 %v11639_v43  ;;  %v7588_v43 = vsel %vm13103_vm11, %v7583_v36, %v14450_v1  ;;  %v7598_v1 = vsel %vm13103_vm11, %v7593_v40, %v7597_v61  ;;  %v9410_v12 = vcombine.low %v7612_v24, %v7622_v15  ;;  %v7645_v36 = vrot.slane %v7643_v49, 5 }
 0x578   :  { %10847 = vmatprep.subr.bf16.mxu1 %v11640_v11  ;;  %v9409_v5 = vcombine.low %v7588_v43, %v7598_v1  ;;  %v7655_v33 = vrot.slane %v7654_v23, 4  ;;  %v7674_v6 = vrot.slane %v7672_v44, 4  ;;  %v7698_v18 = vrot.slane %v7696_v59, 4  ;;  %v11687_v23 = vld [vmem:[#allocation2 + $0xbc] sm:$0x1] }
 0x579   :  { %v7720_v30 = vshrl.u32 %v7356_v10, 16  ;;  %v7729_v43 = vshll.u32 %v14376_v38, 16  ;;  %v7733_v40 = vshrl.u32 %v14376_v38, 16  ;;  %v7636_v58 = vsel %vm13103_vm11, %v7631_v53, %v14458_v14  ;;  %v11688_v53 = vld [vmem:[#allocation2 + $0xc8] sm:$0x1] }
 0x57a   :  { %10816 = vmatmul.mubr.bf16.gmra.mrb[32].mxu1 %v9407_v63  ;;  %v7663_v63 = vrot.slane %v7661_v34, 4  ;;  %v11686_v34 = vld [vmem:[#allocation2 + $0xc4] sm:$0xf]  ;;  %v7646_v3 = vsel %vm13103_vm11, %v7641_v55, %v7645_v36  ;;  %v7669_v49 = vrot.slane %v7667_v57, 5  ;;  %v7660_v24 = vsel %vm13103_vm11, %v7655_v33, %v7659_v41 }
 0x57b   :  { %10819 = vmatprep.mubr.bf16.mxu1 %v9408_v46  ;;  %10848 = vmatpush3.bf16.msra.mxu1 %v11640_v11  ;;  %v7699_v11 = vshll.u32 %v7353_v28, 16  ;;  %v7677_v46 = vrot.slane %v7675_v0, 5  ;;  %v7705_v61 = vshll.u32 %v11686_v34, 16  ;;  %v7709_v52 = vshrl.u32 %v11686_v34, 16 }
 0x57c   :  { %10849 = vmatprep.subr.bf16.mxu1 %v11641_v26  ;;  %v7664_v45 = vor.u32 %v7663_v63, %v7659_v41  ;;  %v7683_v28 = vrot.slane %v7681_v9, 5  ;;  %v7687_v27 = vrot.slane %v7685_v4, 4  ;;  %v7691_v63 = vshll.u32 %v11687_v23, 16 }
 0x57d   :  { %v7701_v31 = vrot.slane %v7699_v11, 5  ;;  %v7678_v60 = vor.u32 %v7677_v46, %v7674_v6  ;;  %v7707_v1 = vrot.slane %v7705_v61, 5  ;;  %v7711_v38 = vrot.slane %v7709_v52, 4 }
 0x57e   :  { %v7665_v44 = vrot.slane %v7664_v45, 4  ;;  %v7722_v15 = vrot.slane %v7720_v30, 4  ;;  %v7731_v11 = vrot.slane %v7729_v43, 5  ;;  %v7735_v14 = vrot.slane %v7733_v40, 4 }
 0x57f   :  { %10850 = vmatpush3.bf16.msra.mxu1 %v11641_v26  ;;  %v7723_v26 = vshll.u32 %v7356_v10, 16  ;;  %v7702_v0 = vor.u32 %v7701_v31, %v7698_v18  ;;  %v7715_v36 = vshll.u32 %v11688_v53, 16  ;;  %v7679_v41 = vrot.slane %v7678_v60, 4  ;;  %v14893_v60 = vld [vmem:[#allocation45_spill] sm:$0xff]  ;;  %v14908_v53 = vld [vmem:[#allocation55_spill] sm:$0xff] }
 0x580   :  { %v7688_v13 = vor.u32 %v7687_v27, %v7683_v28  ;;  %v7712_v56 = vor.u32 %v7711_v38, %v7707_v1  ;;  %v7693_v9 = vrot.slane %v7691_v63, 5  ;;  %v7736_v10 = vor.u32 %v7735_v14, %v7731_v11  ;;  %v14894_v27 = vld [vmem:[#allocation46_spill] sm:$0xff]  ;;  %v14896_v63 = vld [vmem:[#allocation48_spill] sm:$0xff]  ;;  %v14900_v38 = vld [vmem:[#allocation51_spill] sm:$0xff] }
 0x581   :  { %v7725_v59 = vrot.slane %v7723_v26, 5  ;;  %v7703_v57 = vrot.slane %v7702_v0, 4  ;;  %v7739_v33 = vshll.u32 %v14378_v29, 16  ;;  %v7717_v45 = vrot.slane %v7715_v36, 5  ;;  %v14905_v14 = vld [vmem:[#allocation54_spill] sm:$0xff]  ;;  %v14909_v36 = vld [vmem:[#allocation56_spill] sm:$0xff] }
 0x582   :  { %10820 = vmatmul.mubr.bf16.gmra.mrb[36].mxu1 %v9409_v5  ;;  %v9411_v5 = vcombine.low %v7636_v58, %v7646_v3  ;;  %v7684_v6 = vsel %vm13103_vm11, %v7679_v41, %v7683_v28  ;;  %v7689_v46 = vrot.slane %v7688_v13, 4  ;;  %v7713_v31 = vrot.slane %v7712_v56, 4  ;;  %v14891_v28 = vld [vmem:[#allocation44_spill] sm:$0xff]  ;;  %v14911_v41 = vld [vmem:[#allocation57_spill] sm:$0xff]  ;;  %v14914_v56 = vld [vmem:[#allocation59_spill] sm:$0xff] }
 0x583   :  { %10823 = vmatprep.mubr.bf16.mxu1 %v9410_v12  ;;  %v7670_v12 = vsel %vm13103_vm11, %v7665_v44, %v7669_v49  ;;  %v7726_v4 = vor.u32 %v7725_v59, %v7722_v15  ;;  %v7708_v18 = vsel %vm13103_vm11, %v7703_v57, %v7707_v1  ;;  %v7737_v52 = vrot.slane %v7736_v10, 4  ;;  %v14890_v49 = vld [vmem:[#allocation43_spill] sm:$0xff]  ;;  %v14897_v44 = vld [vmem:[#allocation49_spill] sm:$0xff]  ;;  %v14899_v1 = vld [vmem:[#allocation50_spill] sm:$0xff] }
 0x584   :  { %v9412_v55 = vcombine.low %v7660_v24, %v7670_v12  ;;  %v7694_v34 = vsel %vm13103_vm11, %v7689_v46, %v7693_v9  ;;  %v7741_v30 = vrot.slane %v7739_v33, 5  ;;  %v7718_v43 = vsel %vm13103_vm11, %v7713_v31, %v7717_v45  ;;  %v14913_v57 = vld [vmem:[#allocation58_spill] sm:$0xff] }
 0x585   :  { %v7727_v61 = vrot.slane %v7726_v4, 4  ;;  %v9413_v26 = vcombine.low %v7684_v6, %v7694_v34  ;;  %v9414_v29 = vcombine.low %v7708_v18, %v7718_v43  ;;  %v14892_v24 = vcombine.low %v14890_v49, %v14891_v28  ;;  %v9470_v6 = vld [vmem:[%s14687_s0 + $0x79] sm:$0xff]  ;;  %v9468_v31 = vld [vmem:[%s14687_s0 + $0x61] sm:$0xff] }
 0x586   :  { %v7742_v58 = vsel %vm13103_vm11, %v7737_v52, %v7741_v30  ;;  %v14895_v23 = vcombine.low %v14893_v60, %v14894_v27  ;;  %v14898_v0 = vcombine.low %v14896_v63, %v14897_v44  ;;  %v14901_v15 = vcombine.low %v14899_v1, %v14900_v38  ;;  %v9471_v52 = vld [vmem:[%s14687_s0 + $0x81] sm:$0xff]  ;;  %v9474_v63 = vld [vmem:[%s14687_s0 + $0xa9] sm:$0xff]  ;;  %v9472_v1 = vld [vmem:[%s14687_s0 + $0x91] sm:$0xff] }
 0x587   :  { %v7732_v40 = vsel %vm13103_vm11, %v7727_v61, %v7731_v11  ;;  %v14903_v59 = vcombine.low %v14089_v32, %v14902_v51  ;;  %v14904_v11 = vld [vmem:[#allocation53_spill] sm:$0xff]  ;;  %v14907_v12 = vcombine.low %v14112_v17, %v14116_v19  ;;  %v14912_v13 = vcombine.low %v14133_v62, %v14911_v41  ;;  %v14545_v62 = vld [vmem:[%s14691_s4] ss:$0 sm:$0xff]  ;;  %s11741_s4 = smov [#allocation6]  }
 0x588   :  { %v9415_v3 = vcombine.low %v7732_v40, %v7742_v58  ;;  %v14915_v32 = vcombine.low %v14913_v57, %v14914_v56  ;;  %v14916_v17 = vcombine.low %v14187_v42, %v14191_v2  ;;  %v14917_v19 = vcombine.low %v14202_v39, %v14206_v47  ;;  %v9465_v39 = vld [vmem:[%s14687_s0 + $0x39] sm:$0xff]  ;;  %v9475_v51 = vld [vmem:[%s14687_s0 + $0xb1] sm:$0xff]  ;;  %s8735_s29 = sshll.u32 %s11741_s4, 4  ;;  %s8736_s29 = int_to_ptr.vmem [resolvable:$true] %s8735_s29 }
 0x589   :  { %s11711_s30 = scalar_lea.vmem %s8736_s29, 4096  ;;  %p11716_p9 = scmp.lt.s32.totalorder %s8736_s29, %s8736_s29 }
 0x58a   :  { %10824 = vmatmul.mubr.bf16.gmra.mrb[40].mxu1 %v9411_v5  ;;  %v14906_v5 = vcombine.low %v14904_v11, %v14905_v14  ;;  %p11712_p8 = scmp.ne.s32.totalorder %s8736_s29, %s11711_s30  ;;  %p11717_p10 = scmp.lt.s32.totalorder %s11711_s30, %s11711_s30 }
 0x58b   :  { %10827 = vmatprep.mubr.bf16.mxu1 %v9412_v55  ;;  %v14910_v55 = vcombine.low %v14908_v53, %v14909_v36 }
 0x58c   :  { %p11718_p11 = por %p11717_p10, %p11716_p9 }
 0x58e   :  { %p11719_p12 = pnand %p11718_p11, %p11712_p8 }
 0x592   :  { %10828 = vmatmul.mubr.bf16.gmra.mrb[44].mxu1 %v9413_v26 }
 0x593   :  { %10831 = vmatprep.mubr.bf16.mxu1 %v9414_v29  ;;  %v9469_v29 = vld [vmem:[%s14687_s0 + $0x69] sm:$0xff] }
 0x59a   :  { %10832 = vmatmul.mubr.bf16.gmra.mrb[48].mxu1 %v9415_v3 }
 0x59b   :  { %10851 = vmatprep.mubr.bf16.mxu1 %v14892_v24 }
 0x5a2   :  { %10852 = vmatmul.mubr.bf16.vlgmr.msra.gmra.mrb[20].mxu1 %v14895_v23 }
 0x5a3   :  { %10855 = vmatprep.mubr.bf16.mxu1 %v14898_v0 }
 0x5aa   :  { %10856 = vmatmul.mubr.bf16.gmra.mrb[24].mxu1 %v14901_v15 }
 0x5ab   :  { %10859 = vmatprep.mubr.bf16.mxu1 %v14903_v59 }
 0x5b2   :  { %10860 = vmatmul.mubr.bf16.gmra.mrb[28].mxu1 %v14906_v5  ;;  %v9473_v5 = vld [vmem:[%s14687_s0 + $0x99] sm:$0xff] }
 0x5b3   :  { %10863 = vmatprep.mubr.bf16.mxu1 %v14907_v12 }
 0x5ba   :  { %10864 = vmatmul.mubr.bf16.gmra.mrb[32].mxu1 %v14910_v55 }
 0x5bb   :  { %10867 = vmatprep.mubr.bf16.mxu1 %v14912_v13 }
 0x5c2   :  { %10868 = vmatmul.mubr.bf16.gmra.mrb[36].mxu1 %v14915_v32 }
 0x5c3   :  { %10871 = vmatprep.mubr.bf16.mxu1 %v9450_v22 }
 0x5ca   :  { %10872 = vmatmul.mubr.bf16.gmra.mrb[40].mxu1 %v9451_v54 }
 0x5cb   :  { %10875 = vmatprep.mubr.bf16.mxu1 %v9452_v8 }
 0x5d2   :  { %10876 = vmatmul.mubr.bf16.gmra.mrb[44].mxu1 %v14916_v17  ;;  %v9478_v17 = vld [vmem:[%s14687_s0 + $0xd9] sm:$0xff] }
 0x5d3   :  { %10879 = vmatprep.mubr.bf16.mxu1 %v14917_v19 }
 0x5da   :  { %10880 = vmatmul.mubr.bf16.gmra.mrb[48].mxu1 %v9455_v16 }
 0x675   :  { %v10853_v25 = vpop.f32.mrb[20].mxu1 }
 0x676   :  { %v8604_v37 = vadd.f32 %v10853_v25, %v14545_v62  ;;  %v8404_v22 = vpop.f32.mrb[21].mxu1 }
 0x677   :  { %v8602_v20 = vadd.f32 %v14545_v62, %v8404_v22  ;;  %v10854_v54 = vpop.f32.mrb[22].mxu1 }
 0x678   :  { %v8636_v8 = vadd.f32 %v9466_v21, %v8604_v37  ;;  %v8605_v42 = vadd.f32 %v10854_v54, %v14545_v62  ;;  %v8407_v2 = vpop.f32.mrb[23].mxu1  ;;  %v9476_v21 = vld [vmem:[%s14687_s0 + $0xc1] sm:$0xff] }
 0x679   :  { %v8634_v47 = vadd.f32 %v9464_v48, %v8602_v20  ;;  %v8603_v35 = vadd.f32 %v14545_v62, %v8407_v2  ;;  %v9479_v48 = vld [vmem:[%s14687_s0 + $0xe1] sm:$0xff] }
 0x67a   :  { %v8668_v7 = vmax.f32 %v8636_v8, 0.0  ;;  %v8637_v16 = vadd.f32 %v9467_v50, %v8605_v42  ;;  %v9477_v8 = vld [vmem:[%s14687_s0 + $0xc9] sm:$0xff] }
 0x67b   :  { %v8666_v9 = vmax.f32 %v8634_v47, 0.0  ;;  %v8635_v4 = vadd.f32 %v9465_v39, %v8603_v35 }
 0x67c   :  { %8700 = vst [vmem:[#allocation6 + $0x10] sm:$0xff] %v8668_v7  ;;  %v8669_v10 = vmax.f32 %v8637_v16, 0.0 }
 0x67d   :  { %8698 = vst [vmem:[#allocation6] sm:$0xff] %v8666_v9  ;;  %v8667_v33 = vmax.f32 %v8635_v4, 0.0  ;;  %v10857_v45 = vpop.f32.mrb[24].mxu1 }
 0x67e   :  { %8701 = vst [vmem:[#allocation6 + $0x18] sm:$0xff] %v8669_v10  ;;  %v8608_v46 = vadd.f32 %v10857_v45, %v14545_v62  ;;  %v8420_v18 = vpop.f32.mrb[25].mxu1  ;;  %v9482_v10 = vld [vmem:[%s14687_s0 + $0x109] sm:$0xff] }
 0x67f   :  { %8699 = vst [vmem:[#allocation6 + $0x8] sm:$0xff] %v8667_v33  ;;  %v8606_v34 = vadd.f32 %v14545_v62, %v8420_v18  ;;  %v10858_v61 = vpop.f32.mrb[26].mxu1 }
 0x680   :  { %v8640_v30 = vadd.f32 %v9470_v6, %v8608_v46  ;;  %v8609_v26 = vadd.f32 %v10858_v61, %v14545_v62  ;;  %v8423_v43 = vpop.f32.mrb[27].mxu1  ;;  %v9480_v6 = vld [vmem:[%s14687_s0 + $0xf1] sm:$0xff] }
 0x681   :  { %v8638_v40 = vadd.f32 %v9468_v31, %v8606_v34  ;;  %v8607_v58 = vadd.f32 %v14545_v62, %v8423_v43  ;;  %v9483_v31 = vld [vmem:[%s14687_s0 + $0x111] sm:$0xff] }
 0x682   :  { %v8672_v3 = vmax.f32 %v8640_v30, 0.0  ;;  %v8641_v49 = vadd.f32 %v9471_v52, %v8609_v26  ;;  %v9481_v30 = vld [vmem:[%s14687_s0 + $0xf9] sm:$0xff] }
 0x683   :  { %v8670_v28 = vmax.f32 %v8638_v40, 0.0  ;;  %v8639_v24 = vadd.f32 %v9469_v29, %v8607_v58 }
 0x684   :  { %8704 = vst [vmem:[#allocation6 + $0x30] sm:$0xff] %v8672_v3  ;;  %v8673_v60 = vmax.f32 %v8641_v49, 0.0 }
 0x685   :  { %8702 = vst [vmem:[#allocation6 + $0x20] sm:$0xff] %v8670_v28  ;;  %v8671_v27 = vmax.f32 %v8639_v24, 0.0  ;;  %v10861_v23 = vpop.f32.mrb[28].mxu1 }
 0x686   :  { %8705 = vst [vmem:[#allocation6 + $0x38] sm:$0xff] %v8673_v60  ;;  %v8612_v44 = vadd.f32 %v10861_v23, %v14545_v62  ;;  %v8436_v0 = vpop.f32.mrb[29].mxu1  ;;  %v9486_v60 = vld [vmem:[%s14687_s0 + $0x139] sm:$0xff] }
 0x687   :  { %8703 = vst [vmem:[#allocation6 + $0x28] sm:$0xff] %v8671_v27  ;;  %v8610_v38 = vadd.f32 %v14545_v62, %v8436_v0  ;;  %v10862_v15 = vpop.f32.mrb[30].mxu1 }
 0x688   :  { %v8644_v59 = vadd.f32 %v9474_v63, %v8612_v44  ;;  %v8613_v11 = vadd.f32 %v10862_v15, %v14545_v62  ;;  %v8439_v14 = vpop.f32.mrb[31].mxu1  ;;  %v9484_v63 = vld [vmem:[%s14687_s0 + $0x121] sm:$0xff] }
 0x689   :  { %v8642_v12 = vadd.f32 %v9472_v1, %v8610_v38  ;;  %v8611_v53 = vadd.f32 %v14545_v62, %v8439_v14  ;;  %v9487_v1 = vld [vmem:[%s14687_s0 + $0x141] sm:$0xff] }
 0x68a   :  { %v8676_v36 = vmax.f32 %v8644_v59, 0.0  ;;  %v8645_v55 = vadd.f32 %v9475_v51, %v8613_v11  ;;  %v9485_v59 = vld [vmem:[%s14687_s0 + $0x129] sm:$0xff] }
 0x68b   :  { %v8674_v41 = vmax.f32 %v8642_v12, 0.0  ;;  %v8643_v13 = vadd.f32 %v9473_v5, %v8611_v53 }
 0x68c   :  { %8708 = vst [vmem:[#allocation6 + $0x50] sm:$0xff] %v8676_v36  ;;  %v8677_v57 = vmax.f32 %v8645_v55, 0.0 }
 0x68d   :  { %8706 = vst [vmem:[#allocation6 + $0x40] sm:$0xff] %v8674_v41  ;;  %v8675_v56 = vmax.f32 %v8643_v13, 0.0  ;;  %v10865_v32 = vpop.f32.mrb[32].mxu1 }
 0x68e   :  { %8709 = vst [vmem:[#allocation6 + $0x58] sm:$0xff] %v8677_v57  ;;  %v8616_v19 = vadd.f32 %v10865_v32, %v14545_v62  ;;  %v8452_v25 = vpop.f32.mrb[33].mxu1  ;;  %v9490_v57 = vld [vmem:[%s14687_s0 + $0x169] sm:$0xff] }
 0x68f   :  { %8707 = vst [vmem:[#allocation6 + $0x48] sm:$0xff] %v8675_v56  ;;  %v8614_v37 = vadd.f32 %v14545_v62, %v8452_v25  ;;  %v10866_v22 = vpop.f32.mrb[34].mxu1 }
 0x690   :  { %v8648_v20 = vadd.f32 %v9478_v17, %v8616_v19  ;;  %v8617_v54 = vadd.f32 %v10866_v22, %v14545_v62  ;;  %v8455_v50 = vpop.f32.mrb[35].mxu1  ;;  %v9488_v17 = vld [vmem:[%s14687_s0 + $0x151] sm:$0xff] }
 0x691   :  { %v8646_v42 = vadd.f32 %v9476_v21, %v8614_v37  ;;  %v8615_v2 = vadd.f32 %v14545_v62, %v8455_v50  ;;  %v9491_v21 = vld [vmem:[%s14687_s0 + $0x171] sm:$0xff] }
 0x692   :  { %v8680_v39 = vmax.f32 %v8648_v20, 0.0  ;;  %v8649_v47 = vadd.f32 %v9479_v48, %v8617_v54  ;;  %v9489_v20 = vld [vmem:[%s14687_s0 + $0x159] sm:$0xff] }
 0x693   :  { %v8678_v35 = vmax.f32 %v8646_v42, 0.0  ;;  %v8647_v7 = vadd.f32 %v9477_v8, %v8615_v2 }
 0x694   :  { %8712 = vst [vmem:[#allocation6 + $0x70] sm:$0xff] %v8680_v39  ;;  %v8681_v16 = vmax.f32 %v8649_v47, 0.0 }
 0x695   :  { %8710 = vst [vmem:[#allocation6 + $0x60] sm:$0xff] %v8678_v35  ;;  %v8679_v9 = vmax.f32 %v8647_v7, 0.0  ;;  %v10869_v4 = vpop.f32.mrb[36].mxu1 }
 0x696   :  { %8713 = vst [vmem:[#allocation6 + $0x78] sm:$0xff] %v8681_v16  ;;  %v8620_v33 = vadd.f32 %v10869_v4, %v14545_v62  ;;  %v8468_v45 = vpop.f32.mrb[37].mxu1  ;;  %v9494_v16 = vld [vmem:[%s14687_s0 + $0x199] sm:$0xff] }
 0x697   :  { %8711 = vst [vmem:[#allocation6 + $0x68] sm:$0xff] %v8679_v9  ;;  %v8618_v46 = vadd.f32 %v14545_v62, %v8468_v45  ;;  %v10870_v18 = vpop.f32.mrb[38].mxu1 }
 0x698   :  { %v8652_v34 = vadd.f32 %v9482_v10, %v8620_v33  ;;  %v8621_v61 = vadd.f32 %v10870_v18, %v14545_v62  ;;  %v8471_v52 = vpop.f32.mrb[39].mxu1  ;;  %v9492_v10 = vld [vmem:[%s14687_s0 + $0x181] sm:$0xff] }
 0x699   :  { %v8650_v26 = vadd.f32 %v9480_v6, %v8618_v46  ;;  %v8619_v43 = vadd.f32 %v14545_v62, %v8471_v52  ;;  %v9495_v6 = vld [vmem:[%s14687_s0 + $0x1a1] sm:$0xff] }
 0x69a   :  { %v8684_v29 = vmax.f32 %v8652_v34, 0.0  ;;  %v8653_v40 = vadd.f32 %v9483_v31, %v8621_v61  ;;  %v9493_v34 = vld [vmem:[%s14687_s0 + $0x189] sm:$0xff] }
 0x69b   :  { %v8682_v58 = vmax.f32 %v8650_v26, 0.0  ;;  %v8651_v3 = vadd.f32 %v9481_v30, %v8619_v43 }
 0x69c   :  { %8716 = vst [vmem:[#allocation6 + $0x90] sm:$0xff] %v8684_v29  ;;  %v8685_v49 = vmax.f32 %v8653_v40, 0.0 }
 0x69d   :  { %8714 = vst [vmem:[#allocation6 + $0x80] sm:$0xff] %v8682_v58  ;;  %v8683_v28 = vmax.f32 %v8651_v3, 0.0  ;;  %v10873_v24 = vpop.f32.mrb[40].mxu1 }
 0x69e   :  { %8717 = vst [vmem:[#allocation6 + $0x98] sm:$0xff] %v8685_v49  ;;  %v8624_v27 = vadd.f32 %v10873_v24, %v14545_v62  ;;  %v8484_v23 = vpop.f32.mrb[41].mxu1 }
 0x69f   :  { %8715 = vst [vmem:[#allocation6 + $0x88] sm:$0xff] %v8683_v28  ;;  %v8622_v44 = vadd.f32 %v14545_v62, %v8484_v23  ;;  %v10874_v0 = vpop.f32.mrb[42].mxu1 }
 0x6a0   :  { %v8656_v38 = vadd.f32 %v9486_v60, %v8624_v27  ;;  %v8625_v15 = vadd.f32 %v10874_v0, %v14545_v62  ;;  %v8487_v51 = vpop.f32.mrb[43].mxu1 }
 0x6a1   :  { %v8654_v11 = vadd.f32 %v9484_v63, %v8622_v44  ;;  %v8623_v14 = vadd.f32 %v14545_v62, %v8487_v51 }
 0x6a2   :  { %v8688_v5 = vmax.f32 %v8656_v38, 0.0  ;;  %v8657_v12 = vadd.f32 %v9487_v1, %v8625_v15 }
 0x6a3   :  { %v8686_v53 = vmax.f32 %v8654_v11, 0.0  ;;  %v8655_v36 = vadd.f32 %v9485_v59, %v8623_v14 }
 0x6a4   :  { %8720 = vst [vmem:[#allocation6 + $0xb0] sm:$0xff] %v8688_v5  ;;  %v8689_v55 = vmax.f32 %v8657_v12, 0.0 }
 0x6a5   :  { %8718 = vst [vmem:[#allocation6 + $0xa0] sm:$0xff] %v8686_v53  ;;  %v8687_v41 = vmax.f32 %v8655_v36, 0.0  ;;  %v10877_v13 = vpop.f32.mrb[44].mxu1 }
 0x6a6   :  { %8721 = vst [vmem:[#allocation6 + $0xb8] sm:$0xff] %v8689_v55  ;;  %v8628_v56 = vadd.f32 %v10877_v13, %v14545_v62  ;;  %v8500_v32 = vpop.f32.mrb[45].mxu1 }
 0x6a7   :  { %8719 = vst [vmem:[#allocation6 + $0xa8] sm:$0xff] %v8687_v41  ;;  %v8626_v19 = vadd.f32 %v14545_v62, %v8500_v32  ;;  %v10878_v25 = vpop.f32.mrb[46].mxu1 }
 0x6a8   :  { %v8660_v37 = vadd.f32 %v9490_v57, %v8628_v56  ;;  %v8629_v22 = vadd.f32 %v10878_v25, %v14545_v62  ;;  %v8503_v48 = vpop.f32.mrb[47].mxu1 }
 0x6a9   :  { %v8658_v54 = vadd.f32 %v9488_v17, %v8626_v19  ;;  %v8627_v50 = vadd.f32 %v14545_v62, %v8503_v48 }
 0x6aa   :  { %v8692_v8 = vmax.f32 %v8660_v37, 0.0  ;;  %v8661_v42 = vadd.f32 %v9491_v21, %v8629_v22 }
 0x6ab   :  { %v8690_v2 = vmax.f32 %v8658_v54, 0.0  ;;  %v8659_v39 = vadd.f32 %v9489_v20, %v8627_v50 }
 0x6ac   :  { %8724 = vst [vmem:[#allocation6 + $0xd0] sm:$0xff] %v8692_v8  ;;  %v8693_v47 = vmax.f32 %v8661_v42, 0.0 }
 0x6ad   :  { %8722 = vst [vmem:[#allocation6 + $0xc0] sm:$0xff] %v8690_v2  ;;  %v8691_v35 = vmax.f32 %v8659_v39, 0.0  ;;  %v10881_v7 = vpop.f32.mrb[48].mxu1 }
 0x6ae   :  { %8725 = vst [vmem:[#allocation6 + $0xd8] sm:$0xff] %v8693_v47  ;;  %v8632_v9 = vadd.f32 %v10881_v7, %v14545_v62  ;;  %v8516_v4 = vpop.f32.mrb[49].mxu1 }
 0x6af   :  { %8723 = vst [vmem:[#allocation6 + $0xc8] sm:$0xff] %v8691_v35  ;;  %v8630_v33 = vadd.f32 %v14545_v62, %v8516_v4  ;;  %v10882_v45 = vpop.f32.mrb[50].mxu1 }
 0x6b0   :  { %v8664_v46 = vadd.f32 %v9494_v16, %v8632_v9  ;;  %v8633_v18 = vadd.f32 %v10882_v45, %v14545_v62  ;;  %v8519_v31 = vpop.f32.mrb[51].mxu1 }
 0x6b1   :  { %v8662_v61 = vadd.f32 %v9492_v10, %v8630_v33  ;;  %v8631_v52 = vadd.f32 %v14545_v62, %v8519_v31 }
 0x6b2   :  { %v8696_v30 = vmax.f32 %v8664_v46, 0.0  ;;  %v8665_v26 = vadd.f32 %v9495_v6, %v8633_v18 }
 0x6b3   :  { %v8694_v43 = vmax.f32 %v8662_v61, 0.0  ;;  %v8663_v29 = vadd.f32 %v9493_v34, %v8631_v52 }
 0x6b4   :  { %8728 = vst [vmem:[#allocation6 + $0xf0] sm:$0xff] %v8696_v30  ;;  %v8697_v40 = vmax.f32 %v8665_v26, 0.0 }
 0x6b5   :  { %8726 = vst [vmem:[#allocation6 + $0xe0] sm:$0xff] %v8694_v43  ;;  %v8695_v58 = vmax.f32 %v8663_v29, 0.0 }
 0x6b6   :  { %8729 = vst [vmem:[#allocation6 + $0xf8] sm:$0xff] %v8697_v40 }
 0x6b7   :  { %8727 = vst [vmem:[#allocation6 + $0xe8] sm:$0xff] %v8695_v58 }
 0x6b8   :  { %11722 = shalt.err (!%p11719_p12)
}
 0x6b9   :  { %s11723_s7 = scalar_lea.hbm %s14692_s5, 4096 }
 0x6ba   :  { %p11724_p13 = scmp.ne.s32.totalorder %s14692_s5, %s11723_s7  ;;  %p11727_p0 = scmp.lt.u32.totalorder %s11723_s7, %s14692_s5 }
 0x6bc   :  { %p11729_p1 = pnand %p11727_p0, %p11724_p13 }
 0x6be   :  { %11732 = shalt.err (!%p11729_p1)
}
 0x6bf   :  { %s11742_s12 = smov 128   ;;  %s11743_s3 = smov 8  }
 0x6c0   :  { %8741 = dma.vmem_to_hbm [thread:$0]  %s8736_s29, 4096, %s14692_s5, [#allocation5], %s11742_s12, %s11742_s12, %s11743_s3  }
 0x6c1   :  { %11735 = dma.done.wait [#allocation5], 4096  }
 0x6c2   :  { %11736 = vsyncadd [#allocation5], 4294963200 }
 0x6c3   :  { %8745 = vsyncpa [#allocation4], 1 }
 0x6c4   :  { %8746 = vsyncpa [#allocation5], 1 }

</bundles_post_ra>
